<compile_context>
chip_gen: v7x
topology: tpu7x:2x2x1
jax: 0.10.0
libtpu: 0.0.40
codegen_flags: <defaults>
</compile_context>

<pallas_src>
import functools

import jax
import jax.numpy as jnp
from jax.experimental import pallas as pl
from jax.experimental.pallas import tpu as pltpu

# ---------------- configuration (small shapes consistent with the module) ----
IN_FEATURES = 2            # (x, y) coordinates
OUT_FEATURES = 3           # e.g. RGB
HIDDEN_FEATURES = 32
HIDDEN_LAYERS = 2
MOD_IN_FEATURES = 4
MOD_FEATURES = 32
MOD_HIDDEN_LAYERS = 1
FIRST_OMEGA_0 = 30.0
HIDDEN_OMEGA_0 = 30.0
NUM_HARMONIC = 30                                   # harmonic embedding for x
NUM_MOD_HARMONIC = 4                                # harmonic embedding for modulation input
EMB_FEATURES = IN_FEATURES * NUM_HARMONIC * 2       # 120
MOD_EMB_FEATURES = MOD_IN_FEATURES * NUM_MOD_HARMONIC * 2

B = 2
N = 16 * 16        # 16x16 coordinate grid, flattened


# ---------------- harmonic embedding (glue; standard pytorch3d-style) --------
def harmonic_embedding(x, n_harmonic):
    # freqs = 2**i (logspace, omega0 = 1), output = [sin(x*f...), cos(x*f...)]
    freqs = 2.0 ** jnp.arange(n_harmonic, dtype=jnp.float32)
    emb = x[..., None] * freqs                       # (..., D, n)
    emb = emb.reshape(*x.shape[:-1], x.shape[-1] * n_harmonic)
    return jnp.concatenate([jnp.sin(emb), jnp.cos(emb)], axis=-1)


def harmonic_embedding_channels_first(x, n_harmonic):
    # Same values as harmonic_embedding (element-for-element identical), but
    # emitted directly in the kernel's (B, EMB, N) channels-first layout.
    Bb, Nn, D = x.shape
    freqs = 2.0 ** jnp.arange(n_harmonic, dtype=jnp.float32)
    xt = jnp.transpose(x, (0, 2, 1))                              # (B, D, N)
    arg = xt[:, :, None, :] * freqs[None, None, :, None]          # (B, D, nh, N)
    arg = arg.reshape(Bb, D * n_harmonic, Nn)                     # (B, D*nh, N)
    return jnp.concatenate([jnp.sin(arg), jnp.cos(arg)], axis=1)  # (B, EMB, N)


# ---------------- Pallas kernel: the SIREN + FiLM hot path --------------------
def _siren_kernel(x_ref, scale_ref, shift_ref,
                  w0_ref, b0_ref, wh_ref, bh_ref, wf_ref, bf_ref,
                  o_ref, *, hidden_layers):
    # x_ref:     (1, EMB, N)       harmonic-embedded coords, channels-first
    # scale_ref: (1, L+1, H, 1)    per-batch FiLM scale column per sine layer
    # shift_ref: (1, L+1, H, 1)
    # w0_ref:    (H, EMB)  omega_0 pre-folded     b0_ref: (H, 1)  omega_0 pre-folded
    # wh_ref:    (L, H, H) omega_0 pre-folded     bh_ref: (L, H, 1)
    # wf_ref:    (OUT, H)                         bf_ref: (OUT, 1)
    # o_ref:     (1, OUT, N)  -- lane-dense output (last dim = N, multiple of 128)
    emb = x_ref[0]                                                  # (EMB, N)

    # first sine layer (omega_0 already folded into w0/b0)
    z = jnp.dot(w0_ref[...], emb, preferred_element_type=jnp.float32) + b0_ref[...]
    h = jnp.sin(z * scale_ref[0, 0] + shift_ref[0, 0])              # FiLM + sin

    # hidden sine layers (static unroll; hidden_layers is small)
    for i in range(hidden_layers):
        z = jnp.dot(wh_ref[i], h, preferred_element_type=jnp.float32) + bh_ref[i]
        h = jnp.sin(z * scale_ref[0, i + 1] + shift_ref[0, i + 1])  # FiLM + sin

    # final linear + sin  -> (OUT, N), stored lane-dense
    z = jnp.dot(wf_ref[...], h, preferred_element_type=jnp.float32) + bf_ref[...]
    o_ref[0] = jnp.sin(z)


def siren_pallas(x_emb_cf, scale_k, shift_k, p):
    """x_emb_cf: (B, EMB, N); scale_k/shift_k: (B, L+1, H, 1). Returns (B, OUT, N)."""
    Bb, E, Nn = x_emb_cf.shape
    H = HIDDEN_FEATURES
    L = HIDDEN_LAYERS
    assert Nn % 128 == 0, "point count must be a multiple of 128 for lane-dense stores"

    # Constant-fold omega_0 into the sine layers' weights/biases (param-side).
    w0 = (FIRST_OMEGA_0 * p["w0"]).astype(jnp.float32)               # (H, E)
    b0 = (FIRST_OMEGA_0 * p["b0"])[:, None].astype(jnp.float32)      # (H, 1)
    wh = (HIDDEN_OMEGA_0 * p["wh"]).astype(jnp.float32)              # (L, H, H)
    bh = (HIDDEN_OMEGA_0 * p["bh"])[:, :, None].astype(jnp.float32)  # (L, H, 1)
    wf = p["wf"].astype(jnp.float32)                                 # (OUT, H)
    bf = p["bf"][:, None].astype(jnp.float32)                        # (OUT, 1)

    kernel = functools.partial(_siren_kernel, hidden_layers=L)
    return pl.pallas_call(
        kernel,
        out_shape=jax.ShapeDtypeStruct((Bb, OUT_FEATURES, Nn), jnp.float32),
        grid=(Bb,),
        in_specs=[
            pl.BlockSpec((1, E, Nn), lambda b: (b, 0, 0)),            # embedded coords
            pl.BlockSpec((1, L + 1, H, 1), lambda b: (b, 0, 0, 0)),   # FiLM scale
            pl.BlockSpec((1, L + 1, H, 1), lambda b: (b, 0, 0, 0)),   # FiLM shift
            pl.BlockSpec((H, E), lambda b: (0, 0)),                   # W0 (omega folded)
            pl.BlockSpec((H, 1), lambda b: (0, 0)),                   # b0 (omega folded)
            pl.BlockSpec((L, H, H), lambda b: (0, 0, 0)),             # Wh stacked
            pl.BlockSpec((L, H, 1), lambda b: (0, 0, 0)),             # bh stacked
            pl.BlockSpec((OUT_FEATURES, H), lambda b: (0, 0)),        # Wf
            pl.BlockSpec((OUT_FEATURES, 1), lambda b: (0, 0)),        # bf
        ],
        out_specs=pl.BlockSpec((1, OUT_FEATURES, Nn), lambda b: (b, 0, 0)),
        compiler_params=pltpu.CompilerParams(
            dimension_semantics=("parallel",)),
    )(x_emb_cf, scale_k, shift_k, w0, b0, wh, bh, wf, bf)


# ---------------- mapping networks (tiny; plain-JAX glue) ---------------------
# TODO(synk): MappingNetwork source was not provided; assumed a standard ReLU MLP
# over the harmonic-embedded modulation input with separate scale/shift heads,
# each network emitting num_dimensions=1 -> scale/shift of shape (1, B, H).
def mapping_forward(mp, mod_emb):
    h = mod_emb
    for W, b in mp["trunk"]:
        h = jax.nn.relu(h @ W + b)
    scale = h @ mp["Ws"] + mp["bs"]      # (B, H)
    shift = h @ mp["Wsh"] + mp["bsh"]    # (B, H)
    return scale[None], shift[None]      # (1, B, H)


def calculate_scale_and_shift(mod_params_list, modulation_input):
    mod_emb = harmonic_embedding(modulation_input, NUM_MOD_HARMONIC)
    scales, shifts = [], []
    for mp in mod_params_list:           # Mult_Networks_One_Dimension_For_Each_Layer
        s, sh = mapping_forward(mp, mod_emb)
        scales.append(s[0])
        shifts.append(sh[0])
    scale = jnp.stack(scales, axis=0)    # (L+1, B, H)
    shift = jnp.stack(shifts, axis=0)
    return scale, shift


# ---------------- full forward -------------------------------------------------
def siren_model_with_film_forward(params, x, modulation_input):
    x_emb_cf = harmonic_embedding_channels_first(x, NUM_HARMONIC)     # (B, EMB, N)
    scale, shift = calculate_scale_and_shift(params["mod"], modulation_input)
    scale_k = jnp.transpose(scale, (1, 0, 2))[..., None]              # (B, L+1, H, 1)
    shift_k = jnp.transpose(shift, (1, 0, 2))[..., None]
    out_cf = siren_pallas(x_emb_cf, scale_k, shift_k, params["siren"])  # (B, OUT, N)
    return jnp.transpose(out_cf, (0, 2, 1))                           # (B, N, OUT)


# ---------------- pure-JAX reference (for correctness check) ------------------
def siren_model_with_film_reference(params, x, modulation_input):
    x_emb = harmonic_embedding(x, NUM_HARMONIC)
    scale, shift = calculate_scale_and_shift(params["mod"], modulation_input)
    p = params["siren"]
    h = x_emb
    # TODO(synk): FiLM source not provided; assumed FiLM(x, s, t) = s*x + t with
    # per-(batch, hidden) scale/shift broadcast over the point dimension.
    z = FIRST_OMEGA_0 * (h @ p["w0"].T + p["b0"])
    z = z * scale[0][:, None, :] + shift[0][:, None, :]
    h = jnp.sin(z)
    for i in range(HIDDEN_LAYERS):
        z = HIDDEN_OMEGA_0 * (h @ p["wh"][i].T + p["bh"][i])
        z = z * scale[i + 1][:, None, :] + shift[i + 1][:, None, :]
        h = jnp.sin(z)
    z = h @ p["wf"].T + p["bf"]
    return jnp.sin(z)


# ---------------- deterministic parameter construction ------------------------
def init_params(key):
    H = HIDDEN_FEATURES
    L = HIDDEN_LAYERS
    keys = jax.random.split(key, 16)

    def u(k, shape, lo, hi):
        return jax.random.uniform(k, shape, jnp.float32, lo, hi)

    # SIREN weights, stored in PyTorch nn.Linear orientation (out_features, in_features).
    first_bound = 1.0 / EMB_FEATURES
    hid_bound = float(jnp.sqrt(6.0 / H)) / HIDDEN_OMEGA_0
    b0_bound = float(1.0 / jnp.sqrt(EMB_FEATURES))
    bh_bound = float(1.0 / jnp.sqrt(H))
    siren = {
        "w0": u(keys[0], (H, EMB_FEATURES), -first_bound, first_bound),
        "b0": u(keys[1], (H,), -b0_bound, b0_bound),
        "wh": u(keys[2], (L, H, H), -hid_bound, hid_bound),
        "bh": u(keys[3], (L, H), -bh_bound, bh_bound),
        "wf": u(keys[4], (OUT_FEATURES, H), -hid_bound, hid_bound),
        "bf": u(keys[5], (OUT_FEATURES,), -bh_bound, bh_bound),
    }

    # Mapping networks: hidden_layers + 1 of them (Mult_Networks_One_Dimension_For_Each_Layer)
    mod_nets = []
    mkeys = jax.random.split(keys[6], L + 1)
    for mk in mkeys:
        sub = jax.random.split(mk, 8)
        trunk = []
        in_dim = MOD_EMB_FEATURES
        dims = [MOD_FEATURES] * (1 + MOD_HIDDEN_LAYERS)
        for j, out_dim in enumerate(dims):
            bnd = float(1.0 / jnp.sqrt(in_dim))
            trunk.append((u(sub[2 * j], (in_dim, out_dim), -bnd, bnd),
                          u(sub[2 * j + 1], (out_dim,), -bnd, bnd)))
            in_dim = out_dim
        bnd = float(1.0 / jnp.sqrt(MOD_FEATURES))
        mod_nets.append({
            "trunk": trunk,
            "Ws": u(sub[6], (MOD_FEATURES, H), -bnd, bnd),
            "bs": u(sub[7], (H,), -bnd, bnd),
            "Wsh": u(sub[4], (MOD_FEATURES, H), -bnd, bnd),
            "bsh": u(sub[5], (H,), -bnd, bnd),
        })

    return {"siren": siren, "mod": mod_nets}


# ---------------- main ---------------------------------------------------------
if __name__ == "__main__":
    key = jax.random.PRNGKey(0)
    k_param, k_x, k_mod = jax.random.split(key, 3)

    params = init_params(k_param)

    # coordinate grid in [-1, 1], shape (B, N, IN_FEATURES)
    lin = jnp.linspace(-1.0, 1.0, 16)
    gy, gx = jnp.meshgrid(lin, lin, indexing="ij")
    coords = jnp.stack([gx.ravel(), gy.ravel()], axis=-1)            # (256, 2)
    x = jnp.broadcast_to(coords[None], (B, N, IN_FEATURES)).astype(jnp.float32)
    x = x + 0.01 * jax.random.normal(k_x, x.shape, jnp.float32)

    modulation_input = jax.random.normal(k_mod, (B, MOD_IN_FEATURES), jnp.float32)

    fwd = jax.jit(siren_model_with_film_forward)
    out = fwd(params, x, modulation_input)
    out = jax.block_until_ready(out)

    ref = siren_model_with_film_reference(params, x, modulation_input)
    assert out.shape == (B, N, OUT_FEATURES)
    max_err = jnp.max(jnp.abs(out - ref))
    assert jnp.allclose(out, ref, atol=1e-3, rtol=1e-3), f"max err {max_err}"

    print("KERNEL_OK")
</pallas_src>

<mosaic_0001>
module attributes {stable_mosaic.version = 11 : i64} {
  func.func @_siren_kernel(%arg0: i32, %arg1: memref<1x120x256xf32, #tpu.memory_space<vmem>>, %arg2: memref<1x3x32x1xf32, #tpu.memory_space<vmem>>, %arg3: memref<1x3x32x1xf32, #tpu.memory_space<vmem>>, %arg4: memref<32x120xf32, #tpu.memory_space<vmem>>, %arg5: memref<32x1xf32, #tpu.memory_space<vmem>>, %arg6: memref<2x32x32xf32, #tpu.memory_space<vmem>>, %arg7: memref<2x32x1xf32, #tpu.memory_space<vmem>>, %arg8: memref<3x32xf32, #tpu.memory_space<vmem>>, %arg9: memref<3x1xf32, #tpu.memory_space<vmem>>, %arg10: memref<1x3x256xf32, #tpu.memory_space<vmem>>) attributes {dimension_semantics = [#tpu.dimension_semantics<parallel>], iteration_bounds = array<i64: 2>, scalar_prefetch = 0 : i64, scratch_operands = 0 : i64, tpu.core_type = #tpu.core_type<tc>, window_params = [{transform_indices = @transform_0, window_bounds = array<i64: 1, 120, 256>}, {transform_indices = @transform_1, window_bounds = array<i64: 1, 3, 32, 1>}, {transform_indices = @transform_2, window_bounds = array<i64: 1, 3, 32, 1>}, {pipeline_mode = #tpu.pipeline_mode<synchronous>, transform_indices = @transform_3, window_bounds = array<i64: 32, 120>}, {pipeline_mode = #tpu.pipeline_mode<synchronous>, transform_indices = @transform_4, window_bounds = array<i64: 32, 1>}, {pipeline_mode = #tpu.pipeline_mode<synchronous>, transform_indices = @transform_5, window_bounds = array<i64: 2, 32, 32>}, {pipeline_mode = #tpu.pipeline_mode<synchronous>, transform_indices = @transform_6, window_bounds = array<i64: 2, 32, 1>}, {pipeline_mode = #tpu.pipeline_mode<synchronous>, transform_indices = @transform_7, window_bounds = array<i64: 3, 32>}, {pipeline_mode = #tpu.pipeline_mode<synchronous>, transform_indices = @transform_8, window_bounds = array<i64: 3, 1>}, {transform_indices = @transform_9, window_bounds = array<i64: 1, 3, 256>}]} {
    %c0 = arith.constant 0 : index
    %c0_0 = arith.constant 0 : index
    %c0_1 = arith.constant 0 : index
    %0 = vector.load %arg1[%c0, %c0_0, %c0_1] : memref<1x120x256xf32, #tpu.memory_space<vmem>>, vector<1x120x256xf32>
    %1 = vector.shape_cast %0 : vector<1x120x256xf32> to vector<120x256xf32>
    %c0_2 = arith.constant 0 : index
    %c0_3 = arith.constant 0 : index
    %2 = vector.load %arg4[%c0_2, %c0_3] : memref<32x120xf32, #tpu.memory_space<vmem>>, vector<32x120xf32>
    %cst = arith.constant dense<0.000000e+00> : vector<32x256xf32>
    %3 = tpu.matmul %2, %1, %cst {dimension_numbers = #tpu.dot_dimension_numbers<[1], [0], [0], [1], [0, 0, 1, 1], [], []>} : vector<32x120xf32>, vector<120x256xf32>, vector<32x256xf32> -> vector<32x256xf32>
    %c0_4 = arith.constant 0 : index
    %c0_5 = arith.constant 0 : index
    %4 = vector.load %arg5[%c0_4, %c0_5] : memref<32x1xf32, #tpu.memory_space<vmem>>, vector<32x1xf32>
    %5 = vector.broadcast %4 : vector<32x1xf32> to vector<32x256xf32>
    %6 = arith.addf %3, %5 : vector<32x256xf32>
    %c0_6 = arith.constant 0 : index
    %c0_7 = arith.constant 0 : index
    %c0_8 = arith.constant 0 : index
    %c0_9 = arith.constant 0 : index
    %7 = vector.load %arg2[%c0_6, %c0_7, %c0_8, %c0_9] : memref<1x3x32x1xf32, #tpu.memory_space<vmem>>, vector<1x1x32x1xf32>
    %8 = vector.shape_cast %7 : vector<1x1x32x1xf32> to vector<32x1xf32>
    %9 = vector.broadcast %8 : vector<32x1xf32> to vector<32x256xf32>
    %10 = arith.mulf %6, %9 : vector<32x256xf32>
    %c0_10 = arith.constant 0 : index
    %c0_11 = arith.constant 0 : index
    %c0_12 = arith.constant 0 : index
    %c0_13 = arith.constant 0 : index
    %11 = vector.load %arg3[%c0_10, %c0_11, %c0_12, %c0_13] : memref<1x3x32x1xf32, #tpu.memory_space<vmem>>, vector<1x1x32x1xf32>
    %12 = vector.shape_cast %11 : vector<1x1x32x1xf32> to vector<32x1xf32>
    %13 = vector.broadcast %12 : vector<32x1xf32> to vector<32x256xf32>
    %14 = arith.addf %10, %13 : vector<32x256xf32>
    %15 = math.sin %14 : vector<32x256xf32>
    %c0_14 = arith.constant 0 : index
    %c0_15 = arith.constant 0 : index
    %c0_16 = arith.constant 0 : index
    %16 = vector.load %arg6[%c0_14, %c0_15, %c0_16] : memref<2x32x32xf32, #tpu.memory_space<vmem>>, vector<1x32x32xf32>
    %17 = vector.shape_cast %16 : vector<1x32x32xf32> to vector<32x32xf32>
    %cst_17 = arith.constant dense<0.000000e+00> : vector<32x256xf32>
    %18 = tpu.matmul %17, %15, %cst_17 {dimension_numbers = #tpu.dot_dimension_numbers<[1], [0], [0], [1], [0, 0, 1, 1], [], []>} : vector<32x32xf32>, vector<32x256xf32>, vector<32x256xf32> -> vector<32x256xf32>
    %c0_18 = arith.constant 0 : index
    %c0_19 = arith.constant 0 : index
    %c0_20 = arith.constant 0 : index
    %19 = vector.load %arg7[%c0_18, %c0_19, %c0_20] : memref<2x32x1xf32, #tpu.memory_space<vmem>>, vector<1x32x1xf32>
    %20 = vector.shape_cast %19 : vector<1x32x1xf32> to vector<32x1xf32>
    %21 = vector.broadcast %20 : vector<32x1xf32> to vector<32x256xf32>
    %22 = arith.addf %18, %21 : vector<32x256xf32>
    %c0_21 = arith.constant 0 : index
    %c1 = arith.constant 1 : index
    %c0_22 = arith.constant 0 : index
    %c0_23 = arith.constant 0 : index
    %23 = vector.load %arg2[%c0_21, %c1, %c0_22, %c0_23] : memref<1x3x32x1xf32, #tpu.memory_space<vmem>>, vector<1x1x32x1xf32>
    %24 = vector.shape_cast %23 : vector<1x1x32x1xf32> to vector<32x1xf32>
    %25 = vector.broadcast %24 : vector<32x1xf32> to vector<32x256xf32>
    %26 = arith.mulf %22, %25 : vector<32x256xf32>
    %c0_24 = arith.constant 0 : index
    %c1_25 = arith.constant 1 : index
    %c0_26 = arith.constant 0 : index
    %c0_27 = arith.constant 0 : index
    %27 = vector.load %arg3[%c0_24, %c1_25, %c0_26, %c0_27] : memref<1x3x32x1xf32, #tpu.memory_space<vmem>>, vector<1x1x32x1xf32>
    %28 = vector.shape_cast %27 : vector<1x1x32x1xf32> to vector<32x1xf32>
    %29 = vector.broadcast %28 : vector<32x1xf32> to vector<32x256xf32>
    %30 = arith.addf %26, %29 : vector<32x256xf32>
    %31 = math.sin %30 : vector<32x256xf32>
    %c1_28 = arith.constant 1 : index
    %c0_29 = arith.constant 0 : index
    %c0_30 = arith.constant 0 : index
    %32 = vector.load %arg6[%c1_28, %c0_29, %c0_30] : memref<2x32x32xf32, #tpu.memory_space<vmem>>, vector<1x32x32xf32>
    %33 = vector.shape_cast %32 : vector<1x32x32xf32> to vector<32x32xf32>
    %cst_31 = arith.constant dense<0.000000e+00> : vector<32x256xf32>
    %34 = tpu.matmul %33, %31, %cst_31 {dimension_numbers = #tpu.dot_dimension_numbers<[1], [0], [0], [1], [0, 0, 1, 1], [], []>} : vector<32x32xf32>, vector<32x256xf32>, vector<32x256xf32> -> vector<32x256xf32>
    %c1_32 = arith.constant 1 : index
    %c0_33 = arith.constant 0 : index
    %c0_34 = arith.constant 0 : index
    %35 = vector.load %arg7[%c1_32, %c0_33, %c0_34] : memref<2x32x1xf32, #tpu.memory_space<vmem>>, vector<1x32x1xf32>
    %36 = vector.shape_cast %35 : vector<1x32x1xf32> to vector<32x1xf32>
    %37 = vector.broadcast %36 : vector<32x1xf32> to vector<32x256xf32>
    %38 = arith.addf %34, %37 : vector<32x256xf32>
    %c0_35 = arith.constant 0 : index
    %c2 = arith.constant 2 : index
    %c0_36 = arith.constant 0 : index
    %c0_37 = arith.constant 0 : index
    %39 = vector.load %arg2[%c0_35, %c2, %c0_36, %c0_37] : memref<1x3x32x1xf32, #tpu.memory_space<vmem>>, vector<1x1x32x1xf32>
    %40 = vector.shape_cast %39 : vector<1x1x32x1xf32> to vector<32x1xf32>
    %41 = vector.broadcast %40 : vector<32x1xf32> to vector<32x256xf32>
    %42 = arith.mulf %38, %41 : vector<32x256xf32>
    %c0_38 = arith.constant 0 : index
    %c2_39 = arith.constant 2 : index
    %c0_40 = arith.constant 0 : index
    %c0_41 = arith.constant 0 : index
    %43 = vector.load %arg3[%c0_38, %c2_39, %c0_40, %c0_41] : memref<1x3x32x1xf32, #tpu.memory_space<vmem>>, vector<1x1x32x1xf32>
    %44 = vector.shape_cast %43 : vector<1x1x32x1xf32> to vector<32x1xf32>
    %45 = vector.broadcast %44 : vector<32x1xf32> to vector<32x256xf32>
    %46 = arith.addf %42, %45 : vector<32x256xf32>
    %47 = math.sin %46 : vector<32x256xf32>
    %c0_42 = arith.constant 0 : index
    %c0_43 = arith.constant 0 : index
    %48 = vector.load %arg8[%c0_42, %c0_43] : memref<3x32xf32, #tpu.memory_space<vmem>>, vector<3x32xf32>
    %cst_44 = arith.constant dense<0.000000e+00> : vector<3x256xf32>
    %49 = tpu.matmul %48, %47, %cst_44 {dimension_numbers = #tpu.dot_dimension_numbers<[1], [0], [0], [1], [0, 0, 1, 1], [], []>} : vector<3x32xf32>, vector<32x256xf32>, vector<3x256xf32> -> vector<3x256xf32>
    %c0_45 = arith.constant 0 : index
    %c0_46 = arith.constant 0 : index
    %50 = vector.load %arg9[%c0_45, %c0_46] : memref<3x1xf32, #tpu.memory_space<vmem>>, vector<3x1xf32>
    %51 = vector.broadcast %50 : vector<3x1xf32> to vector<3x256xf32>
    %52 = arith.addf %49, %51 : vector<3x256xf32>
    %53 = math.sin %52 : vector<3x256xf32>
    %c0_47 = arith.constant 0 : index
    %c0_48 = arith.constant 0 : index
    %c0_49 = arith.constant 0 : index
    %54 = vector.load %arg10[%c0_47, %c0_48, %c0_49] : memref<1x3x256xf32, #tpu.memory_space<vmem>>, vector<1x3x256xf32>
    %55 = vector.shape_cast %54 : vector<1x3x256xf32> to vector<3x256xf32>
    %56 = vector.shape_cast %53 : vector<3x256xf32> to vector<1x3x256xf32>
    tpu.vector_store %arg10[%c0_47, %c0_48, %c0_49], %56 {strides = array<i32>} : memref<1x3x256xf32, #tpu.memory_space<vmem>>, vector<1x3x256xf32>,
    return
  }
  func.func @transform_0(%arg0: i32) -> (i32, i32, i32) {
    %c0_i32 = arith.constant 0 : i32
    %c0_i32_0 = arith.constant 0 : i32
    %c0_i32_1 = arith.constant 0 : i32
    return %arg0, %c0_i32, %c0_i32_0 : i32, i32, i32
  }
  func.func @transform_1(%arg0: i32) -> (i32, i32, i32, i32) {
    %c0_i32 = arith.constant 0 : i32
    %c0_i32_0 = arith.constant 0 : i32
    %c0_i32_1 = arith.constant 0 : i32
    %c0_i32_2 = arith.constant 0 : i32
    return %arg0, %c0_i32, %c0_i32_0, %c0_i32_1 : i32, i32, i32, i32
  }
  func.func @transform_2(%arg0: i32) -> (i32, i32, i32, i32) {
    %c0_i32 = arith.constant 0 : i32
    %c0_i32_0 = arith.constant 0 : i32
    %c0_i32_1 = arith.constant 0 : i32
    %c0_i32_2 = arith.constant 0 : i32
    return %arg0, %c0_i32, %c0_i32_0, %c0_i32_1 : i32, i32, i32, i32
  }
  func.func @transform_3(%arg0: i32) -> (i32, i32) {
    %c0_i32 = arith.constant 0 : i32
    %c0_i32_0 = arith.constant 0 : i32
    %c0_i32_1 = arith.constant 0 : i32
    return %c0_i32, %c0_i32_0 : i32, i32
  }
  func.func @transform_4(%arg0: i32) -> (i32, i32) {
    %c0_i32 = arith.constant 0 : i32
    %c0_i32_0 = arith.constant 0 : i32
    %c0_i32_1 = arith.constant 0 : i32
    return %c0_i32, %c0_i32_0 : i32, i32
  }
  func.func @transform_5(%arg0: i32) -> (i32, i32, i32) {
    %c0_i32 = arith.constant 0 : i32
    %c0_i32_0 = arith.constant 0 : i32
    %c0_i32_1 = arith.constant 0 : i32
    %c0_i32_2 = arith.constant 0 : i32
    return %c0_i32, %c0_i32_0, %c0_i32_1 : i32, i32, i32
  }
  func.func @transform_6(%arg0: i32) -> (i32, i32, i32) {
    %c0_i32 = arith.constant 0 : i32
    %c0_i32_0 = arith.constant 0 : i32
    %c0_i32_1 = arith.constant 0 : i32
    %c0_i32_2 = arith.constant 0 : i32
    return %c0_i32, %c0_i32_0, %c0_i32_1 : i32, i32, i32
  }
  func.func @transform_7(%arg0: i32) -> (i32, i32) {
    %c0_i32 = arith.constant 0 : i32
    %c0_i32_0 = arith.constant 0 : i32
    %c0_i32_1 = arith.constant 0 : i32
    return %c0_i32, %c0_i32_0 : i32, i32
  }
  func.func @transform_8(%arg0: i32) -> (i32, i32) {
    %c0_i32 = arith.constant 0 : i32
    %c0_i32_0 = arith.constant 0 : i32
    %c0_i32_1 = arith.constant 0 : i32
    return %c0_i32, %c0_i32_0 : i32, i32
  }
  func.func @transform_9(%arg0: i32) -> (i32, i32, i32) {
    %c0_i32 = arith.constant 0 : i32
    %c0_i32_0 = arith.constant 0 : i32
    %c0_i32_1 = arith.constant 0 : i32
    return %arg0, %c0_i32, %c0_i32_0 : i32, i32, i32
  }
}

</mosaic_0001>

<bundles_post_ra>
// kernel: siren_model_with_film_forward.1
= control target key start
LH: loop header
LB: loop body
LE: loop exit
PB: predicated region body
PF: predicated region fallthrough
CT: control target
= control target key end

     0   :  { %s4359_s30 = smov 0   ;;  %s7157_s0 = inlined_call_operand.vmem [shape: f32[2,120,256], index: 0, kind: input, shape index: {}]   ;;  %s7158_s1 = inlined_call_operand.vmem [shape: f32[2,3,32,1], index: 1, kind: input, shape index: {}]   ;;  %s7159_s2 = inlined_call_operand.vmem [shape: f32[2,3,32,1], index: 2, kind: input, shape index: {}]   ;;  %s7160_s3 = inlined_call_operand.vmem [shape: f32[32,120], index: 3, kind: input, shape index: {}]   ;;  %s7161_s4 = inlined_call_operand.vmem [shape: f32[32,1], index: 4, kind: input, shape index: {}]   ;;  %s7162_s5 = inlined_call_operand.vmem [shape: f32[2,32,32], index: 5, kind: input, shape index: {}]   ;;  %s7163_s6 = inlined_call_operand.vmem [shape: f32[2,32,1], index: 6, kind: input, shape index: {}]   ;;  %s7164_s7 = inlined_call_operand.vmem [shape: f32[3,32], index: 7, kind: input, shape index: {}]   ;;  %s7165_s8 = inlined_call_operand.vmem [shape: f32[3,1], index: 8, kind: input, shape index: {}]   ;;  %s7166_s9 = inlined_call_operand.vmem [shape: f32[2,3,256], index: 9, kind: output, shape index: {}]  }
   0x1 LB: > { %s3859_s10 = sadd.s32 4294967295, %s4299_s30   ;;  %p3863_p0 = scmp.ge.s32.totalorder %s4299_s30, 1  ;;  %s4299_s30 = sphi %s4359_s30, %s19_s30  }
   0x2   : > { %p307_p1 = scmp.lt.s32.totalorder %s4299_s30, 3 }
   0x4   : > { %p308_p2 = pnand %p3863_p0, %p307_p1 }
   0x6   : > { %311 = sbr.rel (%p308_p2) target bundleno = 1716 (0x6b4), region = 56 }
   0xd   : > { %p353_p3 = scmp.lt.s32.totalorder %s3859_s10, 1  ;;  %v7167_v0 = vmov 0.0   ;;  %v4302_v1 = vmov 0   ;;  %v407_v2 = vld [vmem:[%s7161_s4] sm:$0xff]  ;;  %v410_v3 = vld [vmem:[%s7161_s4 + $0x18] sm:$0xff]  ;;  %v408_v4 = vld [vmem:[%s7161_s4 + $0x8] sm:$0xff] }
   0xe   : > { %508 = vmatprep.mubr.f32.mxu0 %v7167_v0  ;;  %4187 = vset.pattern.permute.xlu0 %v4302_v1  ;;  %v409_v5 = vld [vmem:[%s7161_s4 + $0x10] sm:$0xff]  ;;  %v1433_v51 = vld [vmem:[%s7163_s6] sm:$0xff]  ;;  %v1434_v59 = vld [vmem:[%s7163_s6 + $0x8] sm:$0xff]  ;;  %vm431_vm0 = vcmask 982016  }
   0xf   : > { %s7312_s10 = smov (!%p353_p3, %s3859_s10), 1  ;;  %413 = vperm.xlu0 %4187, %v407_v2   ;;  %4188 = vset.pattern.permute.xlu1 %v4302_v1  ;;  %v1435_v60 = vld [vmem:[%s7163_s6 + $0x10] sm:$0xff]  ;;  %v403_v62 = vld [vmem:[%s7160_s3] sm:$0xff]  ;;  %v404_v2 = vld [vmem:[%s7160_s3 + $0x8] sm:$0xff] }
  0x10   : > { %428 = vperm.xlu1 %4188, %v410_v3   ;;  %1534 = vmatprep.mubr.f32.mxu1 %v7167_v0  ;;  %s4065_s17 = smul.u32 240, %s7312_s10  ;;  %v1436_v3 = vld [vmem:[%s7163_s6 + $0x18] sm:$0xff]  ;;  %s4012_s19 = sshll.u32 %s7312_s10, 3 }
  0x11   : > { %s4066_s23 = smul.u32 96, %s7312_s10  ;;  %s372_s21 = scalar_lea.vmem %s7166_s9, %s4012_s19 }
  0x12   : > { %s4384_s20 = scalar_lea.vmem %s7157_s0, %s4065_s17 }
  0x13   : > { %418 = vperm.xlu0 %4187, %v408_v4   ;;  %v374_v6 = vld [vmem:[%s4384_s20 + $0x8] sm:$0xff]  ;;  %v376_v7 = vld [vmem:[%s4384_s20 + $0x18] sm:$0xff]  ;;  %v373_v8 = vld [vmem:[%s4384_s20] sm:$0xff]  ;;  %s4407_s26 = scalar_lea.vmem %s7158_s1, %s4066_s23  ;;  %s4412_s29 = scalar_lea.vmem %s7159_s2, %s4066_s23 }
  0x14   : > { %v4013_v9 = vpack.c.bf16 %v376_v7, %v374_v6  ;;  %v375_v10 = vld [vmem:[%s4384_s20 + $0x10] sm:$0xff]  ;;  %v378_v11 = vld [vmem:[%s4384_s20 + $0x28] sm:$0xff]  ;;  %v380_v12 = vld [vmem:[%s4384_s20 + $0x38] sm:$0xff] }
  0x15   : > { %v4015_v13 = vpack.c.bf16 %v375_v10, %v373_v8  ;;  %v4017_v14 = vpack.c.bf16 %v380_v12, %v378_v11  ;;  %v377_v15 = vld [vmem:[%s4384_s20 + $0x20] sm:$0xff]  ;;  %v379_v16 = vld [vmem:[%s4384_s20 + $0x30] sm:$0xff]  ;;  %v382_v17 = vld [vmem:[%s4384_s20 + $0x48] sm:$0xff] }
  0x16   : > { %4014 = vmatprep.subr.bf16.mxu0 %v4013_v9  ;;  %v384_v18 = vld [vmem:[%s4384_s20 + $0x58] sm:$0xff]  ;;  %v4019_v19 = vpack.c.bf16 %v379_v16, %v377_v15  ;;  %v381_v21 = vld [vmem:[%s4384_s20 + $0x40] sm:$0xff]  ;;  %v383_v22 = vld [vmem:[%s4384_s20 + $0x50] sm:$0xff] }
  0x17   : > { %423 = vperm.xlu0 %4187, %v409_v5   ;;  %4016 = vmatpush1.bf16.msra.mxu0 %v4015_v13  ;;  %v4021_v20 = vpack.c.bf16 %v384_v18, %v382_v17  ;;  %v386_v23 = vld [vmem:[%s4384_s20 + $0x68] sm:$0xff]  ;;  %v388_v24 = vld [vmem:[%s4384_s20 + $0x78] sm:$0xff]  ;;  %v4023_v25 = vpack.c.bf16 %v383_v22, %v381_v21  ;;  %v385_v27 = vld [vmem:[%s4384_s20 + $0x60] sm:$0xff] }
  0x18   : > { %4018 = vmatprep.subr.bf16.mxu0 %v4017_v14  ;;  %v4025_v26 = vpack.c.bf16 %v388_v24, %v386_v23  ;;  %v387_v28 = vld [vmem:[%s4384_s20 + $0x70] sm:$0xff]  ;;  %v390_v29 = vld [vmem:[%s4384_s20 + $0x88] sm:$0xff]  ;;  %v392_v30 = vld [vmem:[%s4384_s20 + $0x98] sm:$0xff] }
  0x19   : > { %v533_v31 = vld [vmem:[%s4407_s26] sm:$0xff]  ;;  %v4027_v33 = vpack.c.bf16 %v387_v28, %v385_v27  ;;  %v534_v34 = vld [vmem:[%s4407_s26 + $0x8] sm:$0xff]  ;;  %v535_v35 = vld [vmem:[%s4407_s26 + $0x10] sm:$0xff]  ;;  %v4029_v36 = vpack.c.bf16 %v392_v30, %v390_v29 }
  0x1a   : > { %v565_v32 = vld [vmem:[%s4412_s29] sm:$0xff]  ;;  %539 = vperm.xlu1 %4188, %v533_v31   ;;  %v391_v38 = vld [vmem:[%s4384_s20 + $0x90] sm:$0xff]  ;;  %v394_v39 = vld [vmem:[%s4384_s20 + $0xa8] sm:$0xff] }
  0x1b   : > { %4020 = vmatpush1.bf16.msra.mxu0 %v4019_v19  ;;  %571 = vperm.xlu0 %4187, %v565_v32   ;;  %v389_v37 = vld [vmem:[%s4384_s20 + $0x80] sm:$0xff]  ;;  %v396_v40 = vld [vmem:[%s4384_s20 + $0xb8] sm:$0xff]  ;;  %v566_v42 = vld [vmem:[%s4412_s29 + $0x8] sm:$0xff] }
  0x1c   : > { %4022 = vmatprep.subr.bf16.mxu0 %v4021_v20  ;;  %v4031_v41 = vpack.c.bf16 %v391_v38, %v389_v37  ;;  %v567_v43 = vld [vmem:[%s4412_s29 + $0x10] sm:$0xff]  ;;  %v4033_v44 = vpack.c.bf16 %v396_v40, %v394_v39  ;;  %v393_v45 = vld [vmem:[%s4384_s20 + $0xa0] sm:$0xff]  ;;  %v398_v47 = vld [vmem:[%s4384_s20 + $0xc8] sm:$0xff] }
  0x1d   : > { %v395_v46 = vld [vmem:[%s4384_s20 + $0xb0] sm:$0xff]  ;;  %v400_v48 = vld [vmem:[%s4384_s20 + $0xd8] sm:$0xff]  ;;  %v397_v53 = vld [vmem:[%s4384_s20 + $0xc0] sm:$0xff] }
  0x1e   : > { %544 = vperm.xlu1 %4188, %v534_v34   ;;  %v4035_v49 = vpack.c.bf16 %v395_v46, %v393_v45  ;;  %v536_v50 = vld [vmem:[%s4407_s26 + $0x18] sm:$0xff]  ;;  %v4037_v52 = vpack.c.bf16 %v400_v48, %v398_v47  ;;  %v399_v54 = vld [vmem:[%s4384_s20 + $0xd0] sm:$0xff]  ;;  %v3909_v57 = vld [vmem:[%s4407_s26 + $0x20] sm:$0xff] }
  0x1f   : > { %4024 = vmatpush1.bf16.msra.mxu0 %v4023_v25  ;;  %549 = vperm.xlu0 %4187, %v535_v35   ;;  %v4039_v55 = vpack.c.bf16 %v399_v54, %v397_v53  ;;  %v568_v56 = vld [vmem:[%s4412_s29 + $0x18] sm:$0xff]  ;;  %v402_v58 = vld [vmem:[%s4384_s20 + $0xe8] sm:$0xff]  ;;  %v401_v61 = vld [vmem:[%s4384_s20 + $0xe0] sm:$0xff] }
  0x20   : > { %4026 = vmatprep.subr.bf16.mxu0 %v4025_v26  ;;  %v3910_v63 = vld [vmem:[%s4407_s26 + $0x28] sm:$0xff]  ;;  %v3913_v1 = vld [vmem:[%s4412_s29 + $0x20] sm:$0xff]  ;;  %v3911_v4 = vld [vmem:[%s4407_s26 + $0x30] sm:$0xff] }
  0x21   : > { %v405_v5 = vld [vmem:[%s7160_s3 + $0x10] sm:$0xff]  ;;  %v3914_v6 = vld [vmem:[%s4412_s29 + $0x28] sm:$0xff]  ;;  %v406_v8 = vld [vmem:[%s7160_s3 + $0x18] sm:$0xff] }
  0x22   : > { %576 = vperm.xlu1 %4188, %v566_v42   ;;  %v3915_v7 = vld [vmem:[%s4412_s29 + $0x30] sm:$0xff]  ;;  %v3912_v9 = vld [vmem:[%s4407_s26 + $0x38] sm:$0xff]  ;;  %v3953_v10 = vld [vmem:[%s7163_s6 + $0x20] sm:$0xff] }
  0x23   : > { %4028 = vmatpush1.bf16.msra.mxu0 %v4027_v33  ;;  %581 = vperm.xlu0 %4187, %v567_v43   ;;  %v3916_v11 = vld [vmem:[%s4412_s29 + $0x38] sm:$0xff]  ;;  %v3961_v12 = vld [vmem:[%s4407_s26 + $0x40] sm:$0xff]  ;;  %v3954_v13 = vld [vmem:[%s7163_s6 + $0x28] sm:$0xff] }
  0x24   : > { %4030 = vmatprep.subr.bf16.mxu0 %v4029_v36  ;;  %v3955_v14 = vld [vmem:[%s7163_s6 + $0x30] sm:$0xff]  ;;  %v3962_v15 = vld [vmem:[%s4407_s26 + $0x48] sm:$0xff]  ;;  %v3965_v16 = vld [vmem:[%s4412_s29 + $0x40] sm:$0xff] }
  0x25   : > { %v3956_v17 = vld [vmem:[%s7163_s6 + $0x38] sm:$0xff]  ;;  %v3963_v18 = vld [vmem:[%s4407_s26 + $0x50] sm:$0xff]  ;;  %v3966_v19 = vld [vmem:[%s4412_s29 + $0x48] sm:$0xff] }
  0x26   : > { %554 = vperm.xlu1 %4188, %v536_v50   ;;  %v3967_v20 = vld [vmem:[%s4412_s29 + $0x50] sm:$0xff]  ;;  %v3964_v21 = vld [vmem:[%s4407_s26 + $0x58] sm:$0xff]  ;;  %v3487_v22 = vld [vmem:[%s7165_s8] sm:$0x7] }
  0x27   : > { %4032 = vmatpush1.bf16.msra.mxu0 %v4031_v41  ;;  %1439 = vperm.xlu0 %4187, %v1433_v51   ;;  %v3968_v23 = vld [vmem:[%s4412_s29 + $0x58] sm:$0xff] }
  0x28   : > { %4034 = vmatprep.subr.bf16.mxu0 %v4033_v44 }
  0x2a   : > { %586 = vperm.xlu1 %4188, %v568_v56  }
  0x2b   : > { %4036 = vmatpush1.bf16.msra.mxu0 %v4035_v49  ;;  %1566 = vperm.xlu0 %4187, %v3909_v57  }
  0x2c   : > { %4038 = vmatprep.subr.bf16.mxu0 %v4037_v52 }
  0x2e   : > { %1444 = vperm.xlu1 %4188, %v1434_v59  }
  0x2f   : > { %4040 = vmatpush1.bf16.msra.mxu0 %v4039_v55  ;;  %1449 = vperm.xlu0 %4187, %v1435_v60  }
  0x30   : > { %472 = vmatprep.subr.mxu0 %v402_v58 }
  0x32   : > { %1571 = vperm.xlu1 %4188, %v3910_v63  }
  0x33   : > { %473 = vmatpush1.msra.mxu0 %v401_v61  ;;  %1599 = vperm.xlu0 %4187, %v3913_v1  }
  0x34   : > { %3869 = vmatmul.mubr.msk.f32.vlgmr.msra.gmra.mrb[0].mxu0 %vm431_vm0, %v403_v62 }
  0x35   : > { %514 = vmatprep.mubr.f32.mxu0 %v7167_v0 }
  0x36   : > { %1454 = vperm.xlu1 %4188, %v1436_v3  }
  0x37   : > { %1576 = vperm.xlu0 %4187, %v3911_v4  }
  0x38   : > { %3870 = vmatmul.mubr.msk.f32.gmra.mrb[2].mxu0 %vm431_vm0, %v404_v2 }
  0x39   : > { %520 = vmatprep.mubr.f32.mxu0 %v7167_v0 }
  0x3a   : > { %1604 = vperm.xlu1 %4188, %v3914_v6  }
  0x3b   : > { %1609 = vperm.xlu0 %4187, %v3915_v7  }
  0x3c   : > { %3871 = vmatmul.mubr.msk.f32.gmra.mrb[4].mxu0 %vm431_vm0, %v405_v5 }
  0x3d   : > { %526 = vmatprep.mubr.f32.mxu0 %v7167_v0 }
  0x3e   : > { %1581 = vperm.xlu1 %4188, %v3912_v9  }
  0x3f   : > { %2469 = vperm.xlu0 %4187, %v3953_v10  }
  0x40   : > { %3872 = vmatmul.mubr.msk.f32.gmra.mrb[6].mxu0 %vm431_vm0, %v406_v8 }
  0x42   : > { %1614 = vperm.xlu1 %4188, %v3916_v11  }
  0x43   : > { %2595 = vperm.xlu0 %4187, %v3961_v12  }
  0x46   : > { %2474 = vperm.xlu1 %4188, %v3954_v13  }
  0x47   : > { %2479 = vperm.xlu0 %4187, %v3955_v14  }
  0x4a   : > { %2600 = vperm.xlu1 %4188, %v3962_v15  }
  0x4b   : > { %2628 = vperm.xlu0 %4187, %v3965_v16  }
  0x4e   : > { %2484 = vperm.xlu1 %4188, %v3956_v17  }
  0x4f   : > { %2605 = vperm.xlu0 %4187, %v3963_v18  }
  0x52   : > { %2633 = vperm.xlu1 %4188, %v3966_v19  }
  0x53   : > { %2638 = vperm.xlu0 %4187, %v3967_v20  }
  0x56   : > { %2610 = vperm.xlu1 %4188, %v3964_v21  }
  0x57   : > { %3490 = vperm.xlu0 %4187, %v3487_v22  }
  0x5a   : > { %2643 = vperm.xlu1 %4188, %v3968_v23  }
  0x8e   : > { %v414_v24 = vpop.permute.xlu0 %413 }
  0x8f   : > { %v4500_v26 = vpop.permute.xlu1 %428 }
  0x92   : > { %v419_v25 = vpop.permute.xlu0 %418 }
  0x96   : > { %v424_v27 = vpop.permute.xlu0 %423 }
  0x99   : > { %v540_v28 = vpop.permute.xlu1 %539 }
  0x9a   : > { %v572_v29 = vpop.permute.xlu0 %571 }
  0x9d   : > { %v545_v33 = vpop.permute.xlu1 %544 }
  0x9e   : > { %v550_v41 = vpop.permute.xlu0 %549 }
  0xa1   : > { %v577_v45 = vpop.permute.xlu1 %576 }
  0xa2   : > { %v582_v58 = vpop.permute.xlu0 %581 }
  0xa5   : > { %v555_v14 = vpop.permute.xlu1 %554 }
  0xa9   : > { %v587_v22 = vpop.permute.xlu1 %586 }
 0x107   : > { %v510_v30 = vpop.f32.mrb[0].mxu0 }
 0x108   : > { %v511_v31 = vadd.f32 %v510_v30, %v414_v24  ;;  %v512_v32 = vpop.f32.mrb[1].mxu0 }
 0x109   : > { %v513_v34 = vadd.f32 %v512_v32, %v414_v24 }
 0x10a   : > { %v557_v35 = vmul.f32 %v540_v28, %v511_v31 }
 0x10b   : > { %v558_v36 = vmul.f32 %v540_v28, %v513_v34  ;;  %v516_v37 = vpop.f32.mrb[2].mxu0 }
 0x10c   : > { %v4502_v38 = vadd.f32 %v572_v29, %v557_v35  ;;  %v517_v39 = vadd.f32 %v516_v37, %v419_v25  ;;  %v518_v40 = vpop.f32.mrb[3].mxu0 }
 0x10d   : > { %v4504_v42 = vadd.f32 %v572_v29, %v558_v36  ;;  %v519_v43 = vadd.f32 %v518_v40, %v419_v25 }
 0x10e   : > { %v559_v44 = vmul.f32 %v545_v33, %v517_v39  ;;  %v600_v46 = vand.u32 2139095040, %v4502_v38 }
 0x10f   : > { %v704_v47 = vand.u32 2139095040, %v4504_v42  ;;  %v560_v48 = vmul.f32 %v545_v33, %v519_v43  ;;  %v522_v49 = vpop.f32.mrb[4].mxu0  ;;  %v701_v29 = vand.u32 2147483647, %v4504_v42 }
 0x110   : > { %v4508_v50 = vadd.f32 %v577_v45, %v559_v44  ;;  %v523_v51 = vadd.f32 %v522_v49, %v424_v27  ;;  %v524_v52 = vpop.f32.mrb[5].mxu0  ;;  %v601_v59 = vshrl.u32 %v600_v46, 23  ;;  %v7172_v46 = vand.u32 2147483647, %v4502_v38 }
 0x111   : > { %v705_v53 = vshrl.u32 %v704_v47, 23  ;;  %v4510_v54 = vadd.f32 %v577_v45, %v560_v48  ;;  %v525_v55 = vadd.f32 %v524_v52, %v424_v27  ;;  %v4532_v39 = vand.u32 8388607, %v701_v29 }
 0x112   : > { %v808_v56 = vand.u32 2139095040, %v4508_v50  ;;  %v561_v57 = vmul.f32 %v550_v41, %v523_v51  ;;  %v3873_v7 = vadd.s32 4294967169, %v601_v59  ;;  %v7176_v59 = vmov 2475754826  }
 0x113   : > { %v912_v60 = vand.u32 2139095040, %v4510_v54  ;;  %v562_v61 = vmul.f32 %v550_v41, %v525_v55  ;;  %v528_v62 = vpop.f32.mrb[6].mxu0  ;;  %v3877_v3 = vadd.s32 4294967169, %v705_v53  ;;  %v7169_v45 = vand.u32 2147483647, %v4510_v54 }
 0x114   : > { %v809_v63 = vshrl.u32 %v808_v56, 23  ;;  %v4514_v1 = vadd.f32 %v582_v58, %v561_v57  ;;  %v530_v2 = vpop.f32.mrb[7].mxu0  ;;  %v529_v13 = vadd.f32 %v528_v62, %v4500_v26  ;;  %v607_v15 = vadd.s32 1, %v3873_v7 }
 0x115   : > { %v913_v4 = vshrl.u32 %v912_v60, 23  ;;  %v4516_v5 = vadd.f32 %v582_v58, %v562_v61  ;;  %v711_v10 = vadd.s32 1, %v3877_v3  ;;  %v531_v28 = vadd.f32 %v530_v2, %v4500_v26 }
 0x116   : > { %v1016_v6 = vand.u32 2139095040, %v4514_v1  ;;  %v3881_v9 = vadd.s32 4294967169, %v809_v63  ;;  %v563_v20 = vmul.f32 %v555_v14, %v529_v13  ;;  %vm608_vm2 = vcmp.gt.s32.totalorder %v607_v15, 0 }
 0x117   : > { %v1120_v8 = vand.u32 2139095040, %v4516_v5  ;;  %v3885_v11 = vadd.s32 4294967169, %v913_v4  ;;  %vm712_vm1 = vcmp.gt.s32.totalorder %v711_v10, 0  ;;  %v609_v27 = vsel %vm608_vm2, %v607_v15, 0 }
 0x118   : > { %v1017_v12 = vshrl.u32 %v1016_v6, 23  ;;  %v815_v17 = vadd.s32 1, %v3881_v9  ;;  %v713_v23 = vsel %vm712_vm1, %v711_v10, 0  ;;  %v4521_v25 = vadd.f32 %v587_v22, %v563_v20 }
 0x119   : > { %v1121_v16 = vshrl.u32 %v1120_v8, 23  ;;  %v919_v19 = vadd.s32 1, %v3885_v11  ;;  %v715_v30 = vand.u32 31, %v713_v23  ;;  %v4525_v34 = vand.u32 31, %v609_v27 }
 0x11a   : > { %v3889_v18 = vadd.s32 4294967169, %v1017_v12  ;;  %vm816_vm3 = vcmp.gt.s32.totalorder %v815_v17, 0  ;;  %7215 = vst [vmem:[#allocation2_spill] sm:$0xff] %v4521_v25  ;;  %v1224_v35 = vand.u32 2139095040, %v4521_v25  ;;  %v564_v37 = vmul.f32 %v555_v14, %v531_v28 }
 0x11b   : > { %v3893_v21 = vadd.s32 4294967169, %v1121_v16  ;;  %vm920_vm4 = vcmp.gt.s32.totalorder %v919_v19, 0  ;;  %v817_v31 = vsel %vm816_vm3, %v815_v17, 0  ;;  %v716_v40 = vsub.s32 32, %v715_v30 }
 0x11c   : > { %v1023_v24 = vadd.s32 1, %v3889_v18  ;;  %v921_v33 = vsel %vm920_vm4, %v919_v19, 0  ;;  %v4528_v36 = vand.u32 31, %v817_v31  ;;  %v4536_v43 = vshrl.u32 %v609_v27, 5 }
 0x11d   : > { %v1127_v32 = vadd.s32 1, %v3893_v21  ;;  %v4534_v26 = vand.u32 31, %v921_v33  ;;  %v4538_v44 = vshrl.u32 %v713_v23, 5  ;;  %v4543_v47 = vsub.s32 32, %v4525_v34 }
 0x11e   : > { %vm1024_vm5 = vcmp.gt.s32.totalorder %v1023_v24, 0  ;;  %v4545_v48 = vshrl.u32 %v817_v31, 5  ;;  %v4547_v49 = vshrl.u32 %v921_v33, 5  ;;  %v1225_v51 = vshrl.u32 %v1224_v35, 23 }
 0x11f   : > { %v1025_v41 = vsel %vm1024_vm5, %v1023_v24, 0  ;;  %vm1128_vm6 = vcmp.gt.s32.totalorder %v1127_v32, 0  ;;  %v4550_v52 = vsub.s32 32, %v4528_v36  ;;  %v4554_v56 = vadd.f32 %v587_v22, %v564_v37 }
 0x120   : > { %v4552_v53 = vand.u32 31, %v1025_v41  ;;  %v1129_v55 = vsel %vm1128_vm6, %v1127_v32, 0  ;;  %v4557_v57 = vsub.s32 32, %v4534_v26  ;;  %v709_v58 = vor.u32 8388608, %v4532_v39 }
 0x121   : > { %v719_v60 = vshrl.u32 %v7176_v59, %v716_v40  ;;  %v7173_v61 = vmov 2131351028   ;;  %v4562_v63 = vshrl.u32 %v1025_v41, 5  ;;  %v7180_v2 = vmov 683565275  }
 0x122   : > { %v722_v62 = vshrl.u32 %v7173_v61, %v716_v40  ;;  %v717_v3 = vshrl.u32 %v7180_v2, %v716_v40  ;;  %v718_v4 = vshll.u32 %v7180_v2, %v715_v30  ;;  %v7178_v6 = vmov 2102212464  }
 0x123   : > { %v725_v7 = vshrl.u32 %v7178_v6, %v716_v40  ;;  %v4567_v8 = vand.u32 31, %v1129_v55  ;;  %v3897_v9 = vadd.s32 4294967169, %v1225_v51  ;;  %v721_v10 = vshll.u32 %v7176_v59, %v715_v30 }
 0x124   : > { %v7193_v11 = vmov 920167782   ;;  %v4572_v13 = vsub.s32 32, %v4552_v53  ;;  %v1328_v14 = vand.u32 2139095040, %v4554_v56  ;;  %v724_v15 = vshll.u32 %v7173_v61, %v715_v30 }
 0x125   : > { %v728_v12 = vshrl.u32 %v7193_v11, %v716_v40  ;;  %v727_v16 = vshll.u32 %v7178_v6, %v715_v30  ;;  %v720_v17 = vor.u32 %v719_v60, %v718_v4  ;;  %v723_v18 = vor.u32 %v722_v62, %v721_v10 }
 0x126   : > { %v730_v19 = vshll.u32 %v7193_v11, %v715_v30  ;;  %v7170_v20 = vmov 1326507024   ;;  %v1039_v22 = vshll.u32 %v7178_v6, %v4552_v53  ;;  %v4581_v23 = vshrl.u32 %v1129_v55, 5 }
 0x127   : > { %v731_v21 = vshrl.u32 %v7170_v20, %v716_v40  ;;  %v726_v24 = vor.u32 %v725_v7, %v724_v15  ;;  %v729_v27 = vor.u32 %v728_v12, %v727_v16  ;;  %v4585_v28 = vshll.u32 %v7193_v11, %v4552_v53 }
 0x128   : > { %v4588_v31 = vsub.s32 32, %v4567_v8  ;;  %v4592_v30 = vshll.u32 %v7178_v6, %v4567_v8  ;;  %v1040_v33 = vshrl.u32 %v7193_v11, %v4572_v13  ;;  %v4598_v35 = vshrl.u32 %v7170_v20, %v4572_v13 }
 0x129   : > { %v732_v32 = vor.u32 %v731_v21, %v730_v19  ;;  %v1329_v37 = vshrl.u32 %v1328_v14, 23  ;;  %vm733_vm7 = vcmp.lt.s32.totalorder %v4538_v44, 1  ;;  %vm734_vm8 = vcmp.lt.s32.totalorder %v4538_v44, 2 }
 0x12a   : > { %vm735_vm9 = vcmp.lt.s32.totalorder %v4538_v44, 3  ;;  %vm736_vm10 = vcmp.lt.s32.totalorder %v4538_v44, 4  ;;  %v741_v39 = vsel %vm733_vm7, %v720_v17, %v723_v18  ;;  %v737_v40 = vsel %vm733_vm7, %v717_v3, %v720_v17 }
 0x12b   : > { %v738_v41 = vsel %vm736_vm10, %v726_v24, 2102212464  ;;  %v742_v51 = vsel %vm736_vm10, %v729_v27, 920167782  ;;  %v745_v55 = vsel %vm733_vm7, %v723_v18, %v726_v24  ;;  %v746_v4 = vsel %vm736_vm10, %v732_v32, 1326507024 }
 0x12c   : > { %v739_v60 = vsel %vm735_vm9, %v723_v18, %v738_v41  ;;  %v743_v62 = vsel %vm735_vm9, %v726_v24, %v742_v51  ;;  %v749_v7 = vshll.u32 %v709_v58, 8  ;;  %v1144_v10 = vshrl.u32 %v7193_v11, %v4588_v31 }
 0x12d   : > { %v4612_v12 = vshll.u32 %v7193_v11, %v4567_v8  ;;  %v1231_v14 = vadd.s32 1, %v3897_v9  ;;  %v744_v3 = vsel %vm734_vm8, %v741_v39, %v743_v62  ;;  %v4618_v15 = vshrl.u32 %v7170_v20, %v4588_v31 }
 0x12e   : > { %v747_v16 = vsel %vm735_vm9, %v729_v27, %v746_v4  ;;  %v4622_v17 = vmul.u32.u64.low %v749_v7, %v744_v3  ;;  %v4623_v58 = vmul.u32.u64.high %v749_v7, %v744_v3, %v4622_v17  ;;  %v4626_v18 = vor.u32 %v1040_v33, %v1039_v22 }
 0x12f   : > { %v1044_v19 = vor.u32 %v4598_v35, %v4585_v28  ;;  %v740_v9 = vsel %vm734_vm8, %v737_v40, %v739_v60  ;;  %v748_v21 = vsel %vm734_vm8, %v745_v55, %v747_v16  ;;  %v3901_v24 = vadd.s32 4294967169, %v1329_v37 }
 0x130   : > { %v4634_v32 = vmul.u32.u64.low %v749_v7, %v748_v21  ;;  %v4635_v39 = vmul.u32.u64.high %v749_v7, %v748_v21, %v4634_v32  ;;  %v916_v27 = vand.u32 8388607, %v7169_v45  ;;  %vm1232_vm11 = vcmp.gt.s32.totalorder %v1231_v14, 0 }
 0x131   : > { %v926_v22 = vshll.u32 %v7180_v2, %v4534_v26  ;;  %v927_v28 = vshrl.u32 %v7176_v59, %v4557_v57  ;;  %v929_v33 = vshll.u32 %v7176_v59, %v4534_v26  ;;  %v930_v44 = vshrl.u32 %v7173_v61, %v4557_v57 }
 0x132   : > { %v756_v35 = vmul.u32 %v749_v7, %v740_v9  ;;  %v759_v37 = vadd.s32 1, %v4623_v58  ;;  %v932_v40 = vshll.u32 %v7173_v61, %v4534_v26  ;;  %v933_v41 = vshrl.u32 %v7178_v6, %v4557_v57 }
 0x133   : > { %v928_v51 = vor.u32 %v927_v28, %v926_v22  ;;  %v931_v55 = vor.u32 %v930_v44, %v929_v33  ;;  %v935_v60 = vshll.u32 %v7178_v6, %v4534_v26  ;;  %v936_v62 = vshrl.u32 %v7193_v11, %v4557_v57 }
 0x134   : > { %vm758_vm12 = vc.u32 %v4635_v39, %v4622_v17  ;;  %v934_v4 = vor.u32 %v933_v41, %v932_v40  ;;  %v938_v7 = vshll.u32 %v7193_v11, %v4534_v26  ;;  %v939_v3 = vshrl.u32 %v7170_v20, %v4557_v57 }
 0x135   : > { %v760_v16 = vsel %vm758_vm12, %v759_v37, %v4623_v58  ;;  %v917_v9 = vor.u32 8388608, %v916_v27  ;;  %v925_v21 = vshrl.u32 %v7180_v2, %v4557_v57  ;;  %v937_v32 = vor.u32 %v936_v62, %v935_v60 }
 0x136   : > { %v761_v22 = vadd.s32 %v760_v16, %v756_v35  ;;  %v940_v28 = vor.u32 %v939_v3, %v938_v7  ;;  %vm941_vm13 = vcmp.lt.s32.totalorder %v4547_v49, 1  ;;  %vm944_vm14 = vcmp.lt.s32.totalorder %v4547_v49, 4 }
 0x137   : > { %vm943_vm15 = vcmp.lt.s32.totalorder %v4547_v49, 3  ;;  %v946_v33 = vsel %vm944_vm14, %v934_v4, 2102212464  ;;  %v949_v26 = vsel %vm941_vm13, %v928_v51, %v931_v55  ;;  %v950_v44 = vsel %vm944_vm14, %v937_v32, 920167782 }
 0x138   : > { %v762_v40 = vadd.s32 536870912, %v761_v22  ;;  %vm942_vm0 = vcmp.lt.s32.totalorder %v4547_v49, 2  ;;  %v951_v58 = vsel %vm943_vm15, %v934_v4, %v950_v44  ;;  %v953_v27 = vsel %vm941_vm13, %v931_v55, %v934_v4 }
 0x139   : > { %v1335_v37 = vadd.s32 1, %v3901_v24  ;;  %v952_v57 = vsel %vm942_vm0, %v949_v26, %v951_v58  ;;  %v954_v35 = vsel %vm944_vm14, %v940_v28, 1326507024  ;;  %v957_v41 = vshll.u32 %v917_v9, 8 }
 0x13a   : > { %v4671_v60 = vshrl.u32 %v762_v40, 30  ;;  %v945_v62 = vsel %vm941_vm13, %v925_v21, %v928_v51  ;;  %v947_v7 = vsel %vm943_vm15, %v931_v55, %v946_v33  ;;  %v955_v3 = vsel %vm943_vm15, %v937_v32, %v954_v35 }
 0x13b   : > { %v4674_v16 = vor.u32 %v1144_v10, %v4592_v30  ;;  %v956_v0 = vsel %vm942_vm0, %v953_v27, %v955_v3  ;;  %v4678_v45 = vmul.u32.u64.low %v957_v41, %v952_v57  ;;  %v4679_v44 = vmul.u32.u64.high %v957_v41, %v952_v57, %v4678_v45 }
 0x13c   : > { %v1233_v24 = vsel %vm1232_vm11, %v1231_v14, 0  ;;  %v764_v4 = vshll.u32 %v4671_v60, 30  ;;  %v4684_v9 = vmul.u32.u64.low %v957_v41, %v956_v0  ;;  %v4685_v28 = vmul.u32.u64.high %v957_v41, %v956_v0, %v4684_v9 }
 0x13d   : > { %vm1048_vm1 = vcmp.lt.s32.totalorder %v4562_v63, 4  ;;  %v1148_v30 = vor.u32 %v4618_v15, %v4612_v12  ;;  %vm1152_vm2 = vcmp.lt.s32.totalorder %v4581_v23, 4  ;;  %v948_v10 = vsel %vm942_vm0, %v945_v62, %v947_v7 }
 0x13e   : > { %v4696_v51 = vsel %vm1048_vm1, %v4626_v18, 920167782  ;;  %v4700_v14 = vsel %vm1048_vm1, %v1044_v19, 1326507024  ;;  %vm1336_vm3 = vcmp.gt.s32.totalorder %v1335_v37, 0  ;;  %v4702_v0 = vsub.s32 %v761_v22, %v764_v4 }
 0x13f   : > { %v4707_v12 = vsel %vm1152_vm2, %v4674_v16, 920167782  ;;  %v4709_v15 = vshrl.u32 %v1233_v24, 5  ;;  %v4711_v49 = vand.u32 31, %v1233_v24  ;;  %v967_v55 = vadd.s32 1, %v4679_v44 }
 0x140   : > { %v767_v21 = vsub.s32 0, %v4702_v0  ;;  %v964_v32 = vmul.u32 %v957_v41, %v948_v10  ;;  %vm966_vm4 = vc.u32 %v4685_v28, %v4678_v45  ;;  %v615_v19 = vshrl.u32 %v7176_v59, %v4543_v47 }
 0x141   : > { %7216 = vst [vmem:[#allocation3_spill] sm:$0xff] %v4709_v15  ;;  %v4721_v22 = vsel %vm1152_vm2, %v1148_v30, 1326507024  ;;  %v4723_v33 = vsel %vm1336_vm3, %v1335_v37, 0  ;;  %v968_v26 = vsel %vm966_vm4, %v967_v55, %v4679_v44  ;;  %v618_v40 = vshrl.u32 %v7173_v61, %v4543_v47 }
 0x142   : > { %v3878_v58 = vmin.u32 %v767_v21, %v4702_v0  ;;  %v969_v27 = vadd.s32 %v968_v26, %v964_v32  ;;  %v614_v57 = vshll.u32 %v7180_v2, %v4525_v34  ;;  %v621_v35 = vshrl.u32 %v7178_v6, %v4543_v47 }
 0x143   : > { %v617_v41 = vshll.u32 %v7176_v59, %v4525_v34  ;;  %v623_v37 = vshll.u32 %v7178_v6, %v4525_v34  ;;  %v624_v62 = vshrl.u32 %v7193_v11, %v4543_v47  ;;  %v627_v7 = vshrl.u32 %v7170_v20, %v4543_v47 }
 0x144   : > { %v769_v3 = vclz %v3878_v58  ;;  %v604_v44 = vand.u32 8388607, %v7172_v46  ;;  %v616_v24 = vor.u32 %v615_v19, %v614_v57  ;;  %v620_v4 = vshll.u32 %v7173_v61, %v4525_v34 }
 0x145   : > { %v970_v9 = vadd.s32 536870912, %v969_v27  ;;  %v619_v30 = vor.u32 %v618_v40, %v617_v41  ;;  %v625_v10 = vor.u32 %v624_v62, %v623_v37  ;;  %v626_v55 = vshll.u32 %v7193_v11, %v4525_v34 }
 0x146   : > { %v4748_v21 = vand.u32 31, %v4723_v33  ;;  %v757_v32 = vadd.s32 %v4622_v17, %v4635_v39  ;;  %v3879_v26 = vadd.s32 4294967294, %v769_v3  ;;  %v622_v58 = vor.u32 %v621_v35, %v620_v4 }
 0x147   : > { %v971_v20 = vshrl.u32 %v970_v9, 30  ;;  %v613_v19 = vshrl.u32 %v7180_v2, %v4543_v47  ;;  %v628_v57 = vor.u32 %v627_v7, %v626_v55  ;;  %vm632_vm5 = vcmp.lt.s32.totalorder %v4536_v43, 4 }
 0x148   : > { %vm3880_vm6 = vcmp.lt.s32.totalorder %v3879_v26, 0  ;;  %v605_v40 = vor.u32 8388608, %v604_v44  ;;  %vm629_vm7 = vcmp.lt.s32.totalorder %v4536_v43, 1  ;;  %v638_v34 = vsel %vm632_vm5, %v625_v10, 920167782 }
 0x149   : > { %vm703_vm8 = vcmp.lt.s32.totalorder %v4504_v42, 0  ;;  %v772_v41 = vsel %vm3880_vm6, 0, %v3879_v26  ;;  %v972_v17 = vshll.u32 %v971_v20, 30  ;;  %vm631_vm9 = vcmp.lt.s32.totalorder %v4536_v43, 3 }
 0x14a   : > { %v637_v39 = vsel %vm629_vm7, %v616_v24, %v619_v30  ;;  %v773_v47 = vsub.s32 32, %v772_v41  ;;  %v777_v35 = vsub.s32 4294967266, %v772_v41  ;;  %v639_v37 = vsel %vm631_vm9, %v622_v58, %v638_v34 }
 0x14b   : > { %v641_v62 = vsel %vm629_vm7, %v619_v30, %v622_v58  ;;  %v4766_v7 = vsub.s32 %v969_v27, %v972_v17  ;;  %vm630_vm10 = vcmp.lt.s32.totalorder %v4536_v43, 2  ;;  %v634_v3 = vsel %vm632_vm5, %v622_v58, 2102212464 }
 0x14c   : > { %v642_v44 = vsel %vm632_vm5, %v628_v57, 1326507024  ;;  %vm4775_vm11 = vcmp.le.f32.partialorder %v701_v29, 0.7853982  ;;  %v774_v9 = vshll.u32 %v4702_v0, %v772_v41  ;;  %v775_v55 = vshrl.u32 %v757_v32, %v773_v47 }
 0x14d   : > { %v778_v26 = vadd.s32 127, %v777_v35  ;;  %v643_v27 = vsel %vm631_vm9, %v625_v10, %v642_v44  ;;  %v975_v34 = vsub.s32 0, %v4766_v7  ;;  %v640_v58 = vsel %vm630_vm10, %v637_v39, %v639_v37 }
 0x14e   : > { %v644_v57 = vsel %vm630_vm10, %v641_v62, %v643_v27  ;;  %v645_v17 = vshll.u32 %v605_v40, 8  ;;  %v776_v29 = vor.u32 %v775_v55, %v774_v9  ;;  %v787_v61 = vsub.s32 4, %v4671_v60 }
 0x14f   : > { %v779_v46 = vshll.u32 %v778_v26, 23  ;;  %v633_v0 = vsel %vm629_vm7, %v613_v19, %v616_v24  ;;  %v3886_v32 = vmin.u32 %v975_v34, %v4766_v7  ;;  %v635_v10 = vsel %vm631_vm9, %v619_v30, %v634_v3 }
 0x150   : > { %v4793_v41 = vmul.u32.u64.low %v645_v17, %v644_v57  ;;  %v4794_v47 = vmul.u32.u64.high %v645_v17, %v644_v57, %v4793_v41  ;;  %v995_v35 = vsub.s32 4, %v971_v20  ;;  %v4801_v40 = vshrl.u32 %v4723_v33, 5 }
 0x151   : > { %v780_v39 = vor.u32 4788187, %v779_v46  ;;  %v4796_v37 = vmul.u32.u64.low %v645_v17, %v640_v58  ;;  %v4797_v62 = vmul.u32.u64.high %v645_v17, %v640_v58, %v4796_v37  ;;  %v4804_v44 = vsub.s32 32, %v4748_v21 }
 0x152   : > { %v4808_v24 = vshll.u32 %v7178_v6, %v4748_v21  ;;  %v977_v30 = vclz %v3886_v32  ;;  %v783_v3 = vcvt.s32.f32 %v776_v29  ;;  %v788_v46 = vsel %vm703_vm8, %v787_v61, %v4671_v60 }
 0x153   : > { %v781_v19 = vand.u32 2147483647, %v780_v39  ;;  %v636_v9 = vsel %vm630_vm10, %v633_v0, %v635_v10  ;;  %v4817_v33 = vshll.u32 %v7193_v11, %v4748_v21  ;;  %vm911_vm12 = vcmp.lt.s32.totalorder %v4510_v54, 0 }
 0x154   : > { %v3887_v55 = vadd.s32 4294967294, %v977_v30  ;;  %vm654_vm13 = vc.u32 %v4794_v47, %v4796_v37  ;;  %v996_v27 = vsel %vm911_vm12, %v995_v35, %v971_v20  ;;  %v655_v34 = vadd.s32 1, %v4797_v62 }
 0x155   : > { %v784_v26 = vmul.f32 %v783_v3, %v781_v19  ;;  %v7175_v61 = vand.u32 2147483647, %v4508_v50  ;;  %v790_v43 = vsel %vm4775_vm11, 0, %v788_v46  ;;  %v7219_v60 = vand.u32 2147483647, %v4510_v54 }
 0x156   : > { %vm3888_vm15 = vcmp.lt.s32.totalorder %v3887_v55, 0  ;;  %v652_v57 = vmul.u32 %v645_v17, %v636_v9  ;;  %v965_v0 = vadd.s32 %v4678_v45, %v4685_v28  ;;  %v656_v32 = vsel %vm654_vm13, %v655_v34, %v4797_v62 }
 0x157   : > { %vm4830_vm14 = vcmp.le.f32.partialorder %v7219_v60, 0.7853982  ;;  %v785_v29 = vxor.u32 2147483648, %v784_v26  ;;  %v980_v20 = vsel %vm3888_vm15, 0, %v3887_v55  ;;  %v812_v17 = vand.u32 8388607, %v7175_v61 }
 0x158   : > { %v981_v10 = vsub.s32 32, %v980_v20  ;;  %v985_v41 = vsub.s32 4294967266, %v980_v20  ;;  %v998_v39 = vsel %vm4830_vm14, 0, %v996_v27  ;;  %v657_v35 = vadd.s32 %v656_v32, %v652_v57 }
 0x159   : > { %v786_v30 = vsel %vm703_vm8, %v785_v29, %v784_v26  ;;  %v982_v19 = vshll.u32 %v4766_v7, %v980_v20  ;;  %v822_v45 = vshll.u32 %v7180_v2, %v4528_v36  ;;  %v823_v9 = vshrl.u32 %v7176_v59, %v4550_v52 }
 0x15a   : > { %v789_v28 = vsel %vm4775_vm11, %v4504_v42, %v786_v30  ;;  %v983_v62 = vshrl.u32 %v965_v0, %v981_v10  ;;  %v986_v3 = vadd.s32 127, %v985_v41  ;;  %v658_v46 = vadd.s32 536870912, %v657_v35 }
 0x15b   : > { %v825_v55 = vshll.u32 %v7176_v59, %v4528_v36  ;;  %v7222_v7 = vmov 2131351028   ;;  %v832_v27 = vshrl.u32 %v7193_v11, %v4550_v52  ;;  %v829_v4 = vshrl.u32 %v7178_v6, %v4550_v52 }
 0x15c   : > { %v826_v26 = vshrl.u32 %v7222_v7, %v4550_v52  ;;  %v984_v34 = vor.u32 %v983_v62, %v982_v19  ;;  %v987_v60 = vshll.u32 %v986_v3, 23  ;;  %v4857_v57 = vshrl.u32 %v658_v46, 30 }
 0x15d   : > { %4189 = vcosq.f32 %v789_v28  ;;  %v831_v29 = vshll.u32 %v7178_v6, %v4528_v36  ;;  %v834_v0 = vshll.u32 %v7193_v11, %v4528_v36  ;;  %v7223_v20 = vmov 1326507024  }
 0x15e   : > { %v835_v32 = vshrl.u32 %v7223_v20, %v4550_v52  ;;  %4191 = vsinq.f32 %v789_v28  ;;  %v988_v10 = vor.u32 4788187, %v987_v60  ;;  %v660_v41 = vshll.u32 %v4857_v57, 30 }
 0x15f   : > { %v828_v30 = vshll.u32 %v7222_v7, %v4528_v36  ;;  %v824_v19 = vor.u32 %v823_v9, %v822_v45  ;;  %v827_v62 = vor.u32 %v826_v26, %v825_v55  ;;  %v833_v3 = vor.u32 %v832_v27, %v831_v29 }
 0x160   : > { %v836_v46 = vor.u32 %v835_v32, %v834_v0  ;;  %v989_v61 = vand.u32 2147483647, %v988_v10  ;;  %v991_v59 = vcvt.s32.f32 %v984_v34  ;;  %v4870_v6 = vsub.s32 %v657_v35, %v660_v41 }
 0x161   : > { %v830_v2 = vor.u32 %v829_v4, %v828_v30  ;;  %v4874_v25 = vshrl.u32 %v7193_v11, %v4804_v44  ;;  %v4878_v28 = vshrl.u32 %v7223_v20, %v4804_v44  ;;  %v794_v60 = vadd.s32 3, %v790_v43 }
 0x162   : > { %v1002_v15 = vadd.s32 3, %v998_v39  ;;  %v992_v36 = vmul.f32 %v991_v59, %v989_v61  ;;  %v663_v45 = vsub.s32 0, %v4870_v6  ;;  %v813_v9 = vor.u32 8388608, %v812_v17 }
 0x163   : > { %vm840_vm0 = vcmp.lt.s32.totalorder %v4545_v48, 4  ;;  %vm837_vm3 = vcmp.lt.s32.totalorder %v4545_v48, 1  ;;  %vm839_vm4 = vcmp.lt.s32.totalorder %v4545_v48, 3  ;;  %v795_v39 = vand.u32 3, %v794_v60 }
 0x164   : > { %v846_v35 = vsel %vm840_vm0, %v833_v3, 920167782  ;;  %v850_v55 = vsel %vm840_vm0, %v836_v46, 1326507024  ;;  %v993_v26 = vxor.u32 2147483648, %v992_v36  ;;  %v3874_v43 = vmin.u32 %v663_v45, %v4870_v6 }
 0x165   : > { %v845_v59 = vsel %vm837_vm3, %v824_v19, %v827_v62  ;;  %v847_v61 = vsel %vm839_vm4, %v830_v2, %v846_v35  ;;  %v7224_v17 = vmov 683565275   ;;  %v849_v34 = vsel %vm837_vm3, %v827_v62, %v830_v2 }
 0x166   : > { %v821_v27 = vshrl.u32 %v7224_v17, %v4550_v52  ;;  %v851_v4 = vsel %vm839_vm4, %v833_v3, %v850_v55  ;;  %v994_v29 = vsel %vm911_vm12, %v993_v26, %v992_v36  ;;  %v665_v0 = vclz %v3874_v43 }
 0x167   : > { %vm838_vm5 = vcmp.lt.s32.totalorder %v4545_v48, 2  ;;  %v842_v32 = vsel %vm840_vm0, %v830_v2, 2102212464  ;;  %v4190_v10 = vpop.eup %4189  ;;  %v997_v52 = vsel %vm4830_vm14, %v4510_v54, %v994_v29  ;;  %v4907_v41 = vand.u32 3, %v1002_v15 }
 0x168   : > { %v848_v30 = vsel %vm838_vm5, %v845_v59, %v847_v61  ;;  %v853_v3 = vshll.u32 %v813_v9, 8  ;;  %v4192_v46 = vpop.eup %4191  ;;  %4193 = vcosq.f32 %v997_v52  ;;  %v3875_v60 = vadd.s32 4294967294, %v665_v0 }
 0x169   : > { %v841_v36 = vsel %vm837_vm3, %v821_v27, %v824_v19  ;;  %v852_v2 = vsel %vm838_vm5, %v849_v34, %v851_v4  ;;  %vm796_vm6 = vcmp.lt.s32.totalorder %v795_v39, 2  ;;  %4195 = vsinq.f32 %v997_v52 }
 0x16a   : > { %v843_v58 = vsel %vm839_vm4, %v827_v62, %v842_v32  ;;  %v4917_v15 = vmul.u32.u64.low %v853_v3, %v852_v2  ;;  %v4918_v45 = vmul.u32.u64.high %v853_v3, %v852_v2, %v4917_v15  ;;  %vm797_vm7 = vcmp.eq.s32.totalorder %v795_v39, 0 }
 0x16b   : > { %vm3876_vm8 = vcmp.lt.s32.totalorder %v3875_v60, 0  ;;  %v4920_v9 = vmul.u32.u64.low %v853_v3, %v848_v30  ;;  %v4921_v35 = vmul.u32.u64.high %v853_v3, %v848_v30, %v4920_v9  ;;  %v798_v55 = vxor.u32 2147483648, %v4192_v46 }
 0x16c   : > { %vm800_vm9 = vcmp.eq.s32.totalorder %v795_v39, 2  ;;  %v801_v19 = vxor.u32 2147483648, %v4190_v10  ;;  %v668_v26 = vsel %vm3876_vm8, 0, %v3875_v60  ;;  %vm793_vm10 = vweird.f32 %v4504_v42 }
 0x16d   : > { %v653_v43 = vadd.s32 %v4796_v37, %v4794_v47  ;;  %v669_v59 = vsub.s32 32, %v668_v26  ;;  %v673_v62 = vsub.s32 4294967266, %v668_v26  ;;  %v844_v61 = vsel %vm838_vm5, %v841_v36, %v843_v58 }
 0x16e   : > { %vm1005_vm11 = vcmp.eq.s32.totalorder %v4907_v41, 0  ;;  %vm1008_vm12 = vcmp.eq.s32.totalorder %v4907_v41, 2  ;;  %vm862_vm13 = vc.u32 %v4918_v45, %v4920_v9  ;;  %v7185_v27 = vand.u32 2147483647, %v4516_v5 }
 0x16f   : > { %vm1004_vm14 = vcmp.lt.s32.totalorder %v4907_v41, 2  ;;  %v670_v34 = vshll.u32 %v4870_v6, %v668_v26  ;;  %v671_v4 = vshrl.u32 %v653_v43, %v669_v59  ;;  %v674_v47 = vadd.s32 127, %v673_v62 }
 0x170   : > { %v863_v37 = vadd.s32 1, %v4921_v35  ;;  %v799_v48 = vsel %vm797_vm7, %v4190_v10, %v798_v55  ;;  %v802_v29 = vsel %vm800_vm9, %v801_v19, %v4192_v46  ;;  %vm1001_vm15 = vweird.f32 %v4510_v54 }
 0x171   : > { %v860_v0 = vmul.u32 %v853_v3, %v844_v61  ;;  %v7225_v32 = vmov 2475754826   ;;  %v672_v30 = vor.u32 %v671_v4, %v670_v34  ;;  %v675_v60 = vshll.u32 %v674_v47, 23 }
 0x172   : > { %v1135_v52 = vshrl.u32 %v7225_v32, %v4588_v31  ;;  %v864_v36 = vsel %vm862_vm13, %v863_v37, %v4921_v35  ;;  %v1138_v6 = vshrl.u32 %v7222_v7, %v4588_v31  ;;  %v1134_v58 = vshll.u32 %v7224_v17, %v4567_v8  ;;  %v4194_v15 = vpop.eup %4193 }
 0x173   : > { %v865_v2 = vadd.s32 %v864_v36, %v860_v0  ;;  %v1137_v10 = vshll.u32 %v7225_v32, %v4567_v8  ;;  %v7226_v46 = vmov 2102212464   ;;  %v803_v55 = vsel %vm796_vm6, %v799_v48, %v802_v29  ;;  %v4196_v43 = vpop.eup %4195 }
 0x174   : > { %v1141_v3 = vshrl.u32 %v7226_v46, %v4588_v31  ;;  %vm599_vm0 = vcmp.lt.s32.totalorder %v4502_v38, 0  ;;  %v676_v19 = vor.u32 4788187, %v675_v60  ;;  %v1124_v35 = vand.u32 8388607, %v7185_v27 }
 0x175   : > { %v1140_v26 = vshll.u32 %v7222_v7, %v4567_v8  ;;  %v1009_v59 = vxor.u32 2147483648, %v4194_v15  ;;  %v866_v62 = vadd.s32 536870912, %v865_v2  ;;  %v1136_v61 = vor.u32 %v1135_v52, %v1134_v58 }
 0x176   : > { %v1139_v34 = vor.u32 %v1138_v6, %v1137_v10  ;;  %v1006_v4 = vxor.u32 2147483648, %v4196_v43  ;;  %v677_v47 = vand.u32 2147483647, %v676_v19  ;;  %v679_v37 = vcvt.s32.f32 %v672_v30 }
 0x177   : > { %v1142_v0 = vor.u32 %v1141_v3, %v1140_v26  ;;  %v804_v39 = vsel %vm793_vm10, nan, %v803_v55  ;;  %v1010_v48 = vsel %vm1008_vm12, %v1009_v59, %v4196_v43  ;;  %v683_v29 = vsub.s32 4, %v4857_v57 }
 0x178   : > { %v867_v60 = vshrl.u32 %v866_v62, 30  ;;  %v1007_v8 = vsel %vm1005_vm11, %v4194_v15, %v1006_v4  ;;  %v680_v36 = vmul.f32 %v679_v37, %v677_v47  ;;  %v1125_v27 = vor.u32 8388608, %v1124_v35 }
 0x179   : > { %vm1149_vm3 = vcmp.lt.s32.totalorder %v4581_v23, 1  ;;  %v1011_v52 = vsel %vm1004_vm14, %v1007_v8, %v1010_v48  ;;  %vm1151_vm4 = vcmp.lt.s32.totalorder %v4581_v23, 3  ;;  %vm1150_vm5 = vcmp.lt.s32.totalorder %v4581_v23, 2 }
 0x17a   : > { %v868_v30 = vshll.u32 %v867_v60, 30  ;;  %v1157_v42 = vsel %vm1149_vm3, %v1136_v61, %v1139_v34  ;;  %v1012_v6 = vsel %vm1001_vm15, nan, %v1011_v52  ;;  %v681_v58 = vxor.u32 2147483648, %v680_v36 }
 0x17b   : > { %v1159_v10 = vsel %vm1151_vm4, %v1142_v0, %v4707_v12  ;;  %v1161_v3 = vsel %vm1149_vm3, %v1139_v34, %v1142_v0  ;;  %v4041_v15 = vpack.c.bf16 %v1012_v6, %v804_v39  ;;  %v1163_v55 = vsel %vm1151_vm4, %v4674_v16, %v4721_v22 }
 0x17c   : > { %v4977_v41 = vsub.s32 %v865_v2, %v868_v30  ;;  %v1356_v54 = vor.u32 %v4878_v28, %v4817_v33  ;;  %v1154_v19 = vsel %vm1152_vm2, %v1142_v0, 2102212464  ;;  %v1164_v12 = vsel %vm1150_vm5, %v1161_v3, %v1163_v55 }
 0x17d   : > { %v1165_v35 = vshll.u32 %v1125_v27, 8  ;;  %4042 = vmatprep.subr.bf16.mxu1 %v4041_v15  ;;  %v682_v2 = vsel %vm599_vm0, %v681_v58, %v680_v36  ;;  %v1133_v43 = vshrl.u32 %v7224_v17, %v4588_v31  ;;  %v1160_v16 = vsel %vm1150_vm5, %v1157_v42, %v1159_v10 }
 0x17e   : > { %v871_v26 = vsub.s32 0, %v4977_v41  ;;  %v7227_v22 = vand.u32 2147483647, %v4502_v38  ;;  %v684_v28 = vsel %vm599_vm0, %v683_v29, %v4857_v57  ;;  %v891_v4 = vsub.s32 4, %v867_v60 }
 0x17f   : > { %v5006_v27 = vmul.u32.u64.low %v1165_v35, %v1164_v12  ;;  %v5007_v59 = vmul.u32.u64.high %v1165_v35, %v1164_v12, %v5006_v27  ;;  %v1153_v31 = vsel %vm1149_vm3, %v1133_v43, %v1136_v61  ;;  %v1155_v47 = vsel %vm1151_vm4, %v1139_v34, %v1154_v19 }
 0x180   : > { %vm4999_vm6 = vcmp.le.f32.partialorder %v7227_v22, 0.7853982  ;;  %v3882_v62 = vmin.u32 %v871_v26, %v4977_v41  ;;  %vm1360_vm2 = vcmp.lt.s32.totalorder %v4801_v40, 4  ;;  %v5023_v39 = vsub.s32 32, %v4711_v49 }
 0x181   : > { %v685_v37 = vsel %vm4999_vm6, %v4502_v38, %v682_v2  ;;  %v5018_v0 = vmul.u32.u64.low %v1165_v35, %v1160_v16  ;;  %v5019_v57 = vmul.u32.u64.high %v1165_v35, %v1160_v16, %v5018_v0  ;;  %v1353_v48 = vor.u32 %v4874_v25, %v4808_v24 }
 0x182   : > { %v1370_v61 = vsel %vm1360_vm2, %v1356_v54, 1326507024  ;;  %v873_v34 = vclz %v3882_v62  ;;  %v686_v29 = vsel %vm4999_vm6, 0, %v684_v28  ;;  %vm807_vm7 = vcmp.lt.s32.totalorder %v4508_v50, 0 }
 0x183   : > { %v861_v8 = vadd.s32 %v4920_v9, %v4918_v45  ;;  %v1156_v36 = vsel %vm1150_vm5, %v1153_v31, %v1155_v47  ;;  %4197 = vcosq.f32 %v685_v37  ;;  %v892_v25 = vsel %vm807_vm7, %v891_v4, %v867_v60 }
 0x184   : > { %v3883_v52 = vadd.s32 4294967294, %v873_v34  ;;  %vm1174_vm8 = vc.u32 %v5007_v59, %v5018_v0  ;;  %v1175_v24 = vadd.s32 1, %v5019_v57  ;;  %v1325_v30 = vand.u32 2147483647, %v4554_v56 }
 0x185   : > { %v1343_v42 = vshrl.u32 %v7225_v32, %v4804_v44  ;;  %v1346_v45 = vshrl.u32 %v7222_v7, %v4804_v44  ;;  %v1172_v23 = vmul.u32 %v1165_v35, %v1156_v36  ;;  %v1342_v9 = vshll.u32 %v7224_v17, %v4748_v21 }
 0x186   : > { %vm3884_vm9 = vcmp.lt.s32.totalorder %v3883_v52, 0  ;;  %v1349_v60 = vshrl.u32 %v7226_v46, %v4804_v44  ;;  %v1176_v58 = vsel %vm1174_vm8, %v1175_v24, %v5019_v57  ;;  %v1345_v10 = vshll.u32 %v7225_v32, %v4748_v21 }
 0x187   : > { %v876_v6 = vsel %vm3884_vm9, 0, %v3883_v52  ;;  %v1348_v3 = vshll.u32 %v7222_v7, %v4748_v21  ;;  %4199 = vsinq.f32 %v685_v37  ;;  %v1177_v54 = vadd.s32 %v1176_v58, %v1172_v23 }
 0x188   : > { %v877_v15 = vsub.s32 32, %v876_v6  ;;  %v881_v55 = vsub.s32 4294967266, %v876_v6  ;;  %v1332_v19 = vand.u32 8388607, %v1325_v30  ;;  %v1344_v12 = vor.u32 %v1343_v42, %v1342_v9 }
 0x189   : > { %v1347_v35 = vor.u32 %v1346_v45, %v1345_v10  ;;  %v1350_v2 = vor.u32 %v1349_v60, %v1348_v3  ;;  %v878_v26 = vshll.u32 %v4977_v41, %v876_v6  ;;  %v1178_v22 = vadd.s32 536870912, %v1177_v54 }
 0x18a   : > { %v879_v43 = vshrl.u32 %v861_v8, %v877_v15  ;;  %v882_v16 = vadd.s32 127, %v881_v55  ;;  %v1366_v33 = vsel %vm1360_vm2, %v1353_v48, 920167782  ;;  %v690_v28 = vadd.s32 3, %v686_v29 }
 0x18b   : > { %v7230_v21 = vand.u32 2147483647, %v4508_v50  ;;  %vm1357_vm11 = vcmp.lt.s32.totalorder %v4801_v40, 1  ;;  %v5067_v31 = vshrl.u32 %v1178_v22, 30  ;;  %vm1359_vm12 = vcmp.lt.s32.totalorder %v4801_v40, 3 }
 0x18c   : > { %v880_v62 = vor.u32 %v879_v43, %v878_v26  ;;  %v883_v4 = vshll.u32 %v882_v16, 23  ;;  %v1333_v47 = vor.u32 8388608, %v1332_v19  ;;  %v1369_v37 = vsel %vm1357_vm11, %v1347_v35, %v1350_v2 }
 0x18d   : > { %vm5062_vm10 = vcmp.le.f32.partialorder %v7230_v21, 0.7853982  ;;  %v1371_v57 = vsel %vm1359_vm12, %v1353_v48, %v1370_v61  ;;  %v4198_v34 = vpop.eup %4197  ;;  %v1180_v8 = vshll.u32 %v5067_v31, 30  ;;  %v1365_v36 = vsel %vm1357_vm11, %v1344_v12, %v1347_v35 }
 0x18e   : > { %v894_v41 = vsel %vm5062_vm10, 0, %v892_v25  ;;  %v884_v29 = vor.u32 4788187, %v883_v4  ;;  %v1367_v52 = vsel %vm1359_vm12, %v1350_v2, %v1366_v33  ;;  %v5081_v24 = vand.u32 3, %v690_v28 }
 0x18f   : > { %v1341_v25 = vshrl.u32 %v7224_v17, %v4804_v44  ;;  %vm1358_vm13 = vcmp.lt.s32.totalorder %v4801_v40, 2  ;;  %v1362_v48 = vsel %vm1360_vm2, %v1350_v2, 2102212464  ;;  %v887_v42 = vcvt.s32.f32 %v880_v62 }
 0x190   : > { %v885_v61 = vand.u32 2147483647, %v884_v29  ;;  %v5088_v45 = vsub.s32 %v1177_v54, %v1180_v8  ;;  %v1372_v23 = vsel %vm1358_vm13, %v1369_v37, %v1371_v57  ;;  %v5094_v9 = vshll.u32 %v7226_v46, %v4711_v49 }
 0x191   : > { %v898_v60 = vadd.s32 3, %v894_v41  ;;  %v1368_v44 = vsel %vm1358_vm13, %v1365_v36, %v1367_v52  ;;  %v1373_v6 = vshll.u32 %v1333_v47, 8  ;;  %v4200_v58 = vpop.eup %4199  ;;  %v5100_v10 = vshrl.u32 %v7193_v11, %v5023_v39 }
 0x192   : > { %v888_v3 = vmul.f32 %v887_v42, %v885_v61  ;;  %v1183_v15 = vsub.s32 0, %v5088_v45  ;;  %v1361_v55 = vsel %vm1357_vm11, %v1341_v25, %v1344_v12  ;;  %vm693_vm14 = vcmp.eq.s32.totalorder %v5081_v24, 0 }
 0x193   : > { %v697_v54 = vxor.u32 2147483648, %v4198_v34  ;;  %v1363_v19 = vsel %vm1359_vm12, %v1347_v35, %v1362_v48  ;;  %v5108_v2 = vmul.u32.u64.low %v1373_v6, %v1372_v23  ;;  %v5109_v26 = vmul.u32.u64.high %v1373_v6, %v1372_v23, %v5108_v2 }
 0x194   : > { %v889_v43 = vxor.u32 2147483648, %v888_v3  ;;  %v3894_v16 = vmin.u32 %v1183_v15, %v5088_v45  ;;  %v5112_v22 = vmul.u32.u64.low %v1373_v6, %v1368_v44  ;;  %v5113_v33 = vmul.u32.u64.high %v1373_v6, %v1368_v44, %v5112_v22 }
 0x195   : > { %vm696_vm15 = vcmp.eq.s32.totalorder %v5081_v24, 2  ;;  %v5117_v28 = vand.u32 3, %v898_v60  ;;  %v1173_v12 = vadd.s32 %v5018_v0, %v5007_v59  ;;  %v1013_v21 = vand.u32 2147483647, %v4514_v1 }
 0x196   : > { %vm692_vm0 = vcmp.lt.s32.totalorder %v5081_v24, 2  ;;  %v694_v35 = vxor.u32 2147483648, %v4200_v58  ;;  %v890_v62 = vsel %vm807_vm7, %v889_v43, %v888_v3  ;;  %v1185_v4 = vclz %v3894_v16 }
 0x197   : > { %v1031_v41 = vshrl.u32 %v7225_v32, %v4572_v13  ;;  %v698_v47 = vsel %vm696_vm15, %v697_v54, %v4200_v58  ;;  %v893_v37 = vsel %vm5062_vm10, %v4508_v50, %v890_v62  ;;  %v1364_v59 = vsel %vm1358_vm13, %v1361_v55, %v1363_v19 }
 0x198   : > { %v1034_v0 = vshrl.u32 %v7222_v7, %v4572_v13  ;;  %4201 = vcosq.f32 %v893_v37  ;;  %v3895_v57 = vadd.s32 4294967294, %v1185_v4  ;;  %vm1382_vm3 = vc.u32 %v5109_v26, %v5112_v22 }
 0x199   : > { %v1030_v29 = vshll.u32 %v7224_v17, %v4552_v53  ;;  %4203 = vsinq.f32 %v893_v37  ;;  %v1383_v8 = vadd.s32 1, %v5113_v33  ;;  %v1020_v27 = vand.u32 8388607, %v1013_v21 }
 0x19a   : > { %v1033_v40 = vshll.u32 %v7225_v32, %v4552_v53  ;;  %vm3896_vm4 = vcmp.lt.s32.totalorder %v3895_v57, 0  ;;  %v1380_v36 = vmul.u32 %v1373_v6, %v1364_v59  ;;  %v1037_v25 = vshrl.u32 %v7226_v46, %v4572_v13 }
 0x19b   : > { %v1032_v52 = vor.u32 %v1031_v41, %v1030_v29  ;;  %v1188_v48 = vsel %vm3896_vm4, 0, %v3895_v57  ;;  %v1384_v61 = vsel %vm1382_vm3, %v1383_v8, %v5113_v33  ;;  %v1036_v23 = vshll.u32 %v7222_v7, %v4552_v53 }
 0x19c   : > { %v1035_v42 = vor.u32 %v1034_v0, %v1033_v40  ;;  %v695_v60 = vsel %vm693_vm14, %v4198_v34, %v694_v35  ;;  %vm904_vm5 = vcmp.eq.s32.totalorder %v5117_v28, 2  ;;  %v1189_v44 = vsub.s32 32, %v1188_v48 }
 0x19d   : > { %v1193_v58 = vsub.s32 4294967266, %v1188_v48  ;;  %v1385_v3 = vadd.s32 %v1384_v61, %v1380_v36  ;;  %v1021_v6 = vor.u32 8388608, %v1020_v27  ;;  %v1038_v15 = vor.u32 %v1037_v25, %v1036_v23 }
 0x19e   : > { %vm1045_vm6 = vcmp.lt.s32.totalorder %v4562_v63, 1  ;;  %vm1047_vm2 = vcmp.lt.s32.totalorder %v4562_v63, 3  ;;  %vm689_vm7 = vweird.f32 %v4502_v38  ;;  %v1191_v55 = vshrl.u32 %v1173_v12, %v1189_v44 }
 0x19f   : > { %v1194_v54 = vadd.s32 127, %v1193_v58  ;;  %v1386_v19 = vadd.s32 536870912, %v1385_v3  ;;  %v1059_v53 = vsel %vm1047_vm2, %v4626_v18, %v4700_v14  ;;  %v699_v34 = vsel %vm692_vm0, %v695_v60, %v698_v47 }
 0x1a0   : > { %v1053_v2 = vsel %vm1045_vm6, %v1032_v52, %v1035_v42  ;;  %v1055_v43 = vsel %vm1047_vm2, %v1038_v15, %v4696_v51  ;;  %v1057_v16 = vsel %vm1045_vm6, %v1035_v42, %v1038_v15  ;;  %v1190_v33 = vshll.u32 %v5088_v45, %v1188_v48 }
 0x1a1   : > { %v1195_v12 = vshll.u32 %v1194_v54, 23  ;;  %v5168_v35 = vshrl.u32 %v1386_v19, 30  ;;  %vm1046_vm8 = vcmp.lt.s32.totalorder %v4562_v63, 2  ;;  %v1029_v18 = vshrl.u32 %v7224_v17, %v4572_v13 }
 0x1a2   : > { %v1050_v14 = vsel %vm1048_vm1, %v1038_v15, 2102212464  ;;  %v1060_v24 = vsel %vm1046_vm8, %v1057_v16, %v1059_v53  ;;  %v1061_v51 = vshll.u32 %v1021_v6, 8  ;;  %v4202_v62 = vpop.eup %4201  ;;  %v1192_v4 = vor.u32 %v1191_v55, %v1190_v33  ;;  %v7233_v53 = vld [vmem:[#allocation3_spill] sm:$0xff]  ;;  %v7234_v16 = vld [vmem:[#allocation2_spill] sm:$0xff] }
 0x1a3   : > { %v1196_v41 = vor.u32 4788187, %v1195_v12  ;;  %v1388_v45 = vshll.u32 %v5168_v35, 30  ;;  %v1056_v47 = vsel %vm1046_vm8, %v1053_v2, %v1055_v43  ;;  %v4204_v37 = vpop.eup %4203  ;;  %v905_v59 = vxor.u32 2147483648, %v4202_v62 }
 0x1a4   : > { %v1049_v13 = vsel %vm1045_vm6, %v1029_v18, %v1032_v52  ;;  %v5182_v0 = vmul.u32.u64.low %v1061_v51, %v1060_v24  ;;  %v5183_v57 = vmul.u32.u64.high %v1061_v51, %v1060_v24, %v5182_v0  ;;  %v902_v29 = vxor.u32 2147483648, %v4204_v37 }
 0x1a5   : > { %v1197_v8 = vand.u32 2147483647, %v1196_v41  ;;  %v1389_v27 = vsub.s32 %v1385_v3, %v1388_v45  ;;  %v1051_v40 = vsel %vm1047_vm2, %v1035_v42, %v1050_v14  ;;  %vm901_vm1 = vcmp.eq.s32.totalorder %v5117_v28, 0 }
 0x1a6   : > { %v906_v36 = vsel %vm904_vm5, %v905_v59, %v4204_v37  ;;  %v5190_v25 = vmul.u32.u64.low %v1061_v51, %v1056_v47  ;;  %v5191_v48 = vmul.u32.u64.high %v1061_v51, %v1056_v47, %v5190_v25  ;;  %vm900_vm9 = vcmp.lt.s32.totalorder %v5117_v28, 2 }
 0x1a7   : > { %v903_v52 = vsel %vm901_vm1, %v4202_v62, %v902_v29  ;;  %v1199_v61 = vcvt.s32.f32 %v1192_v4  ;;  %v1391_v23 = vsub.s32 0, %v1389_v27  ;;  %v700_v60 = vsel %vm689_vm7, nan, %v699_v34 }
 0x1a8   : > { %vm897_vm10 = vweird.f32 %v4508_v50  ;;  %v907_v42 = vsel %vm900_vm9, %v903_v52, %v906_v36  ;;  %v1052_v44 = vsel %vm1046_vm8, %v1049_v13, %v1051_v40  ;;  %vm1070_vm11 = vc.u32 %v5183_v57, %v5190_v25 }
 0x1a9   : > { %v908_v58 = vsel %vm897_vm10, nan, %v907_v42  ;;  %v1200_v3 = vmul.f32 %v1199_v61, %v1197_v8  ;;  %v3902_v6 = vmin.u32 %v1391_v23, %v1389_v27  ;;  %v1249_v28 = vor.u32 %v5100_v10, %v5094_v9 }
 0x1aa   : > { %v1251_v15 = vshrl.u32 %v7223_v20, %v5023_v39  ;;  %v4043_v38 = vpack.c.bf16 %v908_v58, %v700_v60  ;;  %v1071_v55 = vadd.s32 1, %v5191_v48  ;;  %v1068_v54 = vmul.u32 %v1061_v51, %v1052_v44 }
 0x1ab   : > { %v1393_v50 = vclz %v3902_v6  ;;  %v1250_v63 = vshll.u32 %v7193_v11, %v4711_v49  ;;  %vm1256_vm12 = vcmp.lt.s32.totalorder %v7233_v53, 4  ;;  %v1201_v34 = vxor.u32 2147483648, %v1200_v3 }
 0x1ac   : > { %4044 = vmatpush1.bf16.msra.mxu1 %v4043_v38  ;;  %v1072_v19 = vsel %vm1070_vm11, %v1071_v55, %v5191_v48  ;;  %v1262_v10 = vsel %vm1256_vm12, %v1249_v28, 920167782  ;;  %vm1119_vm13 = vcmp.lt.s32.totalorder %v4516_v5, 0  ;;  %v1221_v33 = vand.u32 2147483647, %v7234_v16 }
 0x1ad   : > { %v3903_v2 = vadd.s32 4294967294, %v1393_v50  ;;  %v1073_v43 = vadd.s32 %v1072_v19, %v1068_v54  ;;  %v1252_v9 = vor.u32 %v1251_v15, %v1250_v63  ;;  %v1203_v12 = vsub.s32 4, %v5067_v31 }
 0x1ae   : > { %v1381_v18 = vadd.s32 %v5112_v22, %v5109_v26  ;;  %v1239_v51 = vshrl.u32 %v7225_v32, %v5023_v39  ;;  %v1242_v62 = vshrl.u32 %v7222_v7, %v5023_v39  ;;  %v1245_v4 = vshrl.u32 %v7226_v46, %v5023_v39 }
 0x1af   : > { %vm3904_vm14 = vcmp.lt.s32.totalorder %v3903_v2, 0  ;;  %v1074_v14 = vadd.s32 536870912, %v1073_v43  ;;  %v1202_v41 = vsel %vm1119_vm13, %v1201_v34, %v1200_v3  ;;  %v1228_v26 = vand.u32 8388607, %v1221_v33 }
 0x1b0   : > { %v1396_v24 = vsel %vm3904_vm14, 0, %v3903_v2  ;;  %v1238_v22 = vshll.u32 %v7224_v17, %v4711_v49  ;;  %v1241_v59 = vshll.u32 %v7225_v32, %v4711_v49  ;;  %v1244_v13 = vshll.u32 %v7222_v7, %v4711_v49 }
 0x1b1   : > { %v1397_v45 = vsub.s32 32, %v1396_v24  ;;  %v1401_v47 = vsub.s32 4294967266, %v1396_v24  ;;  %v5226_v37 = vshrl.u32 %v1074_v14, 30  ;;  %v1398_v0 = vshll.u32 %v1389_v27, %v1396_v24 }
 0x1b2   : > { %v1266_v36 = vsel %vm1256_vm12, %v1252_v9, 1326507024  ;;  %v1240_v48 = vor.u32 %v1239_v51, %v1238_v22  ;;  %v1243_v52 = vor.u32 %v1242_v62, %v1241_v59  ;;  %v1246_v61 = vor.u32 %v1245_v4, %v1244_v13 }
 0x1b3   : > { %v1399_v29 = vshrl.u32 %v1381_v18, %v1397_v45  ;;  %v1402_v8 = vadd.s32 127, %v1401_v47  ;;  %v1076_v40 = vshll.u32 %v5226_v37, 30  ;;  %v7235_v23 = vand.u32 2147483647, %v4516_v5 }
 0x1b4   : > { %v1204_v27 = vsel %vm1119_vm13, %v1203_v12, %v5067_v31  ;;  %v1411_v3 = vsub.s32 4, %v5168_v35  ;;  %v1229_v6 = vor.u32 8388608, %v1228_v26  ;;  %vm1253_vm0 = vcmp.lt.s32.totalorder %v7233_v53, 1 }
 0x1b5   : > { %vm5241_vm15 = vcmp.le.f32.partialorder %v7235_v23, 0.7853982  ;;  %v1400_v42 = vor.u32 %v1399_v29, %v1398_v0  ;;  %v1403_v44 = vshll.u32 %v1402_v8, 23  ;;  %v5245_v49 = vsub.s32 %v1073_v43, %v1076_v40 }
 0x1b6   : > { %v1205_v58 = vsel %vm5241_vm15, %v4516_v5, %v1202_v41  ;;  %vm1255_vm3 = vcmp.lt.s32.totalorder %v7233_v53, 3  ;;  %v1261_v55 = vsel %vm1253_vm0, %v1240_v48, %v1243_v52  ;;  %v1265_v50 = vsel %vm1253_vm0, %v1243_v52, %v1246_v61 }
 0x1b7   : > { %v1404_v15 = vor.u32 4788187, %v1403_v44  ;;  %v1079_v38 = vsub.s32 0, %v5245_v49  ;;  %v1263_v31 = vsel %vm1255_vm3, %v1246_v61, %v1262_v10  ;;  %v1267_v54 = vsel %vm1255_vm3, %v1249_v28, %v1266_v36 }
 0x1b8   : > { %4205 = vcosq.f32 %v1205_v58  ;;  %v1407_v19 = vcvt.s32.f32 %v1400_v42  ;;  %v1237_v2 = vshrl.u32 %v7224_v17, %v5023_v39  ;;  %vm1254_vm4 = vcmp.lt.s32.totalorder %v7233_v53, 2 }
 0x1b9   : > { %v1405_v63 = vand.u32 2147483647, %v1404_v15  ;;  %v3890_v34 = vmin.u32 %v1079_v38, %v5245_v49  ;;  %4207 = vsinq.f32 %v1205_v58  ;;  %v1258_v43 = vsel %vm1256_vm12, %v1246_v61, 2102212464 }
 0x1ba   : > { %v1264_v12 = vsel %vm1254_vm4, %v1261_v55, %v1263_v31  ;;  %v1268_v28 = vsel %vm1254_vm4, %v1265_v50, %v1267_v54  ;;  %v1206_v18 = vsel %vm5241_vm15, 0, %v1204_v27  ;;  %vm1327_vm5 = vcmp.lt.s32.totalorder %v4554_v56, 0 }
 0x1bb   : > { %v1408_v9 = vmul.f32 %v1407_v19, %v1405_v63  ;;  %v1081_v10 = vclz %v3890_v34  ;;  %v1269_v14 = vshll.u32 %v1229_v6, 8  ;;  %v1257_v51 = vsel %vm1253_vm0, %v1237_v2, %v1240_v48 }
 0x1bc   : > { %v1259_v62 = vsel %vm1255_vm3, %v1243_v52, %v1258_v43  ;;  %vm5291_vm6 = vcmp.le.f32.partialorder %v1325_v30, 0.7853982  ;;  %v1412_v59 = vsel %vm1327_vm5, %v1411_v3, %v5168_v35  ;;  %v1210_v8 = vadd.s32 3, %v1206_v18 }
 0x1bd   : > { %v1409_v39 = vxor.u32 2147483648, %v1408_v9  ;;  %v3891_v24 = vadd.s32 4294967294, %v1081_v10  ;;  %v5282_v4 = vmul.u32.u64.low %v1269_v14, %v1268_v28  ;;  %v5283_v41 = vmul.u32.u64.high %v1269_v14, %v1268_v28, %v5282_v4 }
 0x1be   : > { %v5285_v45 = vmul.u32.u64.low %v1269_v14, %v1264_v12  ;;  %v5286_v47 = vmul.u32.u64.high %v1269_v14, %v1264_v12, %v5285_v45  ;;  %v1260_v29 = vsel %vm1254_vm4, %v1257_v51, %v1259_v62  ;;  %v1414_v30 = vsel %vm5291_vm6, 0, %v1412_v59 }
 0x1bf   : > { %v1410_v22 = vsel %vm1327_vm5, %v1409_v39, %v1408_v9  ;;  %vm3892_vm2 = vcmp.lt.s32.totalorder %v3891_v24, 0  ;;  %v1276_v52 = vmul.u32 %v1269_v14, %v1260_v29  ;;  %v1211_v53 = vand.u32 3, %v1210_v8 }
 0x1c0   : > { %v1413_v13 = vsel %vm5291_vm6, %v4554_v56, %v1410_v22  ;;  %v1084_v0 = vsel %vm3892_vm2, 0, %v3891_v24  ;;  %vm1278_vm7 = vc.u32 %v5283_v41, %v5285_v45  ;;  %v1279_v35 = vadd.s32 1, %v5286_v47 }
 0x1c1   : > { %4209 = vcosq.f32 %v1413_v13  ;;  %v1089_v40 = vsub.s32 4294967266, %v1084_v0  ;;  %v1418_v60 = vadd.s32 3, %v1414_v30  ;;  %v1085_v42 = vsub.s32 32, %v1084_v0 }
 0x1c2   : > { %4211 = vsinq.f32 %v1413_v13  ;;  %v4206_v36 = vpop.eup %4205  ;;  %v1280_v23 = vsel %vm1278_vm7, %v1279_v35, %v5286_v47  ;;  %v1069_v3 = vadd.s32 %v5190_v25, %v5183_v57  ;;  %vm1216_vm8 = vcmp.eq.s32.totalorder %v1211_v53, 2 }
 0x1c3   : > { %v1090_v48 = vadd.s32 127, %v1089_v40  ;;  %v4208_v61 = vpop.eup %4207  ;;  %v1281_v44 = vadd.s32 %v1280_v23, %v1276_v52  ;;  %v1217_v27 = vxor.u32 2147483648, %v4206_v36  ;;  %v1419_v38 = vand.u32 3, %v1418_v60 }
 0x1c4   : > { %v1214_v58 = vxor.u32 2147483648, %v4208_v61  ;;  %v1087_v55 = vshrl.u32 %v1069_v3, %v1085_v42  ;;  %vm1213_vm1 = vcmp.eq.s32.totalorder %v1211_v53, 0  ;;  %v1086_v19 = vshll.u32 %v5245_v49, %v1084_v0 }
 0x1c5   : > { %v1091_v6 = vshll.u32 %v1090_v48, 23  ;;  %v1282_v15 = vadd.s32 536870912, %v1281_v44  ;;  %v1218_v50 = vsel %vm1216_vm8, %v1217_v27, %v4208_v61  ;;  %vm1212_vm9 = vcmp.lt.s32.totalorder %v1211_v53, 2 }
 0x1c6   : > { %v1215_v63 = vsel %vm1213_vm1, %v4206_v36, %v1214_v58  ;;  %vm1424_vm10 = vcmp.eq.s32.totalorder %v1419_v38, 2  ;;  %v1088_v25 = vor.u32 %v1087_v55, %v1086_v19  ;;  %vm1421_vm11 = vcmp.eq.s32.totalorder %v1419_v38, 0 }
 0x1c7   : > { %v5309_v31 = vshrl.u32 %v1282_v15, 30  ;;  %v1092_v34 = vor.u32 4788187, %v1091_v6  ;;  %v1219_v12 = vsel %vm1212_vm9, %v1215_v63, %v1218_v50  ;;  %vm1420_vm12 = vcmp.lt.s32.totalorder %v1419_v38, 2 }
 0x1c8   : > { %vm1209_vm13 = vweird.f32 %v4516_v5  ;;  %vm1417_vm14 = vweird.f32 %v4554_v56  ;;  %v1095_v62 = vcvt.s32.f32 %v1088_v25  ;;  %v1277_v29 = vadd.s32 %v5285_v45, %v5283_v41 }
 0x1c9   : > { %v1284_v2 = vshll.u32 %v5309_v31, 30  ;;  %v1093_v14 = vand.u32 2147483647, %v1092_v34  ;;  %v1220_v24 = vsel %vm1209_vm13, nan, %v1219_v12  ;;  %vm1015_vm0 = vcmp.lt.s32.totalorder %v4514_v1, 0 }
 0x1ca   : > { %vm5322_vm3 = vcmp.le.f32.partialorder %v1013_v21, 0.7853982  ;;  %v1099_v61 = vsub.s32 4, %v5226_v37  ;;  %v1307_v42 = vsub.s32 4, %v5309_v31  ;;  %vm1223_vm4 = vcmp.lt.s32.totalorder %v7234_v16, 0 }
 0x1cb   : > { %v4210_v54 = vpop.eup %4209  ;;  %v1285_v10 = vsub.s32 %v1281_v44, %v1284_v2  ;;  %v1096_v26 = vmul.f32 %v1095_v62, %v1093_v14  ;;  %vm1222_vm5 = vcmp.le.f32.partialorder %v1221_v33, 0.7853982  ;;  %v1440_v62 = vpop.permute.xlu0 %1439 }
 0x1cc   : > { %v4212_v43 = vpop.eup %4211  ;;  %v1425_v9 = vxor.u32 2147483648, %v4210_v54  ;;  %v1100_v21 = vsel %vm1015_vm0, %v1099_v61, %v5226_v37  ;;  %v1308_v3 = vsel %vm1223_vm4, %v1307_v42, %v5309_v31 }
 0x1cd   : > { %v1422_v57 = vxor.u32 2147483648, %v4212_v43  ;;  %v1287_v39 = vsub.s32 0, %v1285_v10  ;;  %v1097_v13 = vxor.u32 2147483648, %v1096_v26  ;;  %v1102_v27 = vsel %vm5322_vm3, 0, %v1100_v21 }
 0x1ce   : > { %v1426_v28 = vsel %vm1424_vm10, %v1425_v9, %v4212_v43  ;;  %v1106_v15 = vadd.s32 3, %v1102_v27  ;;  %v1310_v38 = vsel %vm1222_vm5, 0, %v1308_v3  ;;  %vm1105_vm10 = vweird.f32 %v4514_v1 }
 0x1cf   : > { %v1423_v18 = vsel %vm1421_vm11, %v4210_v54, %v1422_v57  ;;  %v3898_v4 = vmin.u32 %v1287_v39, %v1285_v10  ;;  %v1098_v56 = vsel %vm1015_vm0, %v1097_v13, %v1096_v26  ;;  %v1314_v50 = vadd.s32 3, %v1310_v38 }
 0x1d0   : > { %v1427_v49 = vsel %vm1420_vm12, %v1423_v18, %v1426_v28  ;;  %v1101_v41 = vsel %vm5322_vm3, %v4514_v1, %v1098_v56  ;;  %v1107_v54 = vand.u32 3, %v1106_v15  ;;  %vm1313_vm11 = vweird.f32 %v7234_v16  ;;  %v1430_v1 = vld [vmem:[%s7162_s5 + $0x8] sm:$0xff] }
 0x1d1   : > { %v1428_v51 = vsel %vm1417_vm14, nan, %v1427_v49  ;;  %v1289_v22 = vclz %v3898_v4  ;;  %4213 = vcosq.f32 %v1101_v41  ;;  %v1315_v34 = vand.u32 3, %v1314_v50  ;;  %v1429_v49 = vld [vmem:[%s7162_s5] sm:$0xff]  ;;  %v1445_v4 = vpop.permute.xlu1 %1444 }
 0x1d2   : > { %v4045_v47 = vpack.c.bf16 %v1428_v51, %v1220_v24  ;;  %4215 = vsinq.f32 %v1101_v41  ;;  %vm1109_vm6 = vcmp.eq.s32.totalorder %v1107_v54, 0  ;;  %vm1112_vm2 = vcmp.eq.s32.totalorder %v1107_v54, 2  ;;  %v1432_v51 = vld [vmem:[%s7162_s5 + $0x18] sm:$0xff] }
 0x1d3   : > { %v3899_v59 = vadd.s32 4294967294, %v1289_v22  ;;  %vm1108_vm7 = vcmp.lt.s32.totalorder %v1107_v54, 2  ;;  %vm1320_vm8 = vcmp.eq.s32.totalorder %v1315_v34, 2  ;;  %vm1317_vm1 = vcmp.eq.s32.totalorder %v1315_v34, 0 }
 0x1d4   : > { %4046 = vmatprep.subr.bf16.mxu1 %v4045_v47  ;;  %vm1316_vm9 = vcmp.lt.s32.totalorder %v1315_v34, 2  ;;  %vm1457_vm12 = vcmask 261120   ;;  %v7242_v24 = vmov 0.0   ;;  %v1567_v47 = vpop.permute.xlu0 %1566 }
 0x1d5   : > { %vm3900_vm15 = vcmp.lt.s32.totalorder %v3899_v59, 0  ;;  %v5363_v26 = vpop.permute.xlu1 %1571 }
 0x1d6   : > { %v1292_v0 = vsel %vm3900_vm15, 0, %v3899_v59 }
 0x1d7   : > { %v1293_v8 = vsub.s32 32, %v1292_v0  ;;  %v1297_v5 = vsub.s32 4294967266, %v1292_v0  ;;  %v1294_v40 = vshll.u32 %v1285_v10, %v1292_v0 }
 0x1d8   : > { %v5365_v22 = vpop.permute.xlu0 %1449 }
 0x1d9   : > { %v1295_v30 = vshrl.u32 %v1277_v29, %v1293_v8  ;;  %v1298_v35 = vadd.s32 127, %v1297_v5  ;;  %v5367_v29 = vpop.permute.xlu1 %1454 }
 0x1db   : > { %v1296_v48 = vor.u32 %v1295_v30, %v1294_v40  ;;  %v1299_v52 = vshll.u32 %v1298_v35, 23  ;;  %v4214_v55 = vpop.eup %4213 }
 0x1dc   : > { %v4216_v37 = vpop.eup %4215  ;;  %v1113_v19 = vxor.u32 2147483648, %v4214_v55  ;;  %v1600_v5 = vpop.permute.xlu0 %1599 }
 0x1dd   : > { %v1300_v45 = vor.u32 4788187, %v1299_v52  ;;  %v1303_v53 = vcvt.s32.f32 %v1296_v48  ;;  %v1110_v63 = vxor.u32 2147483648, %v4216_v37  ;;  %v5373_v52 = vpop.permute.xlu1 %1604 }
 0x1de   : > { %v1114_v43 = vsel %vm1112_vm2, %v1113_v19, %v4216_v37 }
 0x1df   : > { %v1301_v23 = vand.u32 2147483647, %v1300_v45  ;;  %v1111_v33 = vsel %vm1109_vm6, %v4214_v55, %v1110_v63 }
 0x1e0   : > { %v1115_v25 = vsel %vm1108_vm7, %v1111_v33, %v1114_v43 }
 0x1e1   : > { %v1304_v60 = vmul.f32 %v1303_v53, %v1301_v23  ;;  %v1116_v18 = vsel %vm1105_vm10, nan, %v1115_v25 }
 0x1e3   : > { %v1305_v44 = vxor.u32 2147483648, %v1304_v60 }
 0x1e5   : > { %v1306_v58 = vsel %vm1223_vm4, %v1305_v44, %v1304_v60 }
 0x1e6   : > { %v1309_v6 = vsel %vm1222_vm5, %v7234_v16, %v1306_v58  ;;  %v1431_v16 = vld [vmem:[%s7162_s5 + $0x10] sm:$0xff] }
 0x1e7   : > { %4217 = vcosq.f32 %v1309_v6 }
 0x1e8   : > { %4219 = vsinq.f32 %v1309_v6 }
 0x1f1   : > { %v4218_v2 = vpop.eup %4217 }
 0x1f2   : > { %v4220_v9 = vpop.eup %4219  ;;  %v1321_v31 = vxor.u32 2147483648, %v4218_v2 }
 0x1f3   : > { %v1318_v57 = vxor.u32 2147483648, %v4220_v9 }
 0x1f4   : > { %v1322_v10 = vsel %vm1320_vm8, %v1321_v31, %v4220_v9 }
 0x1f5   : > { %v1319_v12 = vsel %vm1317_vm1, %v4218_v2, %v1318_v57 }
 0x1f6   : > { %v1323_v28 = vsel %vm1316_vm9, %v1319_v12, %v1322_v10 }
 0x1f7   : > { %v1324_v14 = vsel %vm1313_vm11, nan, %v1323_v28 }
 0x1f8   : > { %v4047_v39 = vpack.c.bf16 %v1324_v14, %v1116_v18 }
 0x1fa   : > { %4048 = vmatpush1.bf16.msra.mxu1 %v4047_v39 }
 0x1fd   : > { %3905 = vmatmul.mubr.msk.f32.vlgmr.msra.gmra.mrb[0].mxu1 %vm1457_vm12, %v1429_v49 }
 0x1fe   : > { %1540 = vmatprep.mubr.f32.mxu1 %v7242_v24 }
 0x201   : > { %3906 = vmatmul.mubr.msk.f32.gmra.mrb[2].mxu1 %vm1457_vm12, %v1430_v1 }
 0x202   : > { %1546 = vmatprep.mubr.f32.mxu1 %v7242_v24 }
 0x205   : > { %3907 = vmatmul.mubr.msk.f32.gmra.mrb[4].mxu1 %vm1457_vm12, %v1431_v16 }
 0x206   : > { %1552 = vmatprep.mubr.f32.mxu1 %v7242_v24 }
 0x209   : > { %3908 = vmatmul.mubr.msk.f32.gmra.mrb[6].mxu1 %vm1457_vm12, %v1432_v51 }
 0x20a   : > { %2563 = vmatprep.mubr.f32.mxu1 %v7242_v24 }
 0x2d0   : > { %v1536_v59 = vpop.f32.mrb[0].mxu1 }
 0x2d1   : > { %v1537_v13 = vadd.f32 %v1536_v59, %v1440_v62  ;;  %v1538_v0 = vpop.f32.mrb[1].mxu1 }
 0x2d2   : > { %v1539_v42 = vadd.f32 %v1538_v0, %v1440_v62 }
 0x2d3   : > { %v1584_v8 = vmul.f32 %v1567_v47, %v1537_v13 }
 0x2d4   : > { %v1542_v56 = vpop.f32.mrb[2].mxu1  ;;  %v1585_v6 = vmul.f32 %v1567_v47, %v1539_v42 }
 0x2d5   : > { %v5369_v40 = vadd.f32 %v1600_v5, %v1584_v8  ;;  %v1543_v30 = vadd.f32 %v1542_v56, %v1445_v4  ;;  %v1544_v35 = vpop.f32.mrb[3].mxu1 }
 0x2d6   : > { %v5388_v54 = vadd.f32 %v1600_v5, %v1585_v6  ;;  %v1545_v63 = vadd.f32 %v1544_v35, %v1445_v4 }
 0x2d7   : > { %v1628_v36 = vand.u32 2139095040, %v5369_v40  ;;  %v1586_v48 = vmul.f32 %v5363_v26, %v1543_v30  ;;  %v7189_v53 = vand.u32 2147483647, %v5369_v40 }
 0x2d8   : > { %v1548_v41 = vpop.f32.mrb[4].mxu1 }
 0x2d9   : > { %v1629_v45 = vshrl.u32 %v1628_v36, 23  ;;  %v5376_v61 = vadd.f32 %v5373_v52, %v1586_v48  ;;  %v5378_v23 = vpop.f32.mrb[5].mxu1  ;;  %v1632_v3 = vand.u32 8388607, %v7189_v53 }
 0x2db   : > { %v3917_v60 = vadd.s32 4294967169, %v1629_v45  ;;  %v1836_v21 = vand.u32 2139095040, %v5376_v61  ;;  %v1633_v37 = vor.u32 8388608, %v1632_v3  ;;  %v7188_v49 = vand.u32 2147483647, %v5376_v61 }
 0x2dc   : > { %v5382_v44 = vpop.f32.mrb[6].mxu1  ;;  %v1549_v3 = vadd.f32 %v1548_v41, %v5365_v22 }
 0x2dd   : > { %v1635_v27 = vadd.s32 1, %v3917_v60  ;;  %v5384_v58 = vpop.f32.mrb[7].mxu1  ;;  %v1837_v38 = vshrl.u32 %v1836_v21, 23  ;;  %v1673_v56 = vshll.u32 %v1633_v37, 8 }
 0x2df   : > { %vm1636_vm13 = vcmp.gt.s32.totalorder %v1635_v27, 0  ;;  %v3925_v33 = vadd.s32 4294967169, %v1837_v38 }
 0x2e0   : > { %v1637_v15 = vsel %vm1636_vm13, %v1635_v27, 0  ;;  %v1840_v27 = vand.u32 8388607, %v7188_v49 }
 0x2e1   : > { %v1639_v55 = vand.u32 31, %v1637_v15  ;;  %v1638_v19 = vshrl.u32 %v1637_v15, 5  ;;  %v1843_v47 = vadd.s32 1, %v3925_v33 }
 0x2e3   : > { %v1640_v50 = vsub.s32 32, %v1639_v55  ;;  %v1642_v34 = vshll.u32 %v7224_v17, %v1639_v55  ;;  %v1645_v2 = vshll.u32 %v7225_v32, %v1639_v55  ;;  %v1648_v31 = vshll.u32 %v7222_v7, %v1639_v55 }
 0x2e4   : > { %v1651_v25 = vshll.u32 %v7226_v46, %v1639_v55  ;;  %v1654_v12 = vshll.u32 %v7193_v11, %v1639_v55  ;;  %vm1657_vm14 = vcmp.lt.s32.totalorder %v1638_v19, 1  ;;  %vm1660_vm15 = vcmp.lt.s32.totalorder %v1638_v19, 4  ;;  %v5412_v55 = vpop.permute.xlu0 %1576 }
 0x2e5   : > { %v1643_v43 = vshrl.u32 %v7225_v32, %v1640_v50  ;;  %v1646_v9 = vshrl.u32 %v7222_v7, %v1640_v50  ;;  %v1649_v57 = vshrl.u32 %v7226_v46, %v1640_v50  ;;  %v1652_v10 = vshrl.u32 %v7193_v11, %v1640_v50 }
 0x2e6   : > { %v1655_v28 = vshrl.u32 %v7223_v20, %v1640_v50  ;;  %v1641_v59 = vshrl.u32 %v7224_v17, %v1640_v50  ;;  %vm1659_vm0 = vcmp.lt.s32.totalorder %v1638_v19, 3  ;;  %vm1658_vm3 = vcmp.lt.s32.totalorder %v1638_v19, 2 }
 0x2e7   : > { %v1644_v18 = vor.u32 %v1643_v43, %v1642_v34  ;;  %v1647_v14 = vor.u32 %v1646_v9, %v1645_v2  ;;  %v1650_v39 = vor.u32 %v1649_v57, %v1648_v31  ;;  %v1653_v1 = vor.u32 %v1652_v10, %v1651_v25 }
 0x2e8   : > { %v1656_v16 = vor.u32 %v1655_v28, %v1654_v12  ;;  %vm1844_vm4 = vcmp.gt.s32.totalorder %v1843_v47, 0  ;;  %v1732_v50 = vand.u32 2139095040, %v5388_v54  ;;  %v1587_v19 = vmul.f32 %v5363_v26, %v1545_v63 }
 0x2e9   : > { %v1662_v51 = vsel %vm1660_vm15, %v1650_v39, 2102212464  ;;  %v1665_v62 = vsel %vm1657_vm14, %v1644_v18, %v1647_v14  ;;  %v1669_v4 = vsel %vm1657_vm14, %v1647_v14, %v1650_v39  ;;  %v1666_v13 = vsel %vm1660_vm15, %v1653_v1, 920167782 }
 0x2ea   : > { %v1670_v0 = vsel %vm1660_vm15, %v1656_v16, 1326507024  ;;  %v1667_v8 = vsel %vm1659_vm0, %v1650_v39, %v1666_v13  ;;  %v1661_v30 = vsel %vm1657_vm14, %v1641_v59, %v1644_v18  ;;  %v1663_v35 = vsel %vm1659_vm0, %v1647_v14, %v1662_v51 }
 0x2eb   : > { %v1671_v5 = vsel %vm1659_vm0, %v1653_v1, %v1670_v0  ;;  %v1668_v36 = vsel %vm1658_vm3, %v1665_v62, %v1667_v8  ;;  %v1664_v6 = vsel %vm1658_vm3, %v1661_v30, %v1663_v35  ;;  %v1845_v15 = vsel %vm1844_vm4, %v1843_v47, 0  ;;  %v5434_v30 = vpop.permute.xlu0 %1609 }
 0x2ec   : > { %v1672_v48 = vsel %vm1658_vm3, %v1669_v4, %v1671_v5  ;;  %v5405_v42 = vmul.u32.u64.low %v1673_v56, %v1668_v36  ;;  %v5406_v21 = vmul.u32.u64.high %v1673_v56, %v1668_v36, %v5405_v42  ;;  %v1847_v38 = vand.u32 31, %v1845_v15 }
 0x2ed   : > { %v5402_v45 = vmul.u32.u64.low %v1673_v56, %v1672_v48  ;;  %v5403_v60 = vmul.u32.u64.high %v1673_v56, %v1672_v48, %v5402_v45  ;;  %v1680_v34 = vmul.u32 %v1673_v56, %v1664_v6  ;;  %v1841_v2 = vor.u32 8388608, %v1840_v27 }
 0x2ee   : > { %v1683_v37 = vadd.s32 1, %v5406_v21  ;;  %v1848_v33 = vsub.s32 32, %v1847_v38  ;;  %v1588_v43 = vmul.f32 %v5412_v55, %v1549_v3  ;;  %v1846_v9 = vshrl.u32 %v1845_v15, 5 }
 0x2ef   : > { %vm1682_vm5 = vc.u32 %v5403_v60, %v5405_v42  ;;  %v1850_v31 = vshll.u32 %v7224_v17, %v1847_v38  ;;  %v1853_v57 = vshll.u32 %v7225_v32, %v1847_v38  ;;  %v1856_v12 = vshll.u32 %v7222_v7, %v1847_v38 }
 0x2f0   : > { %v1684_v41 = vsel %vm1682_vm5, %v1683_v37, %v5406_v21  ;;  %v1851_v25 = vshrl.u32 %v7225_v32, %v1848_v33  ;;  %v1854_v10 = vshrl.u32 %v7222_v7, %v1848_v33  ;;  %v1859_v26 = vshll.u32 %v7226_v46, %v1847_v38 }
 0x2f1   : > { %v1857_v63 = vshrl.u32 %v7226_v46, %v1848_v33  ;;  %v1860_v28 = vshrl.u32 %v7193_v11, %v1848_v33  ;;  %v1862_v18 = vshll.u32 %v7193_v11, %v1847_v38  ;;  %v1863_v14 = vshrl.u32 %v7223_v20, %v1848_v33 }
 0x2f2   : > { %v1685_v39 = vadd.s32 %v1684_v41, %v1680_v34  ;;  %v1852_v1 = vor.u32 %v1851_v25, %v1850_v31  ;;  %v1855_v16 = vor.u32 %v1854_v10, %v1853_v57  ;;  %v1881_v51 = vshll.u32 %v1841_v2, 8 }
 0x2f3   : > { %v1858_v62 = vor.u32 %v1857_v63, %v1856_v12  ;;  %v1861_v4 = vor.u32 %v1860_v28, %v1859_v26  ;;  %v1864_v47 = vor.u32 %v1863_v14, %v1862_v18  ;;  %vm1865_vm6 = vcmp.lt.s32.totalorder %v1846_v9, 1 }
 0x2f4   : > { %v1849_v59 = vshrl.u32 %v7224_v17, %v1848_v33  ;;  %vm1867_vm2 = vcmp.lt.s32.totalorder %v1846_v9, 3  ;;  %vm1868_vm7 = vcmp.lt.s32.totalorder %v1846_v9, 4  ;;  %v1873_v13 = vsel %vm1865_vm6, %v1852_v1, %v1855_v16 }
 0x2f5   : > { %v1870_v0 = vsel %vm1868_vm7, %v1858_v62, 2102212464  ;;  %v1874_v8 = vsel %vm1868_vm7, %v1861_v4, 920167782  ;;  %v1877_v5 = vsel %vm1865_vm6, %v1855_v16, %v1858_v62  ;;  %v1878_v56 = vsel %vm1868_vm7, %v1864_v47, 1326507024 }
 0x2f6   : > { %v1686_v35 = vadd.s32 536870912, %v1685_v39  ;;  %vm1866_vm8 = vcmp.lt.s32.totalorder %v1846_v9, 2  ;;  %v1875_v36 = vsel %vm1867_vm2, %v1858_v62, %v1874_v8  ;;  %v1879_v48 = vsel %vm1867_vm2, %v1861_v4, %v1878_v56 }
 0x2f7   : > { %v1733_v45 = vshrl.u32 %v1732_v50, 23  ;;  %v1876_v21 = vsel %vm1866_vm8, %v1873_v13, %v1875_v36  ;;  %v1880_v27 = vsel %vm1866_vm8, %v1877_v5, %v1879_v48  ;;  %v5439_v3 = vadd.f32 %v5434_v30, %v1588_v43 }
 0x2f8   : > { %v1869_v6 = vsel %vm1865_vm6, %v1849_v59, %v1852_v1  ;;  %v1871_v15 = vsel %vm1867_vm2, %v1855_v16, %v1870_v0  ;;  %v5443_v38 = vmul.u32.u64.low %v1881_v51, %v1880_v27  ;;  %v5444_v37 = vmul.u32.u64.high %v1881_v51, %v1880_v27, %v5443_v38 }
 0x2f9   : > { %7243 = vst [vmem:[#allocation3_spill] sm:$0xff] %v5439_v3  ;;  %v5446_v34 = vmul.u32.u64.low %v1881_v51, %v1876_v21  ;;  %v5447_v2 = vmul.u32.u64.high %v1881_v51, %v1876_v21, %v5446_v34  ;;  %v5451_v33 = vadd.f32 %v5373_v52, %v1587_v19  ;;  %v5453_v50 = vshrl.u32 %v1686_v35, 30  ;;  %v5463_v19 = vpop.permute.xlu1 %1581 }
 0x2fa   : > { %v3921_v41 = vadd.s32 4294967169, %v1733_v45  ;;  %v1872_v31 = vsel %vm1866_vm8, %v1869_v6, %v1871_v15  ;;  %v2044_v43 = vand.u32 2139095040, %v5439_v3  ;;  %v1555_v52 = vadd.f32 %v5382_v44, %v5367_v29 }
 0x2fb   : > { %vm1890_vm1 = vc.u32 %v5444_v37, %v5446_v34  ;;  %v1891_v9 = vadd.s32 1, %v5447_v2  ;;  %v1940_v57 = vand.u32 2139095040, %v5451_v33  ;;  %v1688_v10 = vshll.u32 %v5453_v50, 30 }
 0x2fc   : > { %v2045_v25 = vshrl.u32 %v2044_v43, 23  ;;  %v1888_v12 = vmul.u32 %v1881_v51, %v1872_v31  ;;  %v1739_v26 = vadd.s32 1, %v3921_v41  ;;  %v1590_v62 = vmul.f32 %v5463_v19, %v1555_v52 }
 0x2fd   : > { %v1892_v63 = vsel %vm1890_vm1, %v1891_v9, %v5447_v2  ;;  %v1941_v14 = vshrl.u32 %v1940_v57, 23  ;;  %v5466_v16 = vsub.s32 %v1685_v39, %v1688_v10  ;;  %v1551_v51 = vadd.f32 %v5378_v23, %v5365_v22  ;;  %v5471_v44 = vpop.permute.xlu1 %1614 }
 0x2fe   : > { %v3933_v28 = vadd.s32 4294967169, %v2045_v25  ;;  %v1893_v18 = vadd.s32 %v1892_v63, %v1888_v12  ;;  %vm1740_vm9 = vcmp.gt.s32.totalorder %v1739_v26, 0  ;;  %v7187_v59 = vand.u32 2147483647, %v5439_v3 }
 0x2ff   : > { %v3929_v47 = vadd.s32 4294967169, %v1941_v14  ;;  %v1691_v0 = vsub.s32 0, %v5466_v16  ;;  %v1741_v8 = vsel %vm1740_vm9, %v1739_v26, 0  ;;  %v5476_v39 = vadd.f32 %v5471_v44, %v1590_v62 }
 0x300   : > { %v2051_v1 = vadd.s32 1, %v3933_v28  ;;  %v1894_v4 = vadd.s32 536870912, %v1893_v18  ;;  %v1589_v35 = vmul.f32 %v5412_v55, %v1551_v51  ;;  %v5481_v36 = vand.u32 31, %v1741_v8 }
 0x301   : > { %7244 = vst [vmem:[#allocation2_spill] sm:$0xff] %v5476_v39  ;;  %v1947_v22 = vadd.s32 1, %v3929_v47  ;;  %v2048_v23 = vand.u32 8388607, %v7187_v59  ;;  %v3918_v45 = vmin.u32 %v1691_v0, %v5466_v16  ;;  %v2252_v6 = vand.u32 2139095040, %v5476_v39 }
 0x302   : > { %vm2052_vm10 = vcmp.gt.s32.totalorder %v2051_v1, 0  ;;  %v5478_v56 = vshrl.u32 %v1894_v4, 30  ;;  %v5502_v62 = vsub.s32 32, %v5481_v36 }
 0x303   : > { %v2053_v13 = vsel %vm2052_vm10, %v2051_v1, 0  ;;  %v1693_v52 = vclz %v3918_v45  ;;  %vm1948_vm11 = vcmp.gt.s32.totalorder %v1947_v22, 0  ;;  %v2049_v28 = vor.u32 8388608, %v2048_v23 }
 0x304   : > { %v2055_v5 = vand.u32 31, %v2053_v13  ;;  %v5486_v21 = vshrl.u32 %v2053_v13, 5  ;;  %v1896_v41 = vshll.u32 %v5478_v56, 30  ;;  %v2253_v1 = vshrl.u32 %v2252_v6, 23 }
 0x305   : > { %v5509_v47 = vsel %vm1948_vm11, %v1947_v22, 0 }
 0x306   : > { %v2056_v48 = vsub.s32 32, %v2055_v5  ;;  %v2058_v27 = vshll.u32 %v7224_v17, %v2055_v5  ;;  %v2061_v38 = vshll.u32 %v7225_v32, %v2055_v5  ;;  %v2064_v31 = vshll.u32 %v7222_v7, %v2055_v5 }
 0x307   : > { %v2067_v43 = vshll.u32 %v7226_v46, %v2055_v5  ;;  %v2070_v10 = vshll.u32 %v7193_v11, %v2055_v5  ;;  %vm2073_vm13 = vcmp.lt.s32.totalorder %v5486_v21, 1  ;;  %v5504_v4 = vsub.s32 %v1893_v18, %v1896_v41 }
 0x308   : > { %v2059_v15 = vshrl.u32 %v7225_v32, %v2056_v48  ;;  %v2062_v55 = vshrl.u32 %v7222_v7, %v2056_v48  ;;  %v2065_v2 = vshrl.u32 %v7226_v46, %v2056_v48  ;;  %v2068_v9 = vshrl.u32 %v7193_v11, %v2056_v48 }
 0x309   : > { %v2071_v12 = vshrl.u32 %v7223_v20, %v2056_v48  ;;  %vm2076_vm14 = vcmp.lt.s32.totalorder %v5486_v21, 4  ;;  %vm2075_vm15 = vcmp.lt.s32.totalorder %v5486_v21, 3  ;;  %v3919_v5 = vadd.s32 4294967294, %v1693_v52 }
 0x30a   : > { %v2060_v57 = vor.u32 %v2059_v15, %v2058_v27  ;;  %v2063_v25 = vor.u32 %v2062_v55, %v2061_v38  ;;  %v2066_v26 = vor.u32 %v2065_v2, %v2064_v31  ;;  %v2069_v63 = vor.u32 %v2068_v9, %v2067_v43 }
 0x30b   : > { %v2072_v14 = vor.u32 %v2071_v12, %v2070_v10  ;;  %vm2074_vm0 = vcmp.lt.s32.totalorder %v5486_v21, 2  ;;  %v2089_v27 = vshll.u32 %v2049_v28, 8  ;;  %v3941_v6 = vadd.s32 4294967169, %v2253_v1 }
 0x30c   : > { %v2081_v51 = vsel %vm2073_vm13, %v2060_v57, %v2063_v25  ;;  %v2082_v13 = vsel %vm2076_vm14, %v2069_v63, 920167782  ;;  %v2085_v23 = vsel %vm2073_vm13, %v2063_v25, %v2066_v26  ;;  %v1755_v15 = vshll.u32 %v7226_v46, %v5481_v36 }
 0x30d   : > { %v2086_v0 = vsel %vm2076_vm14, %v2072_v14, 1326507024  ;;  %v2083_v18 = vsel %vm2075_vm15, %v2066_v26, %v2082_v13  ;;  %v1756_v38 = vshrl.u32 %v7193_v11, %v5502_v62  ;;  %v1759_v55 = vshrl.u32 %v7223_v20, %v5502_v62 }
 0x30e   : > { %v2084_v22 = vsel %vm2074_vm0, %v2081_v51, %v2083_v18  ;;  %v2087_v45 = vsel %vm2075_vm15, %v2069_v63, %v2086_v0  ;;  %v1899_v2 = vsub.s32 0, %v5504_v4  ;;  %v5533_v41 = vand.u32 31, %v5509_v47 }
 0x30f   : > { %v2088_v31 = vsel %vm2074_vm0, %v2085_v23, %v2087_v45  ;;  %v5537_v43 = vmul.u32.u64.low %v2089_v27, %v2084_v22  ;;  %v5538_v9 = vmul.u32.u64.high %v2089_v27, %v2084_v22, %v5537_v43  ;;  %vm3920_vm3 = vcmp.lt.s32.totalorder %v3919_v5, 0 }
 0x310   : > { %v2078_v10 = vsel %vm2076_vm14, %v2066_v26, 2102212464  ;;  %v5543_v12 = vmul.u32.u64.low %v2089_v27, %v2088_v31  ;;  %v5544_v52 = vmul.u32.u64.high %v2089_v27, %v2088_v31, %v5543_v12  ;;  %v5546_v63 = vshrl.u32 %v1741_v8, 5 }
 0x311   : > { %v2057_v28 = vshrl.u32 %v7224_v17, %v2056_v48  ;;  %v5550_v14 = vadd.f32 %v5434_v30, %v1589_v35  ;;  %v2259_v1 = vadd.s32 1, %v3941_v6  ;;  %v5552_v51 = vor.u32 %v1756_v38, %v1755_v15 }
 0x312   : > { %v1758_v13 = vshll.u32 %v7193_v11, %v5481_v36  ;;  %v3926_v0 = vmin.u32 %v1899_v2, %v5504_v4  ;;  %v5557_v18 = vsel %vm3920_vm3, 0, %v3919_v5  ;;  %v2079_v8 = vsel %vm2075_vm15, %v2063_v25, %v2078_v10 }
 0x313   : > { %v2077_v26 = vsel %vm2073_vm13, %v2057_v28, %v2060_v57  ;;  %vm2260_vm4 = vcmp.gt.s32.totalorder %v2259_v1, 0  ;;  %v5564_v30 = vsub.s32 32, %v5533_v41  ;;  %v2099_v35 = vadd.s32 1, %v5538_v9 }
 0x314   : > { %v1760_v48 = vor.u32 %v1759_v55, %v1758_v13  ;;  %vm1764_vm5 = vcmp.lt.s32.totalorder %v5546_v63, 4  ;;  %vm2098_vm6 = vc.u32 %v5544_v52, %v5537_v43  ;;  %v2148_v5 = vand.u32 2139095040, %v5550_v14 }
 0x315   : > { %v7186_v23 = vand.u32 2147483647, %v5476_v39  ;;  %v1701_v57 = vsub.s32 4294967266, %v5557_v18  ;;  %v1901_v22 = vclz %v3926_v0  ;;  %v2080_v25 = vsel %vm2074_vm0, %v2077_v26, %v2079_v8 }
 0x316   : > { %v2261_v45 = vsel %vm2260_vm4, %v2259_v1, 0  ;;  %v5578_v6 = vsel %vm1764_vm5, %v5552_v51, 920167782  ;;  %v1681_v55 = vadd.s32 %v5405_v42, %v5403_v60  ;;  %v5585_v2 = vsel %vm1764_vm5, %v1760_v48, 1326507024 }
 0x317   : > { %v2263_v15 = vand.u32 31, %v2261_v45  ;;  %v5589_v21 = vshrl.u32 %v7193_v11, %v5564_v30  ;;  %v2100_v31 = vsel %vm2098_vm6, %v2099_v35, %v5538_v9  ;;  %v2096_v10 = vmul.u32 %v2089_v27, %v2080_v25 }
 0x318   : > { %v2149_v12 = vshrl.u32 %v2148_v5, 23  ;;  %v1557_v1 = vadd.f32 %v5384_v58, %v5367_v29  ;;  %v1697_v13 = vsub.s32 32, %v5557_v18  ;;  %v1702_v0 = vadd.s32 127, %v1701_v57 }
 0x319   : > { %v2264_v28 = vsub.s32 32, %v2263_v15  ;;  %v3927_v60 = vadd.s32 4294967294, %v1901_v22  ;;  %v2256_v42 = vand.u32 8388607, %v7186_v23  ;;  %v5597_v26 = vadd.s32 %v2100_v31, %v2096_v10 }
 0x31a   : > { %v2262_v8 = vshrl.u32 %v2261_v45, 5  ;;  %v2266_v48 = vshll.u32 %v7224_v17, %v2263_v15  ;;  %v2269_v27 = vshll.u32 %v7225_v32, %v2263_v15  ;;  %v2272_v29 = vshll.u32 %v7222_v7, %v2263_v15 }
 0x31b   : > { %v2267_v9 = vshrl.u32 %v7225_v32, %v2264_v28  ;;  %v2270_v35 = vshrl.u32 %v7222_v7, %v2264_v28  ;;  %v2273_v58 = vshrl.u32 %v7226_v46, %v2264_v28  ;;  %v1698_v5 = vshll.u32 %v5466_v16, %v5557_v18 }
 0x31c   : > { %v2275_v22 = vshll.u32 %v7226_v46, %v2263_v15  ;;  %v2276_v25 = vshrl.u32 %v7193_v11, %v2264_v28  ;;  %v1699_v45 = vshrl.u32 %v1681_v55, %v1697_v13  ;;  %v3937_v31 = vadd.s32 4294967169, %v2149_v12 }
 0x31d   : > { %v2268_v57 = vor.u32 %v2267_v9, %v2266_v48  ;;  %v2271_v10 = vor.u32 %v2270_v35, %v2269_v27  ;;  %v2274_v23 = vor.u32 %v2273_v58, %v2272_v29  ;;  %v2257_v59 = vor.u32 8388608, %v2256_v42 }
 0x31e   : > { %v2277_v49 = vor.u32 %v2276_v25, %v2275_v22  ;;  %v2278_v53 = vshll.u32 %v7193_v11, %v2263_v15  ;;  %v2279_v38 = vshrl.u32 %v7223_v20, %v2264_v28  ;;  %v1703_v24 = vshll.u32 %v1702_v0, 23 }
 0x31f   : > { %vm3928_vm2 = vcmp.lt.s32.totalorder %v3927_v60, 0  ;;  %v2102_v39 = vadd.s32 536870912, %v5597_v26  ;;  %vm2281_vm7 = vcmp.lt.s32.totalorder %v2262_v8, 1  ;;  %v2265_v16 = vshrl.u32 %v7224_v17, %v2264_v28 }
 0x320   : > { %v2280_v18 = vor.u32 %v2279_v38, %v2278_v53  ;;  %vm2284_vm8 = vcmp.lt.s32.totalorder %v2262_v8, 4  ;;  %v2289_v48 = vsel %vm2281_vm7, %v2268_v57, %v2271_v10  ;;  %vm2283_vm1 = vcmp.lt.s32.totalorder %v2262_v8, 3 }
 0x321   : > { %v2286_v55 = vsel %vm2284_vm8, %v2274_v23, 2102212464  ;;  %v2290_v12 = vsel %vm2284_vm8, %v2277_v49, 920167782  ;;  %v2293_v13 = vsel %vm2281_vm7, %v2271_v10, %v2274_v23  ;;  %vm2282_vm9 = vcmp.lt.s32.totalorder %v2262_v8, 2 }
 0x322   : > { %v2291_v42 = vsel %vm2283_vm1, %v2274_v23, %v2290_v12  ;;  %v2294_v9 = vsel %vm2284_vm8, %v2280_v18, 1326507024  ;;  %v2297_v15 = vshll.u32 %v2257_v59, 8  ;;  %v2285_v27 = vsel %vm2281_vm7, %v2265_v16, %v2268_v57 }
 0x323   : > { %v2287_v35 = vsel %vm2283_vm1, %v2271_v10, %v2286_v55  ;;  %v2292_v0 = vsel %vm2282_vm9, %v2289_v48, %v2291_v42  ;;  %v2295_v29 = vsel %vm2283_vm1, %v2277_v49, %v2294_v9  ;;  %v1904_v58 = vsel %vm3928_vm2, 0, %v3927_v60 }
 0x324   : > { %v2296_v28 = vsel %vm2282_vm9, %v2293_v13, %v2295_v29  ;;  %v5616_v53 = vmul.u32.u64.low %v2297_v15, %v2292_v0  ;;  %v5617_v38 = vmul.u32.u64.high %v2297_v15, %v2292_v0, %v5616_v53  ;;  %v1700_v22 = vor.u32 %v1699_v45, %v1698_v5 }
 0x325   : > { %v1704_v25 = vor.u32 4788187, %v1703_v24  ;;  %v5620_v11 = vmul.u32.u64.low %v2297_v15, %v2296_v28  ;;  %v5621_v3 = vmul.u32.u64.high %v2297_v15, %v2296_v28, %v5620_v11  ;;  %v5624_v59 = vshrl.u32 %v5509_v47, 5 }
 0x326   : > { %v1963_v23 = vshll.u32 %v7226_v46, %v5533_v41  ;;  %v7245_v49 = vmov 920167782   ;;  %v2288_v57 = vsel %vm2282_vm9, %v2285_v27, %v2287_v35  ;;  %v1909_v10 = vsub.s32 4294967266, %v1904_v58 }
 0x327   : > { %v5630_v60 = vshll.u32 %v7245_v49, %v5533_v41  ;;  %v1967_v5 = vshrl.u32 %v7223_v20, %v5564_v30  ;;  %v5635_v24 = vshrl.u32 %v2102_v39, 30  ;;  %v1591_v11 = vmul.f32 %v5463_v19, %v1557_v1 }
 0x328   : > { %v1889_v47 = vadd.s32 %v5446_v34, %v5444_v37  ;;  %v5641_v45 = vor.u32 %v5589_v21, %v1963_v23  ;;  %v2155_v16 = vadd.s32 1, %v3937_v31  ;;  %v2307_v18 = vadd.s32 1, %v5617_v38 }
 0x329   : > { %v1705_v48 = vand.u32 2147483647, %v1704_v25  ;;  %v1707_v8 = vcvt.s32.f32 %v1700_v22  ;;  %v1905_v55 = vsub.s32 32, %v1904_v58  ;;  %v2304_v12 = vmul.u32 %v2297_v15, %v2288_v57 }
 0x32a   : > { %vm2306_vm10 = vc.u32 %v5621_v3, %v5616_v53  ;;  %v1747_v39 = vshrl.u32 %v7225_v32, %v5502_v62  ;;  %v1750_v19 = vshrl.u32 %v7222_v7, %v5502_v62  ;;  %v1753_v37 = vshrl.u32 %v7226_v46, %v5502_v62 }
 0x32b   : > { %v1910_v34 = vadd.s32 127, %v1909_v10  ;;  %v2104_v21 = vshll.u32 %v5635_v24, 30  ;;  %v2308_v1 = vsel %vm2306_vm10, %v2307_v18, %v5617_v38  ;;  %v5655_v31 = vadd.f32 %v5471_v44, %v1591_v11 }
 0x32c   : > { %v2309_v13 = vadd.s32 %v2308_v1, %v2304_v12  ;;  %v1746_v42 = vshll.u32 %v7224_v17, %v5481_v36  ;;  %v1749_v9 = vshll.u32 %v7225_v32, %v5481_v36  ;;  %v1752_v15 = vshll.u32 %v7222_v7, %v5481_v36 }
 0x32d   : > { %v1708_v27 = vmul.f32 %v1707_v8, %v1705_v48  ;;  %v1907_v35 = vshrl.u32 %v1889_v47, %v1905_v55  ;;  %vm1972_vm11 = vcmp.lt.s32.totalorder %v5624_v59, 4  ;;  %v7246_v0 = vand.u32 2147483647, %v5388_v54 }
 0x32e   : > { %v2310_v28 = vadd.s32 536870912, %v2309_v13  ;;  %v1748_v44 = vor.u32 %v1747_v39, %v1746_v42  ;;  %v1751_v38 = vor.u32 %v1750_v19, %v1749_v9  ;;  %v1754_v22 = vor.u32 %v1753_v37, %v1752_v15 }
 0x32f   : > { %v1736_v29 = vand.u32 8388607, %v7246_v0  ;;  %v1911_v25 = vshll.u32 %v1910_v34, 23  ;;  %v5667_v23 = vsub.s32 %v5597_v26, %v2104_v21  ;;  %vm2156_vm13 = vcmp.gt.s32.totalorder %v2155_v16, 0 }
 0x330   : > { %v2356_v57 = vand.u32 2139095040, %v5655_v31  ;;  %v1906_v36 = vshll.u32 %v5504_v4, %v1904_v58  ;;  %v1968_v10 = vor.u32 %v1967_v5, %v5630_v60  ;;  %v5675_v11 = vsel %vm1972_vm11, %v5641_v45, 920167782 }
 0x331   : > { %v5677_v47 = vshrl.u32 %v2310_v28, 30  ;;  %v1709_v18 = vxor.u32 2147483648, %v1708_v27  ;;  %v1737_v48 = vor.u32 8388608, %v1736_v29  ;;  %vm1761_vm14 = vcmp.lt.s32.totalorder %v5546_v63, 1 }
 0x332   : > { %vm1763_vm15 = vcmp.lt.s32.totalorder %v5546_v63, 3  ;;  %v1908_v26 = vor.u32 %v1907_v35, %v1906_v36  ;;  %v5681_v8 = vsel %vm2156_vm13, %v2155_v16, 0  ;;  %v1769_v4 = vsel %vm1761_vm14, %v1748_v44, %v1751_v38 }
 0x333   : > { %v1771_v58 = vsel %vm1763_vm15, %v1754_v22, %v5578_v6  ;;  %v1912_v60 = vor.u32 4788187, %v1911_v25  ;;  %v2107_v5 = vsub.s32 0, %v5667_v23  ;;  %v2357_v55 = vshrl.u32 %v2356_v57, 23 }
 0x334   : > { %v1773_v12 = vsel %vm1761_vm14, %v1751_v38, %v1754_v22  ;;  %v2312_v39 = vshll.u32 %v5677_v47, 30  ;;  %vm1762_vm0 = vcmp.lt.s32.totalorder %v5546_v63, 2  ;;  %v1766_v16 = vsel %vm1764_vm5, %v1754_v22, 2102212464 }
 0x335   : > { %v1775_v19 = vsel %vm1763_vm15, %v5552_v51, %v5585_v2  ;;  %v1745_v6 = vshrl.u32 %v7224_v17, %v5502_v62  ;;  %v1772_v37 = vsel %vm1762_vm0, %v1769_v4, %v1771_v58  ;;  %v1777_v21 = vshll.u32 %v1737_v48, 8 }
 0x336   : > { %v1776_v34 = vsel %vm1762_vm0, %v1773_v12, %v1775_v19  ;;  %vm1627_vm3 = vcmp.lt.s32.totalorder %v5369_v40, 0  ;;  %v1982_v1 = vsel %vm1972_vm11, %v1968_v10, 1326507024  ;;  %v5709_v42 = vand.u32 31, %v5681_v8 }
 0x337   : > { %v7197_v51 = vand.u32 2147483647, %v5451_v33  ;;  %v1765_v62 = vsel %vm1761_vm14, %v1745_v6, %v1748_v44  ;;  %v1767_v2 = vsel %vm1763_vm15, %v1751_v38, %v1766_v16  ;;  %v3934_v35 = vmin.u32 %v2107_v5, %v5667_v23 }
 0x338   : > { %v5716_v9 = vmul.u32.u64.low %v1777_v21, %v1776_v34  ;;  %v5717_v15 = vmul.u32.u64.high %v1777_v21, %v1776_v34, %v5716_v9  ;;  %v5720_v0 = vsub.s32 %v2309_v13, %v2312_v39  ;;  %v1710_v22 = vsel %vm1627_vm3, %v1709_v18, %v1708_v27 }
 0x339   : > { %v5722_v29 = vmul.u32.u64.low %v1777_v21, %v1772_v37  ;;  %v5723_v28 = vmul.u32.u64.high %v1777_v21, %v1772_v37, %v5722_v29  ;;  %v1913_v25 = vand.u32 2147483647, %v1912_v60  ;;  %v1915_v57 = vcvt.s32.f32 %v1908_v26 }
 0x33a   : > { %v3945_v44 = vadd.s32 4294967169, %v2357_v55  ;;  %v1768_v38 = vsel %vm1762_vm0, %v1765_v62, %v1767_v2  ;;  %v1944_v36 = vand.u32 8388607, %v7197_v51  ;;  %v1954_v13 = vshll.u32 %v7224_v17, %v5533_v41 }
 0x33b   : > { %v1955_v10 = vshrl.u32 %v7225_v32, %v5564_v30  ;;  %v5737_v48 = vsub.s32 32, %v5709_v42  ;;  %vm1786_vm4 = vc.u32 %v5717_v15, %v5722_v29  ;;  %v1957_v27 = vshll.u32 %v7225_v32, %v5533_v41 }
 0x33c   : > { %v1958_v63 = vshrl.u32 %v7222_v7, %v5564_v30  ;;  %v2109_v18 = vclz %v3934_v35  ;;  %v2315_v26 = vsub.s32 0, %v5720_v0  ;;  %v1787_v4 = vadd.s32 1, %v5723_v28 }
 0x33d   : > { %v1956_v58 = vor.u32 %v1955_v10, %v1954_v13  ;;  %v1784_v60 = vmul.u32 %v1777_v21, %v1768_v38  ;;  %v1960_v55 = vshll.u32 %v7222_v7, %v5533_v41  ;;  %v1961_v12 = vshrl.u32 %v7226_v46, %v5564_v30 }
 0x33e   : > { %v1959_v5 = vor.u32 %v1958_v63, %v1957_v27  ;;  %v7247_v39 = vand.u32 2147483647, %v5369_v40  ;;  %v1916_v19 = vmul.f32 %v1915_v57, %v1913_v25  ;;  %v2363_v6 = vadd.s32 1, %v3945_v44 }
 0x33f   : > { %v1788_v37 = vsel %vm1786_vm4, %v1787_v4, %v5723_v28  ;;  %v1945_v34 = vor.u32 8388608, %v1944_v36  ;;  %vm1835_vm6 = vcmp.lt.s32.totalorder %v5376_v61, 0  ;;  %v1962_v62 = vor.u32 %v1961_v12, %v1960_v55 }
 0x340   : > { %vm5753_vm5 = vcmp.le.f32.partialorder %v7247_v39, 0.7853982  ;;  %v1789_v21 = vadd.s32 %v1788_v37, %v1784_v60  ;;  %vm1969_vm2 = vcmp.lt.s32.totalorder %v5624_v59, 1  ;;  %vm1971_vm7 = vcmp.lt.s32.totalorder %v5624_v59, 3 }
 0x341   : > { %v3935_v41 = vadd.s32 4294967294, %v2109_v18  ;;  %v3942_v2 = vmin.u32 %v2315_v26, %v5720_v0  ;;  %v1977_v9 = vsel %vm1969_vm2, %v1956_v58, %v1959_v5  ;;  %v1983_v35 = vsel %vm1971_vm7, %v5641_v45, %v1982_v1 }
 0x342   : > { %v2172_v28 = vshrl.u32 %v7245_v49, %v5737_v48  ;;  %v1790_v25 = vadd.s32 536870912, %v1789_v21  ;;  %v1979_v57 = vsel %vm1971_vm7, %v1962_v62, %v5675_v11  ;;  %v1981_v44 = vsel %vm1969_vm2, %v1959_v5, %v1962_v62 }
 0x343   : > { %v2175_v38 = vshrl.u32 %v7223_v20, %v5737_v48  ;;  %vm2364_vm8 = vcmp.gt.s32.totalorder %v2363_v6, 0  ;;  %vm1970_vm1 = vcmp.lt.s32.totalorder %v5624_v59, 2  ;;  %v1974_v45 = vsel %vm1972_vm11, %v1962_v62, 2102212464 }
 0x344   : > { %v5779_v1 = vshrl.u32 %v1790_v25, 30  ;;  %v1980_v36 = vsel %vm1970_vm1, %v1977_v9, %v1979_v57  ;;  %v1984_v11 = vsel %vm1970_vm1, %v1981_v44, %v1983_v35  ;;  %v1985_v13 = vshll.u32 %v1945_v34, 8 }
 0x345   : > { %v1917_v10 = vxor.u32 2147483648, %v1916_v19  ;;  %vm3936_vm9 = vcmp.lt.s32.totalorder %v3935_v41, 0  ;;  %v2317_v27 = vclz %v3942_v2  ;;  %v1953_v63 = vshrl.u32 %v7224_v17, %v5564_v30 }
 0x346   : > { %v2365_v18 = vsel %vm2364_vm8, %v2363_v6, 0  ;;  %v1792_v26 = vshll.u32 %v5779_v1, 30  ;;  %v5788_v4 = vmul.u32.u64.low %v1985_v13, %v1984_v11  ;;  %v5789_v60 = vmul.u32.u64.high %v1985_v13, %v1984_v11, %v5788_v4 }
 0x347   : > { %v1973_v55 = vsel %vm1969_vm2, %v1953_v63, %v1956_v58  ;;  %v1975_v12 = vsel %vm1971_vm7, %v1959_v5, %v1974_v45  ;;  %v5795_v39 = vmul.u32.u64.low %v1985_v13, %v1980_v36  ;;  %v5796_v37 = vmul.u32.u64.high %v1985_v13, %v1980_v36, %v5795_v39 }
 0x348   : > { %v1713_v30 = vsel %vm5753_vm5, %v5369_v40, %v1710_v22  ;;  %v2171_v6 = vshll.u32 %v7226_v46, %v5709_v42  ;;  %v2174_v34 = vshll.u32 %v7245_v49, %v5709_v42  ;;  %v5806_v62 = vsub.s32 %v1789_v21, %v1792_v26 }
 0x349   : > { %v1918_v58 = vsel %vm1835_vm6, %v1917_v10, %v1916_v19  ;;  %v5810_v5 = vsel %vm3936_vm9, 0, %v3935_v41  ;;  %v3943_v2 = vadd.s32 4294967294, %v2317_v27  ;;  %v5812_v9 = vand.u32 31, %v2365_v18 }
 0x34a   : > { %v5815_v35 = vshrl.u32 %v5681_v8, 5  ;;  %v1795_v22 = vsub.s32 0, %v5806_v62  ;;  %v1976_v25 = vsel %vm1970_vm1, %v1973_v55, %v1975_v12  ;;  %vm1994_vm10 = vc.u32 %v5789_v60, %v5795_v39 }
 0x34b   : > { %v7250_v21 = vand.u32 2147483647, %v5376_v61  ;;  %v5828_v41 = vor.u32 %v2172_v28, %v2171_v6  ;;  %v2176_v57 = vor.u32 %v2175_v38, %v2174_v34  ;;  %v1995_v8 = vadd.s32 1, %v5796_v37 }
 0x34c   : > { %4221 = vcosq.f32 %v1713_v30  ;;  %v2117_v44 = vsub.s32 4294967266, %v5810_v5  ;;  %v3922_v45 = vmin.u32 %v1795_v22, %v5806_v62  ;;  %vm3944_vm13 = vcmp.lt.s32.totalorder %v3943_v2, 0 }
 0x34d   : > { %vm5824_vm11 = vcmp.le.f32.partialorder %v7250_v21, 0.7853982  ;;  %v5837_v36 = vsub.s32 32, %v5812_v9  ;;  %v1992_v11 = vmul.u32 %v1985_v13, %v1976_v25  ;;  %v1996_v28 = vsel %vm1994_vm10, %v1995_v8, %v5796_v37 }
 0x34e   : > { %v1921_v59 = vsel %vm5824_vm11, %v5376_v61, %v1918_v58  ;;  %4223 = vsinq.f32 %v1713_v30  ;;  %vm2180_vm14 = vcmp.lt.s32.totalorder %v5815_v35, 4  ;;  %v1797_v38 = vclz %v3922_v45 }
 0x34f   : > { %v2097_v10 = vadd.s32 %v5537_v43, %v5544_v52  ;;  %v5846_v27 = vsel %vm2180_vm14, %v5828_v41, 920167782  ;;  %v5850_v63 = vsel %vm2180_vm14, %v2176_v57, 1326507024  ;;  %v1997_v26 = vadd.s32 %v1996_v28, %v1992_v11 }
 0x350   : > { %4225 = vcosq.f32 %v1921_v59  ;;  %v2118_v13 = vadd.s32 127, %v2117_v44  ;;  %v5852_v4 = vsel %vm3944_vm13, 0, %v3943_v2  ;;  %vm1731_vm15 = vcmp.lt.s32.totalorder %v5388_v54, 0 }
 0x351   : > { %v3923_v55 = vadd.s32 4294967294, %v1797_v38  ;;  %4227 = vsinq.f32 %v1921_v59  ;;  %v2113_v43 = vsub.s32 32, %v5810_v5  ;;  %v2380_v52 = vshrl.u32 %v7245_v49, %v5837_v36 }
 0x352   : > { %v1998_v12 = vadd.s32 536870912, %v1997_v26  ;;  %v5860_v30 = vshrl.u32 %v2365_v18, 5  ;;  %v2379_v6 = vshll.u32 %v7226_v46, %v5812_v9  ;;  %v2325_v34 = vsub.s32 4294967266, %v5852_v4 }
 0x353   : > { %vm3924_vm0 = vcmp.lt.s32.totalorder %v3923_v55, 0  ;;  %v2383_v58 = vshrl.u32 %v7223_v20, %v5837_v36  ;;  %v7253_v2 = vand.u32 2147483647, %v5388_v54  ;;  %v2119_v18 = vshll.u32 %v2118_v13, 23 }
 0x354   : > { %v1800_v25 = vsel %vm3924_vm0, 0, %v3923_v55  ;;  %v5873_v21 = vshrl.u32 %v1998_v12, 30  ;;  %v1785_v57 = vadd.s32 %v5722_v29, %v5717_v15  ;;  %v5877_v44 = vor.u32 %v2380_v52, %v2379_v6 }
 0x355   : > { %vm5869_vm4 = vcmp.le.f32.partialorder %v7253_v2, 0.7853982  ;;  %v1801_v8 = vsub.s32 32, %v1800_v25  ;;  %v1805_v59 = vsub.s32 4294967266, %v1800_v25  ;;  %v2382_v45 = vshll.u32 %v7245_v49, %v5812_v9 }
 0x356   : > { %v1815_v11 = vsub.s32 4, %v5779_v1  ;;  %v2000_v28 = vshll.u32 %v5873_v21, 30  ;;  %v5883_v38 = vpop.eup %4221  ;;  %v1802_v55 = vshll.u32 %v5806_v62, %v1800_v25  ;;  %v1711_v2 = vsub.s32 4, %v5453_v50 }
 0x357   : > { %v1803_v12 = vshrl.u32 %v1785_v57, %v1801_v8  ;;  %v1806_v13 = vadd.s32 127, %v1805_v59  ;;  %v2321_v15 = vsub.s32 32, %v5852_v4  ;;  %v5888_v29 = vadd.s32 127, %v2325_v34 }
 0x358   : > { %v2384_v52 = vor.u32 %v2383_v58, %v2382_v45  ;;  %v5890_v6 = vsub.s32 %v1997_v26, %v2000_v28  ;;  %v5892_v37 = vpop.eup %4223  ;;  %v5894_v51 = vshrl.u32 %v2097_v10, %v2113_v43  ;;  %v2305_v20 = vadd.s32 %v5616_v53, %v5621_v3 }
 0x359   : > { %v1804_v49 = vor.u32 %v1803_v12, %v1802_v55  ;;  %v1807_v62 = vshll.u32 %v1806_v13, 23  ;;  %vm2388_vm2 = vcmp.lt.s32.totalorder %v5860_v30, 4  ;;  %v5902_v25 = vsel %vm1731_vm15, %v1815_v11, %v5779_v1 }
 0x35a   : > { %v2003_v34 = vsub.s32 0, %v5890_v6  ;;  %v7200_v26 = vand.u32 2147483647, %v5550_v14  ;;  %v5906_v58 = vpop.eup %4225  ;;  %v5908_v10 = vor.u32 4788187, %v2119_v18  ;;  %v1712_v43 = vsel %vm1627_vm3, %v1711_v2, %v5453_v50 }
 0x35b   : > { %v5913_v3 = vsel %vm2388_vm2, %v5877_v44, 920167782  ;;  %v1808_v53 = vor.u32 4788187, %v1807_v62  ;;  %v5918_v1 = vpop.eup %4227  ;;  %v5920_v57 = vshrl.u32 %v2305_v20, %v2321_v15  ;;  %v5925_v18 = vsel %vm2388_vm2, %v2384_v52, 1326507024 }
 0x35c   : > { %v3930_v59 = vmin.u32 %v2003_v34, %v5890_v6  ;;  %v1811_v11 = vcvt.s32.f32 %v1804_v49  ;;  %v1818_v28 = vsel %vm5869_vm4, 0, %v5902_v25  ;;  %v1919_v50 = vsub.s32 4, %v5478_v56 }
 0x35d   : > { %v1809_v45 = vand.u32 2147483647, %v1808_v53  ;;  %v1993_v20 = vadd.s32 %v5795_v39, %v5789_v60  ;;  %v1714_v12 = vsel %vm5753_vm5, 0, %v1712_v43  ;;  %v2152_v13 = vand.u32 8388607, %v7200_v26 }
 0x35e   : > { %v2005_v55 = vclz %v3930_v59  ;;  %v2162_v49 = vshll.u32 %v7224_v17, %v5709_v42  ;;  %v2163_v15 = vshrl.u32 %v7225_v32, %v5737_v48  ;;  %v2165_v52 = vshll.u32 %v7225_v32, %v5709_v42 }
 0x35f   : > { %v1812_v2 = vmul.f32 %v1811_v11, %v1809_v45  ;;  %v2166_v60 = vshrl.u32 %v7222_v7, %v5737_v48  ;;  %v2168_v16 = vshll.u32 %v7222_v7, %v5709_v42  ;;  %v2169_v39 = vshrl.u32 %v7226_v46, %v5737_v48 }
 0x360   : > { %v3931_v62 = vadd.s32 4294967294, %v2005_v55  ;;  %v1718_v34 = vadd.s32 3, %v1714_v12  ;;  %v5953_v53 = vsel %vm1835_vm6, %v1919_v50, %v5478_v56  ;;  %v2164_v43 = vor.u32 %v2163_v15, %v2162_v49 }
 0x361   : > { %v1813_v25 = vxor.u32 2147483648, %v1812_v2  ;;  %v2161_v59 = vshrl.u32 %v7224_v17, %v5737_v48  ;;  %v2167_v45 = vor.u32 %v2166_v60, %v2165_v52  ;;  %v2170_v11 = vor.u32 %v2169_v39, %v2168_v16 }
 0x362   : > { %vm3932_vm3 = vcmp.lt.s32.totalorder %v3931_v62, 0  ;;  %v2153_v26 = vor.u32 8388608, %v2152_v13  ;;  %vm2177_vm5 = vcmp.lt.s32.totalorder %v5815_v35, 1  ;;  %vm2178_vm7 = vcmp.lt.s32.totalorder %v5815_v35, 2 }
 0x363   : > { %v2008_v55 = vsel %vm3932_vm3, 0, %v3931_v62  ;;  %v1814_v42 = vsel %vm1731_vm15, %v1813_v25, %v1812_v2  ;;  %vm2179_vm6 = vcmp.lt.s32.totalorder %v5815_v35, 3  ;;  %v2182_v56 = vsel %vm2180_vm14, %v2170_v11, 2102212464 }
 0x364   : > { %v2009_v12 = vsub.s32 32, %v2008_v55  ;;  %v2013_v8 = vsub.s32 4294967266, %v2008_v55  ;;  %v2185_v48 = vsel %vm2177_vm5, %v2164_v43, %v2167_v45  ;;  %v2187_v50 = vsel %vm2179_vm6, %v2170_v11, %v5846_v27 }
 0x365   : > { %v2191_v13 = vsel %vm2179_vm6, %v5828_v41, %v5850_v63  ;;  %v2010_v49 = vshll.u32 %v5890_v6, %v2008_v55  ;;  %v2181_v2 = vsel %vm2177_vm5, %v2161_v59, %v2164_v43  ;;  %v2183_v62 = vsel %vm2179_vm6, %v2167_v45, %v2182_v56 }
 0x366   : > { %v2011_v15 = vshrl.u32 %v1993_v20, %v2009_v12  ;;  %v2014_v52 = vadd.s32 127, %v2013_v8  ;;  %v2188_v60 = vsel %vm2178_vm7, %v2185_v48, %v2187_v50  ;;  %v2189_v16 = vsel %vm2177_vm5, %v2167_v45, %v2170_v11 }
 0x367   : > { %v2193_v39 = vshll.u32 %v2153_v26, 8  ;;  %v1817_v27 = vsel %vm5869_vm4, %v5388_v54, %v1814_v42  ;;  %v2192_v6 = vsel %vm2178_vm7, %v2189_v16, %v2191_v13  ;;  %vm1939_vm8 = vcmp.lt.s32.totalorder %v5451_v33, 0 }
 0x368   : > { %v2012_v41 = vor.u32 %v2011_v15, %v2010_v49  ;;  %v2015_v63 = vshll.u32 %v2014_v52, 23  ;;  %v1822_v59 = vadd.s32 3, %v1818_v28  ;;  %v7256_v26 = vand.u32 2147483647, %v5451_v33 }
 0x369   : > { %v5982_v8 = vmul.u32.u64.low %v2193_v39, %v2192_v6  ;;  %v5983_v20 = vmul.u32.u64.high %v2193_v39, %v2192_v6, %v5982_v8  ;;  %v5985_v25 = vmul.u32.u64.low %v2193_v39, %v2188_v60  ;;  %v5986_v43 = vmul.u32.u64.high %v2193_v39, %v2188_v60, %v5985_v25 }
 0x36a   : > { %vm5991_vm1 = vcmp.le.f32.partialorder %v7256_v26, 0.7853982  ;;  %v2016_v45 = vor.u32 4788187, %v2015_v63  ;;  %v1722_v11 = vxor.u32 2147483648, %v5892_v37  ;;  %v2184_v55 = vsel %vm2178_vm7, %v2181_v2, %v2183_v62 }
 0x36b   : > { %4229 = vcosq.f32 %v1817_v27  ;;  %v5998_v42 = vand.u32 3, %v1718_v34  ;;  %v1922_v12 = vsel %vm5824_vm11, 0, %v5953_v53  ;;  %v2353_v28 = vand.u32 2147483647, %v5655_v31 }
 0x36c   : > { %4231 = vsinq.f32 %v1817_v27  ;;  %v2017_v56 = vand.u32 2147483647, %v2016_v45  ;;  %v2019_v48 = vcvt.s32.f32 %v2012_v41  ;;  %v2371_v50 = vshrl.u32 %v7225_v32, %v5837_v36 }
 0x36d   : > { %v2023_v13 = vsub.s32 4, %v5873_v21  ;;  %v2200_v49 = vmul.u32 %v2193_v39, %v2184_v55  ;;  %vm2202_vm9 = vc.u32 %v5983_v20, %v5985_v25  ;;  %v2203_v35 = vadd.s32 1, %v5986_v43 }
 0x36e   : > { %v2020_v34 = vmul.f32 %v2019_v48, %v2017_v56  ;;  %v2370_v19 = vshll.u32 %v7224_v17, %v5812_v9  ;;  %v2373_v53 = vshll.u32 %v7225_v32, %v5812_v9  ;;  %v2374_v15 = vshrl.u32 %v7222_v7, %v5837_v36 }
 0x36f   : > { %v2204_v52 = vsel %vm2202_vm9, %v2203_v35, %v5986_v43  ;;  %v2360_v2 = vand.u32 8388607, %v2353_v28  ;;  %v2376_v62 = vshll.u32 %v7222_v7, %v5812_v9  ;;  %v2377_v60 = vshrl.u32 %v7226_v46, %v5837_v36 }
 0x370   : > { %v2021_v16 = vxor.u32 2147483648, %v2020_v34  ;;  %v2205_v39 = vadd.s32 %v2204_v52, %v2200_v49  ;;  %v2372_v27 = vor.u32 %v2371_v50, %v2370_v19  ;;  %v2375_v41 = vor.u32 %v2374_v15, %v2373_v53 }
 0x371   : > { %v6023_v63 = vand.u32 3, %v1822_v59  ;;  %v1725_v6 = vxor.u32 2147483648, %v5883_v38  ;;  %v1926_v8 = vadd.s32 3, %v1922_v12  ;;  %v2378_v26 = vor.u32 %v2377_v60, %v2376_v62 }
 0x372   : > { %v2022_v43 = vsel %vm1939_vm8, %v2021_v16, %v2020_v34  ;;  %v2024_v9 = vsel %vm1939_vm8, %v2023_v13, %v5873_v21  ;;  %vm1721_vm10 = vcmp.eq.s32.totalorder %v5998_v42, 0  ;;  %vm1724_vm11 = vcmp.eq.s32.totalorder %v5998_v42, 2 }
 0x373   : > { %v1930_v45 = vxor.u32 2147483648, %v5918_v1  ;;  %v2206_v55 = vadd.s32 536870912, %v2205_v39  ;;  %v2025_v59 = vsel %vm5991_vm1, %v5451_v33, %v2022_v43  ;;  %v2361_v12 = vor.u32 8388608, %v2360_v2 }
 0x374   : > { %vm2385_vm13 = vcmp.lt.s32.totalorder %v5860_v30, 1  ;;  %vm2387_vm14 = vcmp.lt.s32.totalorder %v5860_v30, 3  ;;  %4233 = vcosq.f32 %v2025_v59  ;;  %vm1825_vm15 = vcmp.eq.s32.totalorder %v6023_v63, 0 }
 0x375   : > { %v6039_v56 = vshrl.u32 %v2206_v55, 30  ;;  %v2393_v21 = vsel %vm2385_vm13, %v2372_v27, %v2375_v41  ;;  %v2395_v48 = vsel %vm2387_vm14, %v2378_v26, %v5913_v3  ;;  %v4230_v50 = vpop.eup %4229  ;;  %v2026_v13 = vsel %vm5991_vm1, 0, %v2024_v9 }
 0x376   : > { %4235 = vsinq.f32 %v2025_v59  ;;  %v1927_v49 = vand.u32 3, %v1926_v8  ;;  %v2369_v35 = vshrl.u32 %v7224_v17, %v5837_v36  ;;  %v4232_v34 = vpop.eup %4231  ;;  %vm2386_vm0 = vcmp.lt.s32.totalorder %v5860_v30, 2 }
 0x377   : > { %v2208_v19 = vshll.u32 %v6039_v56, 30  ;;  %v2397_v53 = vsel %vm2385_vm13, %v2375_v41, %v2378_v26  ;;  %v2399_v3 = vsel %vm2387_vm14, %v5877_v44, %v5925_v18  ;;  %v2390_v22 = vsel %vm2388_vm2, %v2378_v26, 2102212464 }
 0x378   : > { %v2396_v15 = vsel %vm2386_vm0, %v2393_v21, %v2395_v48  ;;  %v2400_v36 = vsel %vm2386_vm0, %v2397_v53, %v2399_v3  ;;  %v2401_v52 = vshll.u32 %v2361_v12, 8  ;;  %vm1824_vm4 = vcmp.lt.s32.totalorder %v6023_v63, 2 }
 0x379   : > { %v1829_v2 = vxor.u32 2147483648, %v4230_v50  ;;  %v2030_v62 = vadd.s32 3, %v2026_v13  ;;  %v1933_v60 = vxor.u32 2147483648, %v5906_v58  ;;  %v6067_v16 = vsub.s32 %v2205_v39, %v2208_v19 }
 0x37a   : > { %v1826_v8 = vxor.u32 2147483648, %v4232_v34  ;;  %v2389_v44 = vsel %vm2385_vm13, %v2369_v35, %v2372_v27  ;;  %v6071_v18 = vmul.u32.u64.low %v2401_v52, %v2400_v36  ;;  %v6072_v26 = vmul.u32.u64.high %v2401_v52, %v2400_v36, %v6071_v18 }
 0x37b   : > { %vm1925_vm2 = vweird.f32 %v5376_v61  ;;  %v2211_v43 = vsub.s32 0, %v6067_v16  ;;  %v2391_v9 = vsel %vm2387_vm14, %v2375_v41, %v2390_v22  ;;  %vm1821_vm3 = vweird.f32 %v5388_v54 }
 0x37c   : > { %v6078_v55 = vmul.u32.u64.low %v2401_v52, %v2396_v15  ;;  %v6079_v59 = vmul.u32.u64.high %v2401_v52, %v2396_v15, %v6078_v55  ;;  %vm2029_vm5 = vweird.f32 %v5451_v33  ;;  %v1723_v39 = vsel %vm1721_vm10, %v5883_v38, %v1722_v11 }
 0x37d   : > { %v1726_v27 = vsel %vm1724_vm11, %v1725_v6, %v5892_v37  ;;  %vm1929_vm7 = vcmp.eq.s32.totalorder %v1927_v49, 0  ;;  %vm1932_vm6 = vcmp.eq.s32.totalorder %v1927_v49, 2  ;;  %v2031_v41 = vand.u32 3, %v2030_v62 }
 0x37e   : > { %v1931_v12 = vsel %vm1929_vm7, %v5906_v58, %v1930_v45  ;;  %v1934_v21 = vsel %vm1932_vm6, %v1933_v60, %v5918_v1  ;;  %v3938_v48 = vmin.u32 %v2211_v43, %v6067_v16  ;;  %vm1828_vm8 = vcmp.eq.s32.totalorder %v6023_v63, 2  ;;  %v4234_v11 = vpop.eup %4233 }
 0x37f   : > { %vm1720_vm1 = vcmp.lt.s32.totalorder %v5998_v42, 2  ;;  %vm1928_vm9 = vcmp.lt.s32.totalorder %v1927_v49, 2  ;;  %v2392_v38 = vsel %vm2386_vm0, %v2389_v44, %v2391_v9  ;;  %v1827_v37 = vsel %vm1825_vm15, %v4230_v50, %v1826_v8 }
 0x380   : > { %v1830_v6 = vsel %vm1828_vm8, %v1829_v2, %v4232_v34  ;;  %v2213_v13 = vclz %v3938_v48  ;;  %vm2410_vm10 = vc.u32 %v6072_v26, %v6078_v55  ;;  %v4236_v58 = vpop.eup %4235  ;;  %v2037_v1 = vxor.u32 2147483648, %v4234_v11 }
 0x381   : > { %v1727_v45 = vsel %vm1720_vm1, %v1723_v39, %v1726_v27  ;;  %v1935_v35 = vsel %vm1928_vm9, %v1931_v12, %v1934_v21  ;;  %v2411_v19 = vadd.s32 1, %v6079_v59  ;;  %v2034_v42 = vxor.u32 2147483648, %v4236_v58 }
 0x382   : > { %vm2036_vm11 = vcmp.eq.s32.totalorder %v2031_v41, 2  ;;  %v3939_v49 = vadd.s32 4294967294, %v2213_v13  ;;  %v2408_v30 = vmul.u32 %v2401_v52, %v2392_v38  ;;  %v1831_v53 = vsel %vm1824_vm4, %v1827_v37, %v1830_v6 }
 0x383   : > { %vm2033_vm13 = vcmp.eq.s32.totalorder %v2031_v41, 0  ;;  %v2038_v50 = vsel %vm2036_vm11, %v2037_v1, %v4236_v58  ;;  %v2412_v34 = vsel %vm2410_vm10, %v2411_v19, %v6079_v59  ;;  %vm2032_vm14 = vcmp.lt.s32.totalorder %v2031_v41, 2 }
 0x384   : > { %v2035_v3 = vsel %vm2033_vm13, %v4234_v11, %v2034_v42  ;;  %vm3940_vm15 = vcmp.lt.s32.totalorder %v3939_v49, 0  ;;  %v2413_v22 = vadd.s32 %v2412_v34, %v2408_v30  ;;  %vm1717_vm0 = vweird.f32 %v5369_v40 }
 0x385   : > { %v2039_v15 = vsel %vm2032_vm14, %v2035_v3, %v2038_v50  ;;  %v1936_v36 = vsel %vm1925_vm2, nan, %v1935_v35  ;;  %v2216_v2 = vsel %vm3940_vm15, 0, %v3939_v49  ;;  %v1832_v52 = vsel %vm1821_vm3, nan, %v1831_v53  ;;  %v7265_v53 = vld [vmem:[#allocation2_spill] sm:$0xff] }
 0x386   : > { %v2040_v63 = vsel %vm2029_vm5, nan, %v2039_v15  ;;  %v2217_v62 = vsub.s32 32, %v2216_v2  ;;  %v2221_v60 = vsub.s32 4294967266, %v2216_v2  ;;  %v1728_v44 = vsel %vm1717_vm0, nan, %v1727_v45 }
 0x387   : > { %v4049_v8 = vpack.c.bf16 %v2040_v63, %v1832_v52  ;;  %v2201_v18 = vadd.s32 %v5985_v25, %v5983_v20  ;;  %v2414_v43 = vadd.s32 536870912, %v2413_v22  ;;  %v7259_v40 = vshll.u32 %v5667_v23, %v5810_v5 }
 0x388   : > { %v4051_v9 = vpack.c.bf16 %v1936_v36, %v1728_v44  ;;  %v2222_v59 = vadd.s32 127, %v2221_v60  ;;  %v2322_v54 = vshll.u32 %v5720_v0, %v5852_v4  ;;  %v7260_v33 = vshll.u32 %v5888_v29, 23 }
 0x389   : > { %v2116_v61 = vor.u32 %v5894_v51, %v7259_v40  ;;  %4050 = vmatprep.subr.bf16.mxu1 %v4049_v8  ;;  %v2219_v27 = vshrl.u32 %v2201_v18, %v2217_v62  ;;  %v6124_v41 = vshrl.u32 %v2414_v43, 30  ;;  %v2121_v25 = vand.u32 2147483647, %v5908_v10 }
 0x38a   : > { %v2328_v39 = vor.u32 4788187, %v7260_v33  ;;  %4052 = vmatpush1.bf16.msra.mxu1 %v4051_v9  ;;  %v2223_v20 = vshll.u32 %v2222_v59, 23  ;;  %v2324_v23 = vor.u32 %v5920_v57, %v2322_v54  ;;  %v2218_v51 = vshll.u32 %v6067_v16, %v2216_v2  ;;  %v7261_v16 = vld [vmem:[#allocation3_spill] sm:$0xff] }
 0x38b   : > { %v2416_v5 = vshll.u32 %v6124_v41, 30  ;;  %v2123_v21 = vcvt.s32.f32 %v2116_v61  ;;  %vm2043_vm4 = vcmp.lt.s32.totalorder %v7261_v16, 0  ;;  %v7262_v49 = vand.u32 2147483647, %v7261_v16 }
 0x38c   : > { %v2224_v12 = vor.u32 4788187, %v2223_v20  ;;  %v2329_v0 = vand.u32 2147483647, %v2328_v39  ;;  %v2220_v4 = vor.u32 %v2219_v27, %v2218_v51  ;;  %v2331_v38 = vcvt.s32.f32 %v2324_v23 }
 0x38d   : > { %v2417_v29 = vsub.s32 %v2413_v22, %v2416_v5  ;;  %v2124_v48 = vmul.f32 %v2123_v21, %v2121_v25  ;;  %vm6135_vm3 = vcmp.le.f32.partialorder %v7262_v49, 0.7853982  ;;  %vm2251_vm5 = vcmp.lt.s32.totalorder %v7265_v53, 0 }
 0x38e   : > { %v2225_v11 = vand.u32 2147483647, %v2224_v12  ;;  %v2332_v6 = vmul.f32 %v2331_v38, %v2329_v0  ;;  %v2227_v13 = vcvt.s32.f32 %v2220_v4  ;;  %v2409_v3 = vadd.s32 %v6078_v55, %v6072_v26 }
 0x38f   : > { %v2419_v37 = vsub.s32 0, %v2417_v29  ;;  %v2125_v1 = vxor.u32 2147483648, %v2124_v48  ;;  %v7266_v2 = vand.u32 2147483647, %v7265_v53  ;;  %vm2147_vm6 = vcmp.lt.s32.totalorder %v5550_v14, 0 }
 0x390   : > { %v2228_v10 = vmul.f32 %v2227_v13, %v2225_v11  ;;  %v2333_v57 = vxor.u32 2147483648, %v2332_v6  ;;  %v7269_v8 = vand.u32 2147483647, %v5550_v14  ;;  %v2335_v9 = vsub.s32 4, %v5677_v47 }
 0x391   : > { %v3946_v58 = vmin.u32 %v2419_v37, %v2417_v29  ;;  %v2126_v19 = vsel %vm2043_vm4, %v2125_v1, %v2124_v48  ;;  %vm6149_vm7 = vcmp.le.f32.partialorder %v7266_v2, 0.7853982  ;;  %v2231_v59 = vsub.s32 4, %v6039_v56 }
 0x392   : > { %v2229_v42 = vxor.u32 2147483648, %v2228_v10  ;;  %v2334_v34 = vsel %vm2251_vm5, %v2333_v57, %v2332_v6  ;;  %v2129_v36 = vsel %vm6135_vm3, %v7261_v16, %v2126_v19  ;;  %vm6161_vm8 = vcmp.le.f32.partialorder %v7269_v8, 0.7853982 }
 0x393   : > { %v2421_v45 = vclz %v3946_v58  ;;  %v2337_v55 = vsel %vm6149_vm7, %v7265_v53, %v2334_v34  ;;  %4237 = vcosq.f32 %v2129_v36  ;;  %v2127_v39 = vsub.s32 4, %v5635_v24 }
 0x394   : > { %v2230_v63 = vsel %vm2147_vm6, %v2229_v42, %v2228_v10  ;;  %4239 = vcosq.f32 %v2337_v55  ;;  %v2439_v20 = vsub.s32 4, %v6124_v41  ;;  %v2336_v25 = vsel %vm2251_vm5, %v2335_v9, %v5677_v47 }
 0x395   : > { %v3947_v35 = vadd.s32 4294967294, %v2421_v45  ;;  %v2233_v40 = vsel %vm6161_vm8, %v5550_v14, %v2230_v63  ;;  %4241 = vsinq.f32 %v2337_v55  ;;  %v2232_v23 = vsel %vm2147_vm6, %v2231_v59, %v6039_v56 }
 0x396   : > { %4243 = vcosq.f32 %v2233_v40  ;;  %v2128_v5 = vsel %vm2043_vm4, %v2127_v39, %v5635_v24  ;;  %vm2355_vm1 = vcmp.lt.s32.totalorder %v5655_v31, 0  ;;  %v2338_v12 = vsel %vm6149_vm7, 0, %v2336_v25  ;;  %v2475_v25 = vpop.permute.xlu1 %2474 }
 0x397   : > { %vm3948_vm2 = vcmp.lt.s32.totalorder %v3947_v35, 0  ;;  %4245 = vsinq.f32 %v2233_v40  ;;  %v2234_v21 = vsel %vm6161_vm8, 0, %v2232_v23  ;;  %vm6188_vm9 = vcmp.le.f32.partialorder %v2353_v28, 0.7853982 }
 0x398   : > { %v2424_v50 = vsel %vm3948_vm2, 0, %v3947_v35  ;;  %4247 = vsinq.f32 %v2129_v36  ;;  %v2440_v0 = vsel %vm2355_vm1, %v2439_v20, %v6124_v41  ;;  %v2342_v38 = vadd.s32 3, %v2338_v12  ;;  %v2470_v20 = vpop.permute.xlu0 %2469 }
 0x399   : > { %v2425_v22 = vsub.s32 32, %v2424_v50  ;;  %v2429_v15 = vsub.s32 4294967266, %v2424_v50  ;;  %v2426_v62 = vshll.u32 %v2417_v29, %v2424_v50  ;;  %v2130_v29 = vsel %vm6135_vm3, 0, %v2128_v5 }
 0x39a   : > { %v2238_v37 = vadd.s32 3, %v2234_v21  ;;  %v2442_v28 = vsel %vm6188_vm9, 0, %v2440_v0  ;;  %v2134_v13 = vadd.s32 3, %v2130_v29  ;;  %v2343_v10 = vand.u32 3, %v2342_v38 }
 0x39b   : > { %v2427_v60 = vshrl.u32 %v2409_v3, %v2425_v22  ;;  %v2430_v26 = vadd.s32 127, %v2429_v15  ;;  %v2446_v1 = vadd.s32 3, %v2442_v28  ;;  %vm2341_vm8 = vweird.f32 %v7265_v53  ;;  %v3952_v53 = vld [vmem:[%s7162_s5 + $0x38] sm:$0xff] }
 0x39c   : > { %v2239_v45 = vand.u32 3, %v2238_v37  ;;  %v2135_v49 = vand.u32 3, %v2134_v13  ;;  %vm2345_vm10 = vcmp.eq.s32.totalorder %v2343_v10, 0  ;;  %vm2348_vm11 = vcmp.eq.s32.totalorder %v2343_v10, 2  ;;  %v2596_v23 = vpop.permute.xlu0 %2595 }
 0x39d   : > { %v2428_v18 = vor.u32 %v2427_v60, %v2426_v62  ;;  %v2431_v43 = vshll.u32 %v2430_v26, 23  ;;  %v4238_v4 = vpop.eup %4237  ;;  %v2447_v34 = vand.u32 3, %v2446_v1  ;;  %vm2344_vm4 = vcmp.lt.s32.totalorder %v2343_v10, 2 }
 0x39e   : > { %v4240_v48 = vpop.eup %4239  ;;  %v2141_v50 = vxor.u32 2147483648, %v4238_v4  ;;  %vm2241_vm13 = vcmp.eq.s32.totalorder %v2239_v45, 0  ;;  %vm2244_vm14 = vcmp.eq.s32.totalorder %v2239_v45, 2  ;;  %vm2137_vm15 = vcmp.eq.s32.totalorder %v2135_v49, 0 }
 0x39f   : > { %v2432_v61 = vor.u32 4788187, %v2431_v43  ;;  %v2435_v33 = vcvt.s32.f32 %v2428_v18  ;;  %v4242_v11 = vpop.eup %4241  ;;  %v2349_v35 = vxor.u32 2147483648, %v4240_v48  ;;  %vm2140_vm0 = vcmp.eq.s32.totalorder %v2135_v49, 2 }
 0x3a0   : > { %v4244_v6 = vpop.eup %4243  ;;  %v2346_v57 = vxor.u32 2147483648, %v4242_v11  ;;  %vm2240_vm2 = vcmp.lt.s32.totalorder %v2239_v45, 2  ;;  %vm2452_vm3 = vcmp.eq.s32.totalorder %v2447_v34, 2  ;;  %vm2449_vm5 = vcmp.eq.s32.totalorder %v2447_v34, 0  ;;  %v6226_v5 = vpop.permute.xlu0 %2479 }
 0x3a1   : > { %v2433_v54 = vand.u32 2147483647, %v2432_v61  ;;  %v4246_v41 = vpop.eup %4245  ;;  %v2245_v42 = vxor.u32 2147483648, %v4244_v6  ;;  %v2350_v22 = vsel %vm2348_vm11, %v2349_v35, %v4242_v11  ;;  %vm2136_vm7 = vcmp.lt.s32.totalorder %v2135_v49, 2 }
 0x3a2   : > { %v4248_v58 = vpop.eup %4247  ;;  %v2242_v19 = vxor.u32 2147483648, %v4246_v41  ;;  %v2347_v3 = vsel %vm2345_vm10, %v4240_v48, %v2346_v57  ;;  %vm2448_vm6 = vcmp.lt.s32.totalorder %v2447_v34, 2  ;;  %vm2133_vm10 = vweird.f32 %v7261_v16  ;;  %v3951_v16 = vld [vmem:[%s7162_s5 + $0x30] sm:$0xff] }
 0x3a3   : > { %v2436_v27 = vmul.f32 %v2435_v33, %v2433_v54  ;;  %v2138_v30 = vxor.u32 2147483648, %v4248_v58  ;;  %v2246_v2 = vsel %vm2244_vm14, %v2245_v42, %v4246_v41  ;;  %v2142_v60 = vsel %vm2140_vm0, %v2141_v50, %v4248_v58 }
 0x3a4   : > { %v2243_v36 = vsel %vm2241_vm13, %v4244_v6, %v2242_v19  ;;  %v2351_v55 = vsel %vm2344_vm4, %v2347_v3, %v2350_v22 }
 0x3a5   : > { %v2437_v51 = vxor.u32 2147483648, %v2436_v27  ;;  %v2139_v62 = vsel %vm2137_vm15, %v4238_v4, %v2138_v30  ;;  %v2247_v8 = vsel %vm2240_vm2, %v2243_v36, %v2246_v2  ;;  %v2352_v61 = vsel %vm2341_vm8, nan, %v2351_v55  ;;  %v2629_v4 = vpop.permute.xlu0 %2628 }
 0x3a6   : > { %v2143_v43 = vsel %vm2136_vm7, %v2139_v62, %v2142_v60 }
 0x3a7   : > { %v2438_v56 = vsel %vm2355_vm1, %v2437_v51, %v2436_v27  ;;  %vm2237_vm1 = vweird.f32 %v5550_v14  ;;  %v2144_v33 = vsel %vm2133_vm10, nan, %v2143_v43  ;;  %v3949_v27 = vld [vmem:[%s7162_s5 + $0x20] sm:$0xff]  ;;  %v7274_v14 = vmov 0.0   ;;  %v6224_v51 = vpop.permute.xlu1 %2600 }
 0x3a8   : > { %v2441_v24 = vsel %vm6188_vm9, %v5655_v31, %v2438_v56  ;;  %vm2445_vm9 = vweird.f32 %v5655_v31  ;;  %v2248_v9 = vsel %vm2237_vm1, nan, %v2247_v8  ;;  %v4055_v39 = vpack.c.bf16 %v2352_v61, %v2144_v33  ;;  %v3950_v31 = vld [vmem:[%s7162_s5 + $0x28] sm:$0xff] }
 0x3a9   : > { %4249 = vcosq.f32 %v2441_v24  ;;  %v7275_v43 = vmov 920167782  }
 0x3aa   : > { %4251 = vsinq.f32 %v2441_v24 }
 0x3ab   : > { %v6228_v56 = vpop.permute.xlu1 %2484 }
 0x3af   : > { %v6234_v28 = vpop.permute.xlu1 %2633 }
 0x3b3   : > { %v4250_v15 = vpop.eup %4249 }
 0x3b4   : > { %v4252_v52 = vpop.eup %4251  ;;  %v2453_v63 = vxor.u32 2147483648, %v4250_v15 }
 0x3b5   : > { %v2450_v26 = vxor.u32 2147483648, %v4252_v52 }
 0x3b6   : > { %v2454_v44 = vsel %vm2452_vm3, %v2453_v63, %v4252_v52 }
 0x3b7   : > { %v2451_v18 = vsel %vm2449_vm5, %v4250_v15, %v2450_v26 }
 0x3b8   : > { %v2455_v40 = vsel %vm2448_vm6, %v2451_v18, %v2454_v44 }
 0x3b9   : > { %v2456_v59 = vsel %vm2445_vm9, nan, %v2455_v40 }
 0x3ba   : > { %v4053_v54 = vpack.c.bf16 %v2456_v59, %v2248_v9  ;;  %v7276_v9 = vmov 1326507024  }
 0x3bc   : > { %4054 = vmatprep.subr.bf16.mxu1 %v4053_v54 }
 0x3bd   : > { %4056 = vmatpush1.bf16.msra.mxu1 %v4055_v39 }
 0x3c0   : > { %3957 = vmatmul.mubr.msk.f32.vlgmr.msra.gmra.mrb[8].mxu1 %vm1457_vm12, %v3949_v27 }
 0x3c1   : > { %2569 = vmatprep.mubr.f32.mxu1 %v7274_v14 }
 0x3c4   : > { %3958 = vmatmul.mubr.msk.f32.gmra.mrb[10].mxu1 %vm1457_vm12, %v3950_v31 }
 0x3c5   : > { %2575 = vmatprep.mubr.f32.mxu1 %v7274_v14 }
 0x3c8   : > { %3959 = vmatmul.mubr.msk.f32.gmra.mrb[12].mxu1 %vm1457_vm12, %v3951_v16 }
 0x3c9   : > { %2581 = vmatprep.mubr.f32.mxu1 %v7274_v14 }
 0x3cc   : > { %3960 = vmatmul.mubr.msk.f32.gmra.mrb[14].mxu1 %vm1457_vm12, %v3952_v53 }
 0x3cd   : > { %3560 = vmatprep.mubr.f32.mxu1 %v7274_v14 }
 0x493   : > { %v2565_v12 = vpop.f32.mrb[8].mxu1 }
 0x494   : > { %v2566_v21 = vadd.f32 %v2565_v12, %v2470_v20  ;;  %v2567_v47 = vpop.f32.mrb[9].mxu1 }
 0x495   : > { %v2568_v45 = vadd.f32 %v2567_v47, %v2470_v20 }
 0x496   : > { %v2613_v0 = vmul.f32 %v2596_v23, %v2566_v21 }
 0x497   : > { %v2571_v24 = vpop.f32.mrb[10].mxu1  ;;  %v2614_v30 = vmul.f32 %v2596_v23, %v2568_v45 }
 0x498   : > { %v6230_v29 = vadd.f32 %v2629_v4, %v2613_v0  ;;  %v2572_v48 = vadd.f32 %v2571_v24, %v2475_v25  ;;  %v2573_v38 = vpop.f32.mrb[11].mxu1 }
 0x499   : > { %v6249_v36 = vadd.f32 %v2629_v4, %v2614_v30  ;;  %v2574_v2 = vadd.f32 %v2573_v38, %v2475_v25 }
 0x49a   : > { %v2657_v11 = vand.u32 2139095040, %v6230_v29  ;;  %v2615_v37 = vmul.f32 %v6224_v51, %v2572_v48  ;;  %v7204_v1 = vand.u32 2147483647, %v6230_v29 }
 0x49b   : > { %v2577_v6 = vpop.f32.mrb[12].mxu1 }
 0x49c   : > { %v2658_v13 = vshrl.u32 %v2657_v11, 23  ;;  %v6237_v41 = vadd.f32 %v6234_v28, %v2615_v37  ;;  %v6239_v58 = vpop.f32.mrb[13].mxu1  ;;  %v2661_v49 = vand.u32 8388607, %v7204_v1 }
 0x49e   : > { %v3969_v10 = vadd.s32 4294967169, %v2658_v13  ;;  %v2865_v57 = vand.u32 2139095040, %v6237_v41  ;;  %v2662_v22 = vor.u32 8388608, %v2661_v49  ;;  %v7203_v27 = vand.u32 2147483647, %v6237_v41 }
 0x49f   : > { %v6243_v35 = vpop.f32.mrb[14].mxu1 }
 0x4a0   : > { %v2664_v19 = vadd.s32 1, %v3969_v10  ;;  %v6245_v42 = vpop.f32.mrb[15].mxu1  ;;  %v2866_v34 = vshrl.u32 %v2865_v57, 23  ;;  %v2702_v4 = vshll.u32 %v2662_v22, 8  ;;  %v2869_v57 = vand.u32 8388607, %v7203_v27 }
 0x4a1   : > { %v2761_v22 = vand.u32 2139095040, %v6249_v36 }
 0x4a2   : > { %vm2665_vm11 = vcmp.gt.s32.totalorder %v2664_v19, 0  ;;  %v3977_v60 = vadd.s32 4294967169, %v2866_v34  ;;  %v6273_v34 = vpop.permute.xlu0 %2605 }
 0x4a3   : > { %v2666_v50 = vsel %vm2665_vm11, %v2664_v19, 0  ;;  %v2578_v19 = vadd.f32 %v2577_v6, %v6226_v5 }
 0x4a4   : > { %v2668_v3 = vand.u32 31, %v2666_v50  ;;  %v2667_v52 = vshrl.u32 %v2666_v50, 5  ;;  %v2872_v25 = vadd.s32 1, %v3977_v60 }
 0x4a5   : > { %v2617_v60 = vmul.f32 %v6273_v34, %v2578_v19 }
 0x4a6   : > { %v2669_v15 = vsub.s32 32, %v2668_v3  ;;  %v2671_v63 = vshll.u32 %v7224_v17, %v2668_v3  ;;  %v2674_v62 = vshll.u32 %v7225_v32, %v2668_v3  ;;  %v2677_v8 = vshll.u32 %v7222_v7, %v2668_v3 }
 0x4a7   : > { %v2680_v18 = vshll.u32 %v7226_v46, %v2668_v3  ;;  %v2683_v61 = vshll.u32 %v7275_v43, %v2668_v3  ;;  %vm2686_vm13 = vcmp.lt.s32.totalorder %v2667_v52, 1  ;;  %vm2689_vm14 = vcmp.lt.s32.totalorder %v2667_v52, 4 }
 0x4a8   : > { %v2672_v26 = vshrl.u32 %v7225_v32, %v2669_v15  ;;  %v2675_v55 = vshrl.u32 %v7222_v7, %v2669_v15  ;;  %v2678_v44 = vshrl.u32 %v7226_v46, %v2669_v15  ;;  %v2681_v40 = vshrl.u32 %v7275_v43, %v2669_v15 }
 0x4a9   : > { %v2684_v59 = vshrl.u32 %v7276_v9, %v2669_v15  ;;  %v2670_v23 = vshrl.u32 %v7224_v17, %v2669_v15  ;;  %vm2688_vm15 = vcmp.lt.s32.totalorder %v2667_v52, 3  ;;  %vm2687_vm0 = vcmp.lt.s32.totalorder %v2667_v52, 2 }
 0x4aa   : > { %v2673_v54 = vor.u32 %v2672_v26, %v2671_v63  ;;  %v2676_v33 = vor.u32 %v2675_v55, %v2674_v62  ;;  %v2679_v39 = vor.u32 %v2678_v44, %v2677_v8  ;;  %v2682_v14 = vor.u32 %v2681_v40, %v2680_v18 }
 0x4ab   : > { %v2685_v31 = vor.u32 %v2684_v59, %v2683_v61  ;;  %vm2873_vm4 = vcmp.gt.s32.totalorder %v2872_v25, 0  ;;  %v2616_v15 = vmul.f32 %v6224_v51, %v2574_v2  ;;  %v2870_v63 = vor.u32 8388608, %v2869_v57 }
 0x4ac   : > { %v2691_v16 = vsel %vm2689_vm14, %v2679_v39, 2102212464  ;;  %v2694_v53 = vsel %vm2686_vm13, %v2673_v54, %v2676_v33  ;;  %v2698_v20 = vsel %vm2686_vm13, %v2676_v33, %v2679_v39  ;;  %v2695_v12 = vsel %vm2689_vm14, %v2682_v14, 920167782 }
 0x4ad   : > { %v2699_v21 = vsel %vm2689_vm14, %v2685_v31, 1326507024  ;;  %v2696_v47 = vsel %vm2688_vm15, %v2679_v39, %v2695_v12  ;;  %v2690_v24 = vsel %vm2686_vm13, %v2670_v23, %v2673_v54  ;;  %v2692_v48 = vsel %vm2688_vm15, %v2676_v33, %v2691_v16 }
 0x4ae   : > { %v2700_v0 = vsel %vm2688_vm15, %v2682_v14, %v2699_v21  ;;  %v2697_v38 = vsel %vm2687_vm0, %v2694_v53, %v2696_v47  ;;  %v2693_v49 = vsel %vm2687_vm0, %v2690_v24, %v2692_v48  ;;  %v2874_v30 = vsel %vm2873_vm4, %v2872_v25, 0 }
 0x4af   : > { %v2701_v11 = vsel %vm2687_vm0, %v2698_v20, %v2700_v0  ;;  %v6266_v10 = vmul.u32.u64.low %v2702_v4, %v2697_v38  ;;  %v6267_v45 = vmul.u32.u64.high %v2702_v4, %v2697_v38, %v6266_v10  ;;  %v2876_v50 = vand.u32 31, %v2874_v30 }
 0x4b0   : > { %v6263_v37 = vmul.u32.u64.low %v2702_v4, %v2701_v11  ;;  %v6264_v13 = vmul.u32.u64.high %v2702_v4, %v2701_v11, %v6263_v37  ;;  %v2709_v52 = vmul.u32 %v2702_v4, %v2693_v49  ;;  %v2875_v26 = vshrl.u32 %v2874_v30, 5  ;;  %v6295_v4 = vpop.permute.xlu0 %2638 }
 0x4b1   : > { %v2712_v3 = vadd.s32 1, %v6267_v45  ;;  %v2877_v62 = vsub.s32 32, %v2876_v50  ;;  %v2879_v55 = vshll.u32 %v7224_v17, %v2876_v50  ;;  %v2882_v8 = vshll.u32 %v7225_v32, %v2876_v50 }
 0x4b2   : > { %vm2711_vm2 = vc.u32 %v6264_v13, %v6266_v10  ;;  %v2885_v40 = vshll.u32 %v7222_v7, %v2876_v50  ;;  %v2888_v51 = vshll.u32 %v7226_v46, %v2876_v50  ;;  %v2891_v59 = vshll.u32 %v7275_v43, %v2876_v50 }
 0x4b3   : > { %v2713_v6 = vsel %vm2711_vm2, %v2712_v3, %v6267_v45  ;;  %v2880_v44 = vshrl.u32 %v7225_v32, %v2877_v62  ;;  %v2883_v18 = vshrl.u32 %v7222_v7, %v2877_v62  ;;  %v2886_v2 = vshrl.u32 %v7226_v46, %v2877_v62 }
 0x4b4   : > { %v2889_v61 = vshrl.u32 %v7275_v43, %v2877_v62  ;;  %v2892_v54 = vshrl.u32 %v7276_v9, %v2877_v62  ;;  %v2714_v33 = vadd.s32 %v2713_v6, %v2709_v52  ;;  %v2910_v31 = vshll.u32 %v2870_v63, 8 }
 0x4b5   : > { %v2881_v39 = vor.u32 %v2880_v44, %v2879_v55  ;;  %v2884_v14 = vor.u32 %v2883_v18, %v2882_v8  ;;  %v2887_v16 = vor.u32 %v2886_v2, %v2885_v40  ;;  %vm2894_vm3 = vcmp.lt.s32.totalorder %v2875_v26, 1 }
 0x4b6   : > { %v2890_v53 = vor.u32 %v2889_v61, %v2888_v51  ;;  %v2893_v20 = vor.u32 %v2892_v54, %v2891_v59  ;;  %v2878_v25 = vshrl.u32 %v7224_v17, %v2877_v62  ;;  %vm2896_vm5 = vcmp.lt.s32.totalorder %v2875_v26, 3 }
 0x4b7   : > { %vm2897_vm7 = vcmp.lt.s32.totalorder %v2875_v26, 4  ;;  %v2902_v23 = vsel %vm2894_vm3, %v2881_v39, %v2884_v14  ;;  %v2906_v47 = vsel %vm2894_vm3, %v2884_v14, %v2887_v16  ;;  %v2715_v24 = vadd.s32 536870912, %v2714_v33 }
 0x4b8   : > { %v2899_v12 = vsel %vm2897_vm7, %v2887_v16, 2102212464  ;;  %v2903_v21 = vsel %vm2897_vm7, %v2890_v53, 920167782  ;;  %v2907_v0 = vsel %vm2897_vm7, %v2893_v20, 1326507024  ;;  %v6300_v57 = vadd.f32 %v6295_v4, %v2617_v60 }
 0x4b9   : > { %vm2895_vm6 = vcmp.lt.s32.totalorder %v2875_v26, 2  ;;  %v2904_v48 = vsel %vm2896_vm5, %v2887_v16, %v2903_v21  ;;  %v2908_v38 = vsel %vm2896_vm5, %v2890_v53, %v2907_v0  ;;  %v2762_v11 = vshrl.u32 %v2761_v22, 23 }
 0x4ba   : > { %v2905_v37 = vsel %vm2895_vm6, %v2902_v23, %v2904_v48  ;;  %v2909_v45 = vsel %vm2895_vm6, %v2906_v47, %v2908_v38  ;;  %7277 = vst [vmem:[#allocation3_spill] sm:$0xff] %v6300_v57  ;;  %v2898_v19 = vsel %vm2894_vm3, %v2878_v25, %v2881_v39  ;;  %v2900_v49 = vsel %vm2896_vm5, %v2884_v14, %v2899_v12 }
 0x4bb   : > { %v6304_v30 = vmul.u32.u64.low %v2910_v31, %v2909_v45  ;;  %v6305_v50 = vmul.u32.u64.high %v2910_v31, %v2909_v45, %v6304_v30  ;;  %v6307_v3 = vmul.u32.u64.low %v2910_v31, %v2905_v37  ;;  %v6308_v52 = vmul.u32.u64.high %v2910_v31, %v2905_v37, %v6307_v3 }
 0x4bc   : > { %v6312_v63 = vadd.f32 %v6234_v28, %v2616_v15  ;;  %v6314_v22 = vshrl.u32 %v2715_v24, 30  ;;  %v3973_v62 = vadd.s32 4294967169, %v2762_v11  ;;  %v2901_v6 = vsel %vm2895_vm6, %v2898_v19, %v2900_v49  ;;  %v6324_v15 = vpop.permute.xlu1 %2610 }
 0x4bd   : > { %v3073_v60 = vand.u32 2139095040, %v6300_v57  ;;  %vm2919_vm8 = vc.u32 %v6305_v50, %v6307_v3  ;;  %v2920_v26 = vadd.s32 1, %v6308_v52  ;;  %v2917_v18 = vmul.u32 %v2910_v31, %v2901_v6 }
 0x4be   : > { %v2969_v55 = vand.u32 2139095040, %v6312_v63  ;;  %v2717_v44 = vshll.u32 %v6314_v22, 30  ;;  %v2584_v28 = vadd.f32 %v6243_v35, %v6228_v56  ;;  %v2768_v40 = vadd.s32 1, %v3973_v62 }
 0x4bf   : > { %v3074_v8 = vshrl.u32 %v3073_v60, 23  ;;  %v2921_v51 = vsel %vm2919_vm8, %v2920_v26, %v6308_v52  ;;  %v2580_v31 = vadd.f32 %v6239_v58, %v6226_v5  ;;  %v7202_v20 = vand.u32 2147483647, %v6300_v57 }
 0x4c0   : > { %v2922_v61 = vadd.s32 %v2921_v51, %v2917_v18  ;;  %v2970_v59 = vshrl.u32 %v2969_v55, 23  ;;  %v6327_v39 = vsub.s32 %v2714_v33, %v2717_v44  ;;  %v2619_v14 = vmul.f32 %v6324_v15, %v2584_v28  ;;  %v6332_v35 = vpop.permute.xlu1 %2643 }
 0x4c1   : > { %v3985_v2 = vadd.s32 4294967169, %v3074_v8  ;;  %vm2769_vm1 = vcmp.gt.s32.totalorder %v2768_v40, 0  ;;  %v2618_v0 = vmul.f32 %v6273_v34, %v2580_v31  ;;  %v3077_v58 = vand.u32 8388607, %v7202_v20 }
 0x4c2   : > { %v2923_v16 = vadd.s32 536870912, %v2922_v61  ;;  %v3981_v53 = vadd.s32 4294967169, %v2970_v59  ;;  %v2720_v23 = vsub.s32 0, %v6327_v39  ;;  %v2770_v12 = vsel %vm2769_vm1, %v2768_v40, 0 }
 0x4c3   : > { %v3080_v54 = vadd.s32 1, %v3985_v2  ;;  %v6337_v33 = vadd.f32 %v6332_v35, %v2619_v14  ;;  %v6342_v24 = vand.u32 31, %v2770_v12  ;;  %v3078_v51 = vor.u32 8388608, %v3077_v58 }
 0x4c4   : > { %v6339_v47 = vshrl.u32 %v2923_v16, 30  ;;  %v2976_v5 = vadd.s32 1, %v3981_v53  ;;  %v3970_v38 = vmin.u32 %v2720_v23, %v6327_v39 }
 0x4c5   : > { %vm3081_vm9 = vcmp.gt.s32.totalorder %v3080_v54, 0  ;;  %7278 = vst [vmem:[#allocation2_spill] sm:$0xff] %v6337_v33  ;;  %v3281_v45 = vand.u32 2139095040, %v6337_v33 }
 0x4c6   : > { %v3082_v25 = vsel %vm3081_vm9, %v3080_v54, 0  ;;  %7279 = vst [vmem:[#allocation4_spill] sm:$0xff] %v6339_v47  ;;  %v2925_v52 = vshll.u32 %v6339_v47, 30  ;;  %v2722_v18 = vclz %v3970_v38  ;;  %vm2977_vm10 = vcmp.gt.s32.totalorder %v2976_v5, 0 }
 0x4c7   : > { %v3084_v21 = vand.u32 31, %v3082_v25  ;;  %v6347_v11 = vshrl.u32 %v3082_v25, 5  ;;  %v3282_v59 = vshrl.u32 %v3281_v45, 23  ;;  %v6363_v54 = vsub.s32 32, %v6342_v24 }
 0x4c8   : > { %v6365_v14 = vsub.s32 %v2922_v61, %v2925_v52  ;;  %v6370_v31 = vsel %vm2977_vm10, %v2976_v5, 0  ;;  %v3971_v23 = vadd.s32 4294967294, %v2722_v18  ;;  %v3118_v38 = vshll.u32 %v3078_v51, 8 }
 0x4c9   : > { %v3085_v48 = vsub.s32 32, %v3084_v21  ;;  %v3087_v37 = vshll.u32 %v7224_v17, %v3084_v21  ;;  %v3090_v49 = vshll.u32 %v7225_v32, %v3084_v21  ;;  %v3093_v62 = vshll.u32 %v7222_v7, %v3084_v21 }
 0x4ca   : > { %v3096_v6 = vshll.u32 %v7226_v46, %v3084_v21  ;;  %v3099_v8 = vshll.u32 %v7275_v43, %v3084_v21  ;;  %vm3102_vm11 = vcmp.lt.s32.totalorder %v6347_v11, 1  ;;  %vm3105_vm13 = vcmp.lt.s32.totalorder %v6347_v11, 4 }
 0x4cb   : > { %v3088_v19 = vshrl.u32 %v7225_v32, %v3085_v48  ;;  %v3091_v34 = vshrl.u32 %v7222_v7, %v3085_v48  ;;  %v3094_v30 = vshrl.u32 %v7226_v46, %v3085_v48  ;;  %v3097_v60 = vshrl.u32 %v7275_v43, %v3085_v48 }
 0x4cc   : > { %v3100_v44 = vshrl.u32 %v7276_v9, %v3085_v48  ;;  %vm3104_vm14 = vcmp.lt.s32.totalorder %v6347_v11, 3  ;;  %vm3103_vm15 = vcmp.lt.s32.totalorder %v6347_v11, 2  ;;  %v2784_v45 = vshll.u32 %v7226_v46, %v6342_v24 }
 0x4cd   : > { %v3089_v26 = vor.u32 %v3088_v19, %v3087_v37  ;;  %v3092_v55 = vor.u32 %v3091_v34, %v3090_v49  ;;  %v3095_v28 = vor.u32 %v3094_v30, %v3093_v62  ;;  %v3098_v40 = vor.u32 %v3097_v60, %v3096_v6 }
 0x4ce   : > { %v3101_v2 = vor.u32 %v3100_v44, %v3099_v8  ;;  %v3993_v37 = vadd.s32 4294967169, %v3282_v59  ;;  %v2785_v19 = vshrl.u32 %v7275_v43, %v6363_v54  ;;  %v2788_v49 = vshrl.u32 %v7276_v9, %v6363_v54 }
 0x4cf   : > { %v3110_v16 = vsel %vm3102_vm11, %v3089_v26, %v3092_v55  ;;  %v3111_v53 = vsel %vm3105_vm13, %v3098_v40, 920167782  ;;  %v3114_v21 = vsel %vm3102_vm11, %v3092_v55, %v3095_v28  ;;  %v2928_v34 = vsub.s32 0, %v6365_v14 }
 0x4d0   : > { %v3115_v25 = vsel %vm3105_vm13, %v3101_v2, 1326507024  ;;  %v3112_v61 = vsel %vm3104_vm14, %v3095_v28, %v3111_v53  ;;  %v6394_v30 = vand.u32 31, %v6370_v31  ;;  %vm3972_vm0 = vcmp.lt.s32.totalorder %v3971_v23, 0 }
 0x4d1   : > { %v3113_v5 = vsel %vm3103_vm15, %v3110_v16, %v3112_v61  ;;  %v3116_v58 = vsel %vm3104_vm14, %v3098_v40, %v3115_v25  ;;  %v3107_v60 = vsel %vm3105_vm13, %v3095_v28, 2102212464  ;;  %v6407_v18 = vshrl.u32 %v2770_v12, 5 }
 0x4d2   : > { %v3117_v52 = vsel %vm3103_vm15, %v3114_v21, %v3116_v58  ;;  %v6398_v62 = vmul.u32.u64.low %v3118_v38, %v3113_v5  ;;  %v6399_v6 = vmul.u32.u64.high %v3118_v38, %v3113_v5, %v6398_v62  ;;  %v3086_v40 = vshrl.u32 %v7224_v17, %v3085_v48 }
 0x4d3   : > { %v6404_v8 = vmul.u32.u64.low %v3118_v38, %v3117_v52  ;;  %v6405_v44 = vmul.u32.u64.high %v3118_v38, %v3117_v52, %v6404_v8  ;;  %v6411_v51 = vadd.f32 %v6295_v4, %v2618_v0  ;;  %v3288_v2 = vadd.s32 1, %v3993_v37 }
 0x4d4   : > { %v6413_v59 = vor.u32 %v2785_v19, %v2784_v45  ;;  %v2787_v16 = vshll.u32 %v7275_v43, %v6342_v24  ;;  %v3978_v53 = vmin.u32 %v2928_v34, %v6365_v14  ;;  %v6418_v25 = vsel %vm3972_vm0, 0, %v3971_v23 }
 0x4d5   : > { %v3106_v28 = vsel %vm3102_vm11, %v3086_v40, %v3089_v26  ;;  %v3108_v12 = vsel %vm3104_vm14, %v3092_v55, %v3107_v60  ;;  %vm3289_vm4 = vcmp.gt.s32.totalorder %v3288_v2, 0  ;;  %v6425_v4 = vsub.s32 32, %v6394_v30 }
 0x4d6   : > { %v2789_v48 = vor.u32 %v2788_v49, %v2787_v16  ;;  %v3128_v0 = vadd.s32 1, %v6399_v6  ;;  %vm2793_vm2 = vcmp.lt.s32.totalorder %v6407_v18, 4  ;;  %vm3127_vm3 = vc.u32 %v6405_v44, %v6398_v62 }
 0x4d7   : > { %v3177_v23 = vand.u32 2139095040, %v6411_v51  ;;  %v7201_v61 = vand.u32 2147483647, %v6337_v33  ;;  %v2730_v26 = vsub.s32 4294967266, %v6418_v25  ;;  %v2930_v21 = vclz %v3978_v53 }
 0x4d8   : > { %v3109_v55 = vsel %vm3103_vm15, %v3106_v28, %v3108_v12  ;;  %v3290_v5 = vsel %vm3289_vm4, %v3288_v2, 0  ;;  %v6439_v58 = vsel %vm2793_vm2, %v6413_v59, 920167782  ;;  %v2710_v19 = vadd.s32 %v6266_v10, %v6264_v13 }
 0x4d9   : > { %v3292_v37 = vand.u32 31, %v3290_v5  ;;  %v6446_v49 = vsel %vm2793_vm2, %v2789_v48, 1326507024  ;;  %v6450_v11 = vshrl.u32 %v7275_v43, %v6425_v4  ;;  %v3129_v34 = vsel %vm3127_vm3, %v3128_v0, %v6399_v6 }
 0x4da   : > { %v3125_v52 = vmul.u32 %v3118_v38, %v3109_v55  ;;  %v3178_v60 = vshrl.u32 %v3177_v23, 23  ;;  %v2586_v40 = vadd.f32 %v6245_v42, %v6228_v56  ;;  %v2726_v2 = vsub.s32 32, %v6418_v25 }
 0x4db   : > { %v3293_v8 = vsub.s32 32, %v3292_v37  ;;  %v2731_v16 = vadd.s32 127, %v2730_v26  ;;  %v3979_v13 = vadd.s32 4294967294, %v2930_v21  ;;  %v3285_v10 = vand.u32 8388607, %v7201_v61 }
 0x4dc   : > { %v6458_v53 = vadd.s32 %v3129_v34, %v3125_v52  ;;  %v3291_v28 = vshrl.u32 %v3290_v5, 5  ;;  %v3295_v12 = vshll.u32 %v7224_v17, %v3292_v37  ;;  %v3298_v38 = vshll.u32 %v7225_v32, %v3292_v37 }
 0x4dd   : > { %v3296_v6 = vshrl.u32 %v7225_v32, %v3293_v8  ;;  %v3299_v48 = vshrl.u32 %v7222_v7, %v3293_v8  ;;  %v3301_v56 = vshll.u32 %v7222_v7, %v3292_v37  ;;  %v3302_v42 = vshrl.u32 %v7226_v46, %v3293_v8 }
 0x4de   : > { %v2727_v0 = vshll.u32 %v6327_v39, %v6418_v25  ;;  %v3304_v26 = vshll.u32 %v7226_v46, %v3292_v37  ;;  %v3305_v21 = vshrl.u32 %v7275_v43, %v3293_v8  ;;  %v2728_v55 = vshrl.u32 %v2710_v19, %v2726_v2 }
 0x4df   : > { %v3297_v23 = vor.u32 %v3296_v6, %v3295_v12  ;;  %v3989_v5 = vadd.s32 4294967169, %v3178_v60  ;;  %v3300_v34 = vor.u32 %v3299_v48, %v3298_v38  ;;  %v3303_v52 = vor.u32 %v3302_v42, %v3301_v56 }
 0x4e0   : > { %v3286_v61 = vor.u32 8388608, %v3285_v10  ;;  %v3306_v20 = vor.u32 %v3305_v21, %v3304_v26  ;;  %v3307_v27 = vshll.u32 %v7275_v43, %v3292_v37  ;;  %v3308_v1 = vshrl.u32 %v7276_v9, %v3293_v8 }
 0x4e1   : > { %v2732_v45 = vshll.u32 %v2731_v16, 23  ;;  %vm3980_vm5 = vcmp.lt.s32.totalorder %v3979_v13, 0  ;;  %v3131_v33 = vadd.s32 536870912, %v6458_v53  ;;  %vm3310_vm7 = vcmp.lt.s32.totalorder %v3291_v28, 1 }
 0x4e2   : > { %v3294_v39 = vshrl.u32 %v7224_v17, %v3293_v8  ;;  %v3309_v25 = vor.u32 %v3308_v1, %v3307_v27  ;;  %vm3313_vm6 = vcmp.lt.s32.totalorder %v3291_v28, 4  ;;  %v3318_v12 = vsel %vm3310_vm7, %v3297_v23, %v3300_v34 }
 0x4e3   : > { %vm3312_vm8 = vcmp.lt.s32.totalorder %v3291_v28, 3  ;;  %v3315_v19 = vsel %vm3313_vm6, %v3303_v52, 2102212464  ;;  %v3319_v60 = vsel %vm3313_vm6, %v3306_v20, 920167782  ;;  %v3322_v2 = vsel %vm3310_vm7, %v3300_v34, %v3303_v52 }
 0x4e4   : > { %vm3311_vm1 = vcmp.lt.s32.totalorder %v3291_v28, 2  ;;  %v3320_v10 = vsel %vm3312_vm8, %v3303_v52, %v3319_v60  ;;  %v3323_v6 = vsel %vm3313_vm6, %v3309_v25, 1326507024  ;;  %v3326_v37 = vshll.u32 %v3286_v61, 8 }
 0x4e5   : > { %v3314_v38 = vsel %vm3310_vm7, %v3294_v39, %v3297_v23  ;;  %v3316_v48 = vsel %vm3312_vm8, %v3300_v34, %v3315_v19  ;;  %v3321_v16 = vsel %vm3311_vm1, %v3318_v12, %v3320_v10  ;;  %v3324_v56 = vsel %vm3312_vm8, %v3306_v20, %v3323_v6 }
 0x4e6   : > { %v2933_v42 = vsel %vm3980_vm5, 0, %v3979_v13  ;;  %v3325_v8 = vsel %vm3311_vm1, %v3322_v2, %v3324_v56  ;;  %v6477_v1 = vmul.u32.u64.low %v3326_v37, %v3321_v16  ;;  %v6478_v27 = vmul.u32.u64.high %v3326_v37, %v3321_v16, %v6477_v1 }
 0x4e7   : > { %v2729_v26 = vor.u32 %v2728_v55, %v2727_v0  ;;  %v2733_v21 = vor.u32 4788187, %v2732_v45  ;;  %v6481_v57 = vmul.u32.u64.low %v3326_v37, %v3325_v8  ;;  %v6482_v47 = vmul.u32.u64.high %v3326_v37, %v3325_v8, %v6481_v57 }
 0x4e8   : > { %v6485_v61 = vshrl.u32 %v6370_v31, 5  ;;  %v2992_v23 = vshll.u32 %v7226_v46, %v6394_v30  ;;  %v6491_v20 = vshll.u32 %v7275_v43, %v6394_v30  ;;  %v3317_v13 = vsel %vm3311_vm1, %v3314_v38, %v3316_v48 }
 0x4e9   : > { %v2938_v34 = vsub.s32 4294967266, %v2933_v42  ;;  %v2996_v0 = vshrl.u32 %v7276_v9, %v6425_v4  ;;  %v6496_v45 = vshrl.u32 %v3131_v33, 30  ;;  %v2620_v57 = vmul.f32 %v6324_v15, %v2586_v40 }
 0x4ea   : > { %v2918_v31 = vadd.s32 %v6307_v3, %v6305_v50  ;;  %v6502_v55 = vor.u32 %v6450_v11, %v2992_v23  ;;  %v3184_v52 = vadd.s32 1, %v3989_v5  ;;  %v3336_v39 = vadd.s32 1, %v6478_v27 }
 0x4eb   : > { %v2734_v25 = vand.u32 2147483647, %v2733_v21  ;;  %v2736_v28 = vcvt.s32.f32 %v2729_v26  ;;  %v2934_v12 = vsub.s32 32, %v2933_v42  ;;  %v3333_v19 = vmul.u32 %v3326_v37, %v3317_v13 }
 0x4ec   : > { %vm3335_vm9 = vc.u32 %v6482_v47, %v6477_v1  ;;  %v2776_v33 = vshrl.u32 %v7225_v32, %v6363_v54  ;;  %v2779_v15 = vshrl.u32 %v7222_v7, %v6363_v54  ;;  %v2782_v50 = vshrl.u32 %v7226_v46, %v6363_v54 }
 0x4ed   : > { %v2939_v3 = vadd.s32 127, %v2938_v34  ;;  %v3133_v11 = vshll.u32 %v6496_v45, 30  ;;  %v3337_v40 = vsel %vm3335_vm9, %v3336_v39, %v6478_v27  ;;  %v6516_v5 = vadd.f32 %v6332_v35, %v2620_v57 }
 0x4ee   : > { %v3338_v60 = vadd.s32 %v3337_v40, %v3333_v19  ;;  %v2775_v2 = vshll.u32 %v7224_v17, %v6342_v24  ;;  %v2778_v10 = vshll.u32 %v7225_v32, %v6342_v24  ;;  %v2781_v6 = vshll.u32 %v7222_v7, %v6342_v24 }
 0x4ef   : > { %v2737_v37 = vmul.f32 %v2736_v28, %v2734_v25  ;;  %v2936_v38 = vshrl.u32 %v2918_v31, %v2934_v12  ;;  %vm3001_vm10 = vcmp.lt.s32.totalorder %v6485_v61, 4  ;;  %v7280_v48 = vand.u32 2147483647, %v6249_v36 }
 0x4f0   : > { %v3339_v56 = vadd.s32 536870912, %v3338_v60  ;;  %v2777_v35 = vor.u32 %v2776_v33, %v2775_v2  ;;  %v2780_v8 = vor.u32 %v2779_v15, %v2778_v10  ;;  %v2783_v27 = vor.u32 %v2782_v50, %v2781_v6 }
 0x4f1   : > { %v2765_v16 = vand.u32 8388607, %v7280_v48  ;;  %v2940_v26 = vshll.u32 %v2939_v3, 23  ;;  %v6528_v21 = vsub.s32 %v6458_v53, %v3133_v11  ;;  %vm3185_vm11 = vcmp.gt.s32.totalorder %v3184_v52, 0 }
 0x4f2   : > { %v3385_v23 = vand.u32 2139095040, %v6516_v5  ;;  %v2935_v24 = vshll.u32 %v6365_v14, %v2933_v42  ;;  %v2997_v13 = vor.u32 %v2996_v0, %v6491_v20  ;;  %v6536_v34 = vsel %vm3001_vm10, %v6502_v55, 920167782 }
 0x4f3   : > { %v6538_v57 = vshrl.u32 %v3339_v56, 30  ;;  %v2738_v31 = vxor.u32 2147483648, %v2737_v37  ;;  %v2766_v39 = vor.u32 8388608, %v2765_v16  ;;  %vm2790_vm13 = vcmp.lt.s32.totalorder %v6407_v18, 1 }
 0x4f4   : > { %vm2792_vm14 = vcmp.lt.s32.totalorder %v6407_v18, 3  ;;  %v2937_v53 = vor.u32 %v2936_v38, %v2935_v24  ;;  %v6542_v25 = vsel %vm3185_vm11, %v3184_v52, 0  ;;  %v2798_v14 = vsel %vm2790_vm13, %v2777_v35, %v2780_v8 }
 0x4f5   : > { %v2800_v42 = vsel %vm2792_vm14, %v2783_v27, %v6439_v58  ;;  %v2941_v20 = vor.u32 4788187, %v2940_v26  ;;  %v3136_v0 = vsub.s32 0, %v6528_v21  ;;  %v3386_v28 = vshrl.u32 %v3385_v23, 23 }
 0x4f6   : > { %v2802_v12 = vsel %vm2790_vm13, %v2780_v8, %v2783_v27  ;;  %v3341_v19 = vshll.u32 %v6538_v57, 30  ;;  %vm2791_vm15 = vcmp.lt.s32.totalorder %v6407_v18, 2  ;;  %v2795_v52 = vsel %vm2793_vm2, %v2783_v27, 2102212464 }
 0x4f7   : > { %v2804_v33 = vsel %vm2792_vm14, %v6413_v59, %v6446_v49  ;;  %v2774_v58 = vshrl.u32 %v7224_v17, %v6363_v54  ;;  %v2801_v15 = vsel %vm2791_vm15, %v2798_v14, %v2800_v42  ;;  %v2806_v3 = vshll.u32 %v2766_v39, 8 }
 0x4f8   : > { %v2805_v50 = vsel %vm2791_vm15, %v2802_v12, %v2804_v33  ;;  %vm2656_vm0 = vcmp.lt.s32.totalorder %v6230_v29, 0  ;;  %v3011_v11 = vsel %vm3001_vm10, %v2997_v13, 1326507024  ;;  %v6570_v40 = vand.u32 31, %v6542_v25 }
 0x4f9   : > { %v7211_v59 = vand.u32 2147483647, %v6312_v63  ;;  %v2794_v54 = vsel %vm2790_vm13, %v2774_v58, %v2777_v35  ;;  %v2796_v49 = vsel %vm2792_vm14, %v2780_v8, %v2795_v52  ;;  %v3986_v6 = vmin.u32 %v3136_v0, %v6528_v21 }
 0x4fa   : > { %v6577_v2 = vmul.u32.u64.low %v2806_v3, %v2805_v50  ;;  %v6578_v10 = vmul.u32.u64.high %v2806_v3, %v2805_v50, %v6577_v2  ;;  %v6581_v38 = vsub.s32 %v3338_v60, %v3341_v19  ;;  %v2739_v56 = vsel %vm2656_vm0, %v2738_v31, %v2737_v37 }
 0x4fb   : > { %v6583_v48 = vmul.u32.u64.low %v2806_v3, %v2801_v15  ;;  %v6584_v16 = vmul.u32.u64.high %v2806_v3, %v2801_v15, %v6583_v48  ;;  %v2942_v27 = vand.u32 2147483647, %v2941_v20  ;;  %v2944_v26 = vcvt.s32.f32 %v2937_v53 }
 0x4fc   : > { %v3997_v35 = vadd.s32 4294967169, %v3386_v28  ;;  %v2797_v8 = vsel %vm2791_vm15, %v2794_v54, %v2796_v49  ;;  %v2973_v23 = vand.u32 8388607, %v7211_v59  ;;  %v2983_v60 = vshll.u32 %v7224_v17, %v6394_v30 }
 0x4fd   : > { %v2984_v24 = vshrl.u32 %v7225_v32, %v6425_v4  ;;  %v6598_v13 = vsub.s32 32, %v6570_v40  ;;  %vm2815_vm4 = vc.u32 %v6578_v10, %v6583_v48  ;;  %v2986_v37 = vshll.u32 %v7225_v32, %v6394_v30 }
 0x4fe   : > { %v2987_v18 = vshrl.u32 %v7222_v7, %v6425_v4  ;;  %v3138_v31 = vclz %v3986_v6  ;;  %v3344_v39 = vsub.s32 0, %v6581_v38  ;;  %v2816_v53 = vadd.s32 1, %v6584_v16 }
 0x4ff   : > { %v2985_v14 = vor.u32 %v2984_v24, %v2983_v60  ;;  %v2813_v42 = vmul.u32 %v2806_v3, %v2797_v8  ;;  %v2989_v0 = vshll.u32 %v7222_v7, %v6394_v30  ;;  %v2990_v28 = vshrl.u32 %v7226_v46, %v6425_v4 }
 0x500   : > { %v2988_v20 = vor.u32 %v2987_v18, %v2986_v37  ;;  %v7281_v12 = vand.u32 2147483647, %v6230_v29  ;;  %v2945_v52 = vmul.f32 %v2944_v26, %v2942_v27  ;;  %v3392_v33 = vadd.s32 1, %v3997_v35 }
 0x501   : > { %v2817_v58 = vsel %vm2815_vm4, %v2816_v53, %v6584_v16  ;;  %v2974_v15 = vor.u32 8388608, %v2973_v23  ;;  %vm2864_vm3 = vcmp.lt.s32.totalorder %v6237_v41, 0  ;;  %v2991_v3 = vor.u32 %v2990_v28, %v2989_v0 }
 0x502   : > { %vm6614_vm2 = vcmp.le.f32.partialorder %v7281_v12, 0.7853982  ;;  %v2818_v50 = vadd.s32 %v2817_v58, %v2813_v42  ;;  %vm2998_vm5 = vcmp.lt.s32.totalorder %v6485_v61, 1  ;;  %vm3000_vm7 = vcmp.lt.s32.totalorder %v6485_v61, 3 }
 0x503   : > { %v3987_v30 = vadd.s32 4294967294, %v3138_v31  ;;  %v3994_v54 = vmin.u32 %v3344_v39, %v6581_v38  ;;  %v3006_v49 = vsel %vm2998_vm5, %v2985_v14, %v2988_v20  ;;  %v3012_v2 = vsel %vm3000_vm7, %v6502_v55, %v3011_v11 }
 0x504   : > { %v3201_v6 = vshrl.u32 %v7275_v43, %v6598_v13  ;;  %v2819_v16 = vadd.s32 536870912, %v2818_v50  ;;  %v3008_v27 = vsel %vm3000_vm7, %v2991_v3, %v6536_v34  ;;  %v3010_v26 = vsel %vm2998_vm5, %v2988_v20, %v2991_v3 }
 0x505   : > { %v3204_v35 = vshrl.u32 %v7276_v9, %v6598_v13  ;;  %vm3393_vm6 = vcmp.gt.s32.totalorder %v3392_v33, 0  ;;  %vm2999_vm8 = vcmp.lt.s32.totalorder %v6485_v61, 2  ;;  %v3003_v55 = vsel %vm3001_vm10, %v2991_v3, 2102212464 }
 0x506   : > { %v6640_v11 = vshrl.u32 %v2819_v16, 30  ;;  %v3009_v8 = vsel %vm2999_vm8, %v3006_v49, %v3008_v27  ;;  %v3013_v34 = vsel %vm2999_vm8, %v3010_v26, %v3012_v2  ;;  %v3014_v23 = vshll.u32 %v2974_v15, 8 }
 0x507   : > { %v2946_v60 = vxor.u32 2147483648, %v2945_v52  ;;  %vm3988_vm1 = vcmp.lt.s32.totalorder %v3987_v30, 0  ;;  %v3346_v24 = vclz %v3994_v54  ;;  %v2982_v37 = vshrl.u32 %v7224_v17, %v6425_v4 }
 0x508   : > { %v3394_v18 = vsel %vm3393_vm6, %v3392_v33, 0  ;;  %v2821_v31 = vshll.u32 %v6640_v11, 30  ;;  %v6649_v39 = vmul.u32.u64.low %v3014_v23, %v3013_v34  ;;  %v6650_v53 = vmul.u32.u64.high %v3014_v23, %v3013_v34, %v6649_v39 }
 0x509   : > { %v3002_v42 = vsel %vm2998_vm5, %v2982_v37, %v2985_v14  ;;  %v3004_v0 = vsel %vm3000_vm7, %v2988_v20, %v3003_v55  ;;  %v6656_v28 = vmul.u32.u64.low %v3014_v23, %v3009_v8  ;;  %v6657_v12 = vmul.u32.u64.high %v3014_v23, %v3009_v8, %v6656_v28 }
 0x50a   : > { %v2742_v4 = vsel %vm6614_vm2, %v6230_v29, %v2739_v56  ;;  %v3200_v33 = vshll.u32 %v7226_v46, %v6570_v40  ;;  %v3203_v58 = vshll.u32 %v7275_v43, %v6570_v40  ;;  %v6667_v15 = vsub.s32 %v2818_v50, %v2821_v31 }
 0x50b   : > { %v2947_v14 = vsel %vm2864_vm3, %v2946_v60, %v2945_v52  ;;  %v6671_v20 = vsel %vm3988_vm1, 0, %v3987_v30  ;;  %v3995_v3 = vadd.s32 4294967294, %v3346_v24  ;;  %v6673_v54 = vand.u32 31, %v3394_v18 }
 0x50c   : > { %v6676_v49 = vshrl.u32 %v6542_v25, 5  ;;  %v2824_v56 = vsub.s32 0, %v6667_v15  ;;  %v3005_v2 = vsel %vm2999_vm8, %v3002_v42, %v3004_v0  ;;  %vm3023_vm9 = vc.u32 %v6650_v53, %v6656_v28 }
 0x50d   : > { %v7284_v50 = vand.u32 2147483647, %v6237_v41  ;;  %v6689_v30 = vor.u32 %v3201_v6, %v3200_v33  ;;  %v3205_v16 = vor.u32 %v3204_v35, %v3203_v58  ;;  %v3024_v25 = vadd.s32 1, %v6657_v12 }
 0x50e   : > { %4253 = vcosq.f32 %v2742_v4  ;;  %v3146_v27 = vsub.s32 4294967266, %v6671_v20  ;;  %v3974_v26 = vmin.u32 %v2824_v56, %v6667_v15  ;;  %vm3996_vm11 = vcmp.lt.s32.totalorder %v3995_v3, 0 }
 0x50f   : > { %vm6685_vm10 = vcmp.le.f32.partialorder %v7284_v50, 0.7853982  ;;  %v6698_v55 = vsub.s32 32, %v6673_v54  ;;  %v3021_v8 = vmul.u32 %v3014_v23, %v3005_v2  ;;  %v3025_v6 = vsel %vm3023_vm9, %v3024_v25, %v6657_v12 }
 0x510   : > { %v2950_v61 = vsel %vm6685_vm10, %v6237_v41, %v2947_v14  ;;  %4255 = vsinq.f32 %v2742_v4  ;;  %vm3209_vm13 = vcmp.lt.s32.totalorder %v6676_v49, 4  ;;  %v2826_v35 = vclz %v3974_v26 }
 0x511   : > { %v3126_v34 = vadd.s32 %v6398_v62, %v6405_v44  ;;  %v6707_v60 = vsel %vm3209_vm13, %v6689_v30, 920167782  ;;  %v6711_v24 = vsel %vm3209_vm13, %v3205_v16, 1326507024  ;;  %v3026_v37 = vadd.s32 %v3025_v6, %v3021_v8 }
 0x512   : > { %4257 = vcosq.f32 %v2950_v61  ;;  %v3147_v23 = vadd.s32 127, %v3146_v27  ;;  %v6713_v31 = vsel %vm3996_vm11, 0, %v3995_v3  ;;  %vm2760_vm14 = vcmp.lt.s32.totalorder %v6249_v36, 0 }
 0x513   : > { %v3975_v39 = vadd.s32 4294967294, %v2826_v35  ;;  %4259 = vsinq.f32 %v2950_v61  ;;  %v3142_v62 = vsub.s32 32, %v6671_v20  ;;  %v3409_v44 = vshrl.u32 %v7275_v43, %v6698_v55 }
 0x514   : > { %v3027_v42 = vadd.s32 536870912, %v3026_v37  ;;  %v6721_v12 = vshrl.u32 %v3394_v18, 5  ;;  %v3408_v4 = vshll.u32 %v7226_v46, %v6673_v54  ;;  %v3354_v33 = vsub.s32 4294967266, %v6713_v31 }
 0x515   : > { %vm3976_vm15 = vcmp.lt.s32.totalorder %v3975_v39, 0  ;;  %v3412_v58 = vshrl.u32 %v7276_v9, %v6698_v55  ;;  %v7287_v14 = vand.u32 2147483647, %v6249_v36  ;;  %v3148_v18 = vshll.u32 %v3147_v23, 23 }
 0x516   : > { %v2829_v56 = vsel %vm3976_vm15, 0, %v3975_v39  ;;  %v6734_v2 = vshrl.u32 %v3027_v42, 30  ;;  %v2814_v50 = vadd.s32 %v6583_v48, %v6578_v10  ;;  %v6738_v61 = vor.u32 %v3409_v44, %v3408_v4 }
 0x517   : > { %vm6730_vm4 = vcmp.le.f32.partialorder %v7287_v14, 0.7853982  ;;  %v2830_v16 = vsub.s32 32, %v2829_v56  ;;  %v2834_v25 = vsub.s32 4294967266, %v2829_v56  ;;  %v3411_v27 = vshll.u32 %v7275_v43, %v6673_v54 }
 0x518   : > { %v2844_v26 = vsub.s32 4, %v6640_v11  ;;  %v3029_v8 = vshll.u32 %v6734_v2, 30  ;;  %v6744_v6 = vpop.eup %4253  ;;  %v2831_v35 = vshll.u32 %v6667_v15, %v2829_v56  ;;  %v2740_v42 = vsub.s32 4, %v6314_v22 }
 0x519   : > { %v2832_v39 = vshrl.u32 %v2814_v50, %v2830_v16  ;;  %v2835_v23 = vadd.s32 127, %v2834_v25  ;;  %v3350_v10 = vsub.s32 32, %v6713_v31  ;;  %v6749_v48 = vadd.s32 127, %v3354_v33 }
 0x51a   : > { %v3413_v44 = vor.u32 %v3412_v58, %v3411_v27  ;;  %v6751_v4 = vsub.s32 %v3026_v37, %v3029_v8  ;;  %v6753_v14 = vpop.eup %4255  ;;  %v6755_v0 = vshrl.u32 %v3126_v34, %v3142_v62  ;;  %v3334_v59 = vadd.s32 %v6477_v1, %v6482_v47 }
 0x51b   : > { %v2833_v9 = vor.u32 %v2832_v39, %v2831_v35  ;;  %v2836_v15 = vshll.u32 %v2835_v23, 23  ;;  %vm3417_vm5 = vcmp.lt.s32.totalorder %v6721_v12, 4  ;;  %v6763_v56 = vsel %vm2760_vm14, %v2844_v26, %v6640_v11  ;;  %v7290_v35 = vld [vmem:[#allocation4_spill] sm:$0xff] }
 0x51c   : > { %v3032_v33 = vsub.s32 0, %v6751_v4  ;;  %v7213_v37 = vand.u32 2147483647, %v6411_v51  ;;  %v6767_v58 = vpop.eup %4257  ;;  %v6769_v34 = vor.u32 4788187, %v3148_v18  ;;  %v2741_v62 = vsel %vm2656_vm0, %v2740_v42, %v6314_v22 }
 0x51d   : > { %v6774_v47 = vsel %vm3417_vm5, %v6738_v61, 920167782  ;;  %v2837_v1 = vor.u32 4788187, %v2836_v15  ;;  %v6779_v11 = vpop.eup %4259  ;;  %v6781_v50 = vshrl.u32 %v3334_v59, %v3350_v10  ;;  %v6786_v18 = vsel %vm3417_vm5, %v3413_v44, 1326507024 }
 0x51e   : > { %v3982_v25 = vmin.u32 %v3032_v33, %v6751_v4  ;;  %v2840_v26 = vcvt.s32.f32 %v2833_v9  ;;  %v2847_v8 = vsel %vm6730_vm4, 0, %v6763_v56  ;;  %v2948_v22 = vsub.s32 4, %v7290_v35 }
 0x51f   : > { %v2838_v27 = vand.u32 2147483647, %v2837_v1  ;;  %v3022_v59 = vadd.s32 %v6656_v28, %v6650_v53  ;;  %v2743_v23 = vsel %vm6614_vm2, 0, %v2741_v62  ;;  %v3181_v42 = vand.u32 8388607, %v7213_v37 }
 0x520   : > { %v3034_v39 = vclz %v3982_v25  ;;  %v3191_v9 = vshll.u32 %v7224_v17, %v6570_v40  ;;  %v3192_v44 = vshrl.u32 %v7225_v32, %v6598_v13  ;;  %v3194_v15 = vshll.u32 %v7225_v32, %v6570_v40 }
 0x521   : > { %v2841_v10 = vmul.f32 %v2840_v26, %v2838_v27  ;;  %v3195_v53 = vshrl.u32 %v7222_v7, %v6598_v13  ;;  %v3197_v19 = vshll.u32 %v7222_v7, %v6570_v40  ;;  %v3198_v28 = vshrl.u32 %v7226_v46, %v6598_v13 }
 0x522   : > { %v3983_v56 = vadd.s32 4294967294, %v3034_v39  ;;  %v2747_v1 = vadd.s32 3, %v2743_v23  ;;  %v6814_v62 = vsel %vm2864_vm3, %v2948_v22, %v7290_v35  ;;  %v3193_v25 = vor.u32 %v3192_v44, %v3191_v9 }
 0x523   : > { %v2842_v33 = vxor.u32 2147483648, %v2841_v10  ;;  %v3190_v27 = vshrl.u32 %v7224_v17, %v6598_v13  ;;  %v3196_v26 = vor.u32 %v3195_v53, %v3194_v15  ;;  %v3199_v39 = vor.u32 %v3198_v28, %v3197_v19 }
 0x524   : > { %vm3984_vm0 = vcmp.lt.s32.totalorder %v3983_v56, 0  ;;  %v3182_v16 = vor.u32 8388608, %v3181_v42  ;;  %vm3206_vm2 = vcmp.lt.s32.totalorder %v6676_v49, 1  ;;  %vm3207_vm7 = vcmp.lt.s32.totalorder %v6676_v49, 2 }
 0x525   : > { %v3037_v37 = vsel %vm3984_vm0, 0, %v3983_v56  ;;  %v2843_v40 = vsel %vm2760_vm14, %v2842_v33, %v2841_v10  ;;  %vm3208_vm3 = vcmp.lt.s32.totalorder %v6676_v49, 3  ;;  %v3211_v35 = vsel %vm3209_vm13, %v3199_v39, 2102212464 }
 0x526   : > { %v3038_v23 = vsub.s32 32, %v3037_v37  ;;  %v3042_v43 = vsub.s32 4294967266, %v3037_v37  ;;  %v3214_v13 = vsel %vm3206_vm2, %v3193_v25, %v3196_v26  ;;  %v3216_v22 = vsel %vm3208_vm3, %v3199_v39, %v6707_v60 }
 0x527   : > { %v3220_v42 = vsel %vm3208_vm3, %v6689_v30, %v6711_v24  ;;  %v3039_v9 = vshll.u32 %v6751_v4, %v3037_v37  ;;  %v3210_v10 = vsel %vm3206_vm2, %v3190_v27, %v3193_v25  ;;  %v3212_v56 = vsel %vm3208_vm3, %v3196_v26, %v3211_v35 }
 0x528   : > { %v3040_v44 = vshrl.u32 %v3022_v59, %v3038_v23  ;;  %v3043_v15 = vadd.s32 127, %v3042_v43  ;;  %v3217_v53 = vsel %vm3207_vm7, %v3214_v13, %v3216_v22  ;;  %v3218_v19 = vsel %vm3206_vm2, %v3196_v26, %v3199_v39 }
 0x529   : > { %v3222_v28 = vshll.u32 %v3182_v16, 8  ;;  %v2846_v60 = vsel %vm6730_vm4, %v6249_v36, %v2843_v40  ;;  %v3221_v43 = vsel %vm3207_vm7, %v3218_v19, %v3220_v42  ;;  %vm2968_vm6 = vcmp.lt.s32.totalorder %v6312_v63, 0 }
 0x52a   : > { %v3041_v30 = vor.u32 %v3040_v44, %v3039_v9  ;;  %v3044_v24 = vshll.u32 %v3043_v15, 23  ;;  %v2851_v25 = vadd.s32 3, %v2847_v8  ;;  %v7291_v16 = vand.u32 2147483647, %v6312_v63 }
 0x52b   : > { %v6843_v4 = vmul.u32.u64.low %v3222_v28, %v3221_v43  ;;  %v6844_v37 = vmul.u32.u64.high %v3222_v28, %v3221_v43, %v6843_v4  ;;  %v6846_v59 = vmul.u32.u64.low %v3222_v28, %v3217_v53  ;;  %v6847_v33 = vmul.u32.u64.high %v3222_v28, %v3217_v53, %v6846_v59 }
 0x52c   : > { %vm6852_vm8 = vcmp.le.f32.partialorder %v7291_v16, 0.7853982  ;;  %v3045_v27 = vor.u32 4788187, %v3044_v24  ;;  %v2751_v26 = vxor.u32 2147483648, %v6753_v14  ;;  %v3213_v39 = vsel %vm3207_vm7, %v3210_v10, %v3212_v56 }
 0x52d   : > { %4261 = vcosq.f32 %v2846_v60  ;;  %v6859_v40 = vand.u32 3, %v2747_v1  ;;  %v2951_v23 = vsel %vm6685_vm10, 0, %v6814_v62  ;;  %v3382_v8 = vand.u32 2147483647, %v6516_v5 }
 0x52e   : > { %4263 = vsinq.f32 %v2846_v60  ;;  %v3046_v35 = vand.u32 2147483647, %v3045_v27  ;;  %v3048_v13 = vcvt.s32.f32 %v3041_v30  ;;  %v3400_v22 = vshrl.u32 %v7225_v32, %v6698_v55 }
 0x52f   : > { %v3052_v42 = vsub.s32 4, %v6734_v2  ;;  %v3229_v9 = vmul.u32 %v3222_v28, %v3213_v39  ;;  %vm3231_vm1 = vc.u32 %v6844_v37, %v6846_v59  ;;  %v3232_v49 = vadd.s32 1, %v6847_v33 }
 0x530   : > { %v3049_v1 = vmul.f32 %v3048_v13, %v3046_v35  ;;  %v3399_v52 = vshll.u32 %v7224_v17, %v6673_v54  ;;  %v3402_v62 = vshll.u32 %v7225_v32, %v6673_v54  ;;  %v3403_v44 = vshrl.u32 %v7222_v7, %v6698_v55 }
 0x531   : > { %v3233_v15 = vsel %vm3231_vm1, %v3232_v49, %v6847_v33  ;;  %v3389_v10 = vand.u32 8388607, %v3382_v8  ;;  %v3405_v56 = vshll.u32 %v7222_v7, %v6673_v54  ;;  %v3406_v53 = vshrl.u32 %v7226_v46, %v6698_v55 }
 0x532   : > { %v3050_v19 = vxor.u32 2147483648, %v3049_v1  ;;  %v3234_v28 = vadd.s32 %v3233_v15, %v3229_v9  ;;  %v3401_v60 = vor.u32 %v3400_v22, %v3399_v52  ;;  %v3404_v30 = vor.u32 %v3403_v44, %v3402_v62 }
 0x533   : > { %v6884_v24 = vand.u32 3, %v2851_v25  ;;  %v2754_v43 = vxor.u32 2147483648, %v6744_v6  ;;  %v2955_v4 = vadd.s32 3, %v2951_v23  ;;  %v3407_v16 = vor.u32 %v3406_v53, %v3405_v56 }
 0x534   : > { %v3051_v33 = vsel %vm2968_vm6, %v3050_v19, %v3049_v1  ;;  %v3053_v54 = vsel %vm2968_vm6, %v3052_v42, %v6734_v2  ;;  %vm2750_vm9 = vcmp.eq.s32.totalorder %v6859_v40, 0  ;;  %vm2753_vm10 = vcmp.eq.s32.totalorder %v6859_v40, 2 }
 0x535   : > { %v2959_v27 = vxor.u32 2147483648, %v6779_v11  ;;  %v3235_v39 = vadd.s32 536870912, %v3234_v28  ;;  %v3054_v25 = vsel %vm6852_vm8, %v6312_v63, %v3051_v33  ;;  %v3390_v23 = vor.u32 8388608, %v3389_v10 }
 0x536   : > { %vm3414_vm11 = vcmp.lt.s32.totalorder %v6721_v12, 1  ;;  %vm3416_vm13 = vcmp.lt.s32.totalorder %v6721_v12, 3  ;;  %4265 = vcosq.f32 %v3054_v25  ;;  %vm2854_vm14 = vcmp.eq.s32.totalorder %v6884_v24, 0 }
 0x537   : > { %v6900_v35 = vshrl.u32 %v3235_v39, 30  ;;  %v3422_v2 = vsel %vm3414_vm11, %v3401_v60, %v3404_v30  ;;  %v3424_v13 = vsel %vm3416_vm13, %v3407_v16, %v6774_v47  ;;  %v4262_v22 = vpop.eup %4261  ;;  %v3055_v42 = vsel %vm6852_vm8, 0, %v3053_v54 }
 0x538   : > { %4267 = vsinq.f32 %v3054_v25  ;;  %v2956_v9 = vand.u32 3, %v2955_v4  ;;  %v3398_v49 = vshrl.u32 %v7224_v17, %v6698_v55  ;;  %v4264_v1 = vpop.eup %4263  ;;  %vm3415_vm15 = vcmp.lt.s32.totalorder %v6721_v12, 2 }
 0x539   : > { %v3237_v52 = vshll.u32 %v6900_v35, 30  ;;  %v3426_v62 = vsel %vm3414_vm11, %v3404_v30, %v3407_v16  ;;  %v3428_v47 = vsel %vm3416_vm13, %v6738_v61, %v6786_v18  ;;  %v3419_v3 = vsel %vm3417_vm5, %v3407_v16, 2102212464 }
 0x53a   : > { %v3425_v44 = vsel %vm3415_vm15, %v3422_v2, %v3424_v13  ;;  %v3429_v55 = vsel %vm3415_vm15, %v3426_v62, %v3428_v47  ;;  %v3430_v15 = vshll.u32 %v3390_v23, 8  ;;  %vm2853_vm4 = vcmp.lt.s32.totalorder %v6884_v24, 2 }
 0x53b   : > { %v2858_v10 = vxor.u32 2147483648, %v4262_v22  ;;  %v3059_v56 = vadd.s32 3, %v3055_v42  ;;  %v2962_v53 = vxor.u32 2147483648, %v6767_v58  ;;  %v6928_v19 = vsub.s32 %v3234_v28, %v3237_v52 }
 0x53c   : > { %v2855_v4 = vxor.u32 2147483648, %v4264_v1  ;;  %v3418_v61 = vsel %vm3414_vm11, %v3398_v49, %v3401_v60  ;;  %v6932_v18 = vmul.u32.u64.low %v3430_v15, %v3429_v55  ;;  %v6933_v16 = vmul.u32.u64.high %v3430_v15, %v3429_v55, %v6932_v18 }
 0x53d   : > { %vm2954_vm5 = vweird.f32 %v6237_v41  ;;  %v3240_v33 = vsub.s32 0, %v6928_v19  ;;  %v3420_v54 = vsel %vm3416_vm13, %v3404_v30, %v3419_v3  ;;  %vm2850_vm0 = vweird.f32 %v6249_v36 }
 0x53e   : > { %v6939_v39 = vmul.u32.u64.low %v3430_v15, %v3425_v44  ;;  %v6940_v25 = vmul.u32.u64.high %v3430_v15, %v3425_v44, %v6939_v39  ;;  %vm3058_vm2 = vweird.f32 %v6312_v63  ;;  %v2752_v28 = vsel %vm2750_vm9, %v6744_v6, %v2751_v26 }
 0x53f   : > { %v2755_v60 = vsel %vm2753_vm10, %v2754_v43, %v6753_v14  ;;  %vm2958_vm7 = vcmp.eq.s32.totalorder %v2956_v9, 0  ;;  %vm2961_vm3 = vcmp.eq.s32.totalorder %v2956_v9, 2  ;;  %v3060_v30 = vand.u32 3, %v3059_v56 }
 0x540   : > { %v2960_v23 = vsel %vm2958_vm7, %v6767_v58, %v2959_v27  ;;  %v2963_v2 = vsel %vm2961_vm3, %v2962_v53, %v6779_v11  ;;  %v3990_v13 = vmin.u32 %v3240_v33, %v6928_v19  ;;  %vm2857_vm6 = vcmp.eq.s32.totalorder %v6884_v24, 2  ;;  %v4266_v26 = vpop.eup %4265 }
 0x541   : > { %vm2749_vm8 = vcmp.lt.s32.totalorder %v6859_v40, 2  ;;  %vm2957_vm1 = vcmp.lt.s32.totalorder %v2956_v9, 2  ;;  %v3421_v6 = vsel %vm3415_vm15, %v3418_v61, %v3420_v54  ;;  %v2856_v14 = vsel %vm2854_vm14, %v4262_v22, %v2855_v4 }
 0x542   : > { %v2859_v43 = vsel %vm2857_vm6, %v2858_v10, %v4264_v1  ;;  %v3242_v42 = vclz %v3990_v13  ;;  %vm3439_vm9 = vc.u32 %v6933_v16, %v6939_v39  ;;  %v4268_v58 = vpop.eup %4267  ;;  %v3066_v11 = vxor.u32 2147483648, %v4266_v26 }
 0x543   : > { %v2756_v27 = vsel %vm2749_vm8, %v2752_v28, %v2755_v60  ;;  %v2964_v49 = vsel %vm2957_vm1, %v2960_v23, %v2963_v2  ;;  %v3440_v52 = vadd.s32 1, %v6940_v25  ;;  %v3063_v40 = vxor.u32 2147483648, %v4268_v58 }
 0x544   : > { %vm3065_vm10 = vcmp.eq.s32.totalorder %v3060_v30, 2  ;;  %v3991_v9 = vadd.s32 4294967294, %v3242_v42  ;;  %v3437_v12 = vmul.u32 %v3430_v15, %v3421_v6  ;;  %v2860_v62 = vsel %vm2853_vm4, %v2856_v14, %v2859_v43 }
 0x545   : > { %vm3062_vm11 = vcmp.eq.s32.totalorder %v3060_v30, 0  ;;  %v3067_v22 = vsel %vm3065_vm10, %v3066_v11, %v4268_v58  ;;  %v3441_v1 = vsel %vm3439_vm9, %v3440_v52, %v6940_v25  ;;  %vm3061_vm13 = vcmp.lt.s32.totalorder %v3060_v30, 2 }
 0x546   : > { %v3064_v47 = vsel %vm3062_vm11, %v4266_v26, %v3063_v40  ;;  %vm3992_vm14 = vcmp.lt.s32.totalorder %v3991_v9, 0  ;;  %v3442_v3 = vadd.s32 %v3441_v1, %v3437_v12  ;;  %vm2746_vm15 = vweird.f32 %v6230_v29 }
 0x547   : > { %v3068_v44 = vsel %vm3061_vm13, %v3064_v47, %v3067_v22  ;;  %v2965_v55 = vsel %vm2954_vm5, nan, %v2964_v49  ;;  %v3245_v10 = vsel %vm3992_vm14, 0, %v3991_v9  ;;  %v2861_v15 = vsel %vm2850_vm0, nan, %v2860_v62  ;;  %v7300_v62 = vld [vmem:[#allocation2_spill] sm:$0xff] }
 0x548   : > { %v3069_v24 = vsel %vm3058_vm2, nan, %v3068_v44  ;;  %v3246_v56 = vsub.s32 32, %v3245_v10  ;;  %v3250_v53 = vsub.s32 4294967266, %v3245_v10  ;;  %v2757_v61 = vsel %vm2746_vm15, nan, %v2756_v27 }
 0x549   : > { %v4057_v4 = vpack.c.bf16 %v3069_v24, %v2861_v15  ;;  %v3230_v18 = vadd.s32 %v6846_v59, %v6844_v37  ;;  %v3443_v33 = vadd.s32 536870912, %v3442_v3  ;;  %v7294_v29 = vshll.u32 %v6528_v21, %v6671_v20 }
 0x54a   : > { %v4059_v54 = vpack.c.bf16 %v2965_v55, %v2757_v61  ;;  %v3251_v25 = vadd.s32 127, %v3250_v53  ;;  %v3351_v36 = vshll.u32 %v6581_v38, %v6713_v31  ;;  %v7295_v63 = vshll.u32 %v6749_v48, 23 }
 0x54b   : > { %v3145_v41 = vor.u32 %v6755_v0, %v7294_v29  ;;  %4058 = vmatprep.subr.bf16.mxu1 %v4057_v4  ;;  %v3248_v60 = vshrl.u32 %v3230_v18, %v3246_v56  ;;  %v6985_v30 = vshrl.u32 %v3443_v33, 30  ;;  %v3150_v59 = vand.u32 2147483647, %v6769_v34 }
 0x54c   : > { %v3357_v28 = vor.u32 4788187, %v7295_v63  ;;  %4060 = vmatpush1.bf16.msra.mxu1 %v4059_v54  ;;  %v3252_v37 = vshll.u32 %v3251_v25, 23  ;;  %v3353_v21 = vor.u32 %v6781_v50, %v3351_v36  ;;  %v3247_v20 = vshll.u32 %v6928_v19, %v3245_v10  ;;  %v7296_v19 = vld [vmem:[#allocation3_spill] sm:$0xff] }
 0x54d   : > { %v3445_v0 = vshll.u32 %v6985_v30, 30  ;;  %v3152_v2 = vcvt.s32.f32 %v3145_v41  ;;  %vm3072_vm4 = vcmp.lt.s32.totalorder %v7296_v19, 0  ;;  %v7297_v9 = vand.u32 2147483647, %v7296_v19 }
 0x54e   : > { %v3253_v23 = vor.u32 4788187, %v3252_v37  ;;  %v3358_v38 = vand.u32 2147483647, %v3357_v28  ;;  %v3249_v31 = vor.u32 %v3248_v60, %v3247_v20  ;;  %v3360_v6 = vcvt.s32.f32 %v3353_v21 }
 0x54f   : > { %v3446_v48 = vsub.s32 %v3442_v3, %v3445_v0  ;;  %v3153_v13 = vmul.f32 %v3152_v2, %v3150_v59  ;;  %vm6996_vm0 = vcmp.le.f32.partialorder %v7297_v9, 0.7853982  ;;  %vm3280_vm2 = vcmp.lt.s32.totalorder %v7300_v62, 0 }
 0x550   : > { %v3254_v26 = vand.u32 2147483647, %v3253_v23  ;;  %v3361_v43 = vmul.f32 %v3360_v6, %v3358_v38  ;;  %v3256_v42 = vcvt.s32.f32 %v3249_v31  ;;  %v3438_v47 = vadd.s32 %v6939_v39, %v6933_v16 }
 0x551   : > { %v3448_v14 = vsub.s32 0, %v3446_v48  ;;  %v3154_v11 = vxor.u32 2147483648, %v3153_v13  ;;  %v7301_v10 = vand.u32 2147483647, %v7300_v62  ;;  %vm3176_vm3 = vcmp.lt.s32.totalorder %v6411_v51, 0 }
 0x552   : > { %v3257_v34 = vmul.f32 %v3256_v42, %v3254_v26  ;;  %v3362_v50 = vxor.u32 2147483648, %v3361_v43  ;;  %v7304_v4 = vand.u32 2147483647, %v6411_v51  ;;  %v3364_v54 = vsub.s32 4, %v6538_v57 }
 0x553   : > { %v3998_v58 = vmin.u32 %v3448_v14, %v3446_v48  ;;  %v3155_v52 = vsel %vm3072_vm4, %v3154_v11, %v3153_v13  ;;  %vm7010_vm7 = vcmp.le.f32.partialorder %v7301_v10, 0.7853982  ;;  %v3260_v25 = vsub.s32 4, %v6900_v35 }
 0x554   : > { %v3258_v40 = vxor.u32 2147483648, %v3257_v34  ;;  %v3363_v1 = vsel %vm3280_vm2, %v3362_v50, %v3361_v43  ;;  %v3158_v55 = vsel %vm6996_vm0, %v7296_v19, %v3155_v52  ;;  %vm7022_vm6 = vcmp.le.f32.partialorder %v7304_v4, 0.7853982 }
 0x555   : > { %v3450_v27 = vclz %v3998_v58  ;;  %v3366_v39 = vsel %vm7010_vm7, %v7300_v62, %v3363_v1  ;;  %4269 = vcosq.f32 %v3158_v55  ;;  %v3156_v28 = vsub.s32 4, %v6496_v45 }
 0x556   : > { %v3259_v24 = vsel %vm3176_vm3, %v3258_v40, %v3257_v34  ;;  %4271 = vcosq.f32 %v3366_v39  ;;  %v3468_v37 = vsub.s32 4, %v6985_v30  ;;  %v3365_v59 = vsel %vm3280_vm2, %v3364_v54, %v6538_v57 }
 0x557   : > { %v3999_v49 = vadd.s32 4294967294, %v3450_v27  ;;  %v3262_v29 = vsel %vm7022_vm6, %v6411_v51, %v3259_v24  ;;  %4273 = vsinq.f32 %v3366_v39  ;;  %v3261_v21 = vsel %vm3176_vm3, %v3260_v25, %v6900_v35 }
 0x558   : > { %4275 = vcosq.f32 %v3262_v29  ;;  %v3157_v0 = vsel %vm3072_vm4, %v3156_v28, %v6496_v45  ;;  %vm3384_vm8 = vcmp.lt.s32.totalorder %v6516_v5, 0  ;;  %v3367_v23 = vsel %vm7010_vm7, 0, %v3365_v59 }
 0x559   : > { %vm4000_vm5 = vcmp.lt.s32.totalorder %v3999_v49, 0  ;;  %4277 = vsinq.f32 %v3262_v29  ;;  %v3263_v2 = vsel %vm7022_vm6, 0, %v3261_v21  ;;  %vm7049_vm1 = vcmp.le.f32.partialorder %v3382_v8, 0.7853982 }
 0x55a   : > { %v3453_v22 = vsel %vm4000_vm5, 0, %v3999_v49  ;;  %4279 = vsinq.f32 %v3158_v55  ;;  %v3469_v38 = vsel %vm3384_vm8, %v3468_v37, %v6985_v30  ;;  %v3371_v6 = vadd.s32 3, %v3367_v23 }
 0x55b   : > { %v3454_v3 = vsub.s32 32, %v3453_v22  ;;  %v3458_v44 = vsub.s32 4294967266, %v3453_v22  ;;  %v3455_v56 = vshll.u32 %v3446_v48, %v3453_v22  ;;  %v3159_v48 = vsel %vm6996_vm0, 0, %v3157_v0 }
 0x55c   : > { %v3267_v14 = vadd.s32 3, %v3263_v2  ;;  %v3471_v8 = vsel %vm7049_vm1, 0, %v3469_v38  ;;  %v3163_v42 = vadd.s32 3, %v3159_v48  ;;  %v3372_v34 = vand.u32 3, %v3371_v6 }
 0x55d   : > { %v3456_v53 = vshrl.u32 %v3438_v47, %v3454_v3  ;;  %v3459_v16 = vadd.s32 127, %v3458_v44  ;;  %v3475_v11 = vadd.s32 3, %v3471_v8  ;;  %vm3370_vm6 = vweird.f32 %v7300_v62 }
 0x55e   : > { %v3268_v27 = vand.u32 3, %v3267_v14  ;;  %v3164_v9 = vand.u32 3, %v3163_v42  ;;  %vm3374_vm9 = vcmp.eq.s32.totalorder %v3372_v34, 0  ;;  %vm3377_vm10 = vcmp.eq.s32.totalorder %v3372_v34, 2 }
 0x55f   : > { %v3457_v18 = vor.u32 %v3456_v53, %v3455_v56  ;;  %v3460_v33 = vshll.u32 %v3459_v16, 23  ;;  %v4270_v31 = vpop.eup %4269  ;;  %v3476_v1 = vand.u32 3, %v3475_v11  ;;  %vm3373_vm4 = vcmp.lt.s32.totalorder %v3372_v34, 2 }
 0x560   : > { %v4272_v13 = vpop.eup %4271  ;;  %v3170_v22 = vxor.u32 2147483648, %v4270_v31  ;;  %vm3270_vm11 = vcmp.eq.s32.totalorder %v3268_v27, 0  ;;  %vm3273_vm13 = vcmp.eq.s32.totalorder %v3268_v27, 2  ;;  %vm3166_vm14 = vcmp.eq.s32.totalorder %v3164_v9, 0 }
 0x561   : > { %v3461_v41 = vor.u32 4788187, %v3460_v33  ;;  %v3464_v63 = vcvt.s32.f32 %v3457_v18  ;;  %v4274_v26 = vpop.eup %4273  ;;  %v3378_v49 = vxor.u32 2147483648, %v4272_v13  ;;  %vm3169_vm15 = vcmp.eq.s32.totalorder %v3164_v9, 2 }
 0x562   : > { %v4276_v43 = vpop.eup %4275  ;;  %v3375_v50 = vxor.u32 2147483648, %v4274_v26  ;;  %vm3269_vm5 = vcmp.lt.s32.totalorder %v3268_v27, 2  ;;  %vm3481_vm0 = vcmp.eq.s32.totalorder %v3476_v1, 2  ;;  %vm3478_vm2 = vcmp.eq.s32.totalorder %v3476_v1, 0 }
 0x563   : > { %v3462_v36 = vand.u32 2147483647, %v3461_v41  ;;  %v4278_v30 = vpop.eup %4277  ;;  %v3274_v40 = vxor.u32 2147483648, %v4276_v43  ;;  %v3379_v3 = vsel %vm3377_vm10, %v3378_v49, %v4274_v26  ;;  %vm3165_vm7 = vcmp.lt.s32.totalorder %v3164_v9, 2 }
 0x564   : > { %v4280_v58 = vpop.eup %4279  ;;  %v3271_v52 = vxor.u32 2147483648, %v4278_v30  ;;  %v3376_v47 = vsel %vm3374_vm9, %v4272_v13, %v3375_v50  ;;  %vm3477_vm3 = vcmp.lt.s32.totalorder %v3476_v1, 2  ;;  %vm3162_vm9 = vweird.f32 %v7296_v19 }
 0x565   : > { %v3465_v60 = vmul.f32 %v3464_v63, %v3462_v36  ;;  %v3167_v12 = vxor.u32 2147483648, %v4280_v58  ;;  %v3275_v10 = vsel %vm3273_vm13, %v3274_v40, %v4278_v30  ;;  %v3171_v53 = vsel %vm3169_vm15, %v3170_v22, %v4280_v58 }
 0x566   : > { %v3272_v55 = vsel %vm3270_vm11, %v4276_v43, %v3271_v52  ;;  %v3380_v39 = vsel %vm3373_vm4, %v3376_v47, %v3379_v3  ;;  %v7309_v52 = vmov 920167782   ;;  %v7310_v3 = vmov 1326507024  }
 0x567   : > { %v3466_v20 = vxor.u32 2147483648, %v3465_v60  ;;  %v3168_v56 = vsel %vm3166_vm14, %v4270_v31, %v3167_v12  ;;  %v3276_v4 = vsel %vm3269_vm5, %v3272_v55, %v3275_v10  ;;  %v3381_v41 = vsel %vm3370_vm6, nan, %v3380_v39 }
 0x568   : > { %v3172_v33 = vsel %vm3165_vm7, %v3168_v56, %v3171_v53 }
 0x569   : > { %v3467_v35 = vsel %vm3384_vm8, %v3466_v20, %v3465_v60  ;;  %vm3266_vm8 = vweird.f32 %v6411_v51  ;;  %v3173_v63 = vsel %vm3162_vm9, nan, %v3172_v33  ;;  %v3486_v60 = vld [vmem:[%s7164_s7] sm:$0x7]  ;;  %v3491_v51 = vpop.permute.xlu0 %3490 }
 0x56a   : > { %v3470_v45 = vsel %vm7049_vm1, %v6516_v5, %v3467_v35  ;;  %vm3474_vm1 = vweird.f32 %v6516_v5  ;;  %v3277_v54 = vsel %vm3266_vm8, nan, %v3276_v4  ;;  %v4063_v28 = vpack.c.bf16 %v3381_v41, %v3173_v63 }
 0x56b   : > { %4281 = vcosq.f32 %v3470_v45 }
 0x56c   : > { %4283 = vsinq.f32 %v3470_v45 }
 0x575   : > { %v4282_v44 = vpop.eup %4281 }
 0x576   : > { %v4284_v15 = vpop.eup %4283  ;;  %v3482_v24 = vxor.u32 2147483648, %v4282_v44 }
 0x577   : > { %v3479_v16 = vxor.u32 2147483648, %v4284_v15 }
 0x578   : > { %v3483_v61 = vsel %vm3481_vm0, %v3482_v24, %v4284_v15 }
 0x579   : > { %v3480_v18 = vsel %vm3478_vm2, %v4282_v44, %v3479_v16 }
 0x57a   : > { %v3484_v29 = vsel %vm3477_vm3, %v3480_v18, %v3483_v61 }
 0x57b   : > { %v3485_v25 = vsel %vm3474_vm1, nan, %v3484_v29 }
 0x57c   : > { %v4061_v36 = vpack.c.bf16 %v3485_v25, %v3277_v54 }
 0x57e   : > { %4062 = vmatprep.subr.bf16.mxu1 %v4061_v36 }
 0x57f   : > { %4064 = vmatpush1.bf16.msra.mxu1 %v4063_v28 }
 0x582   : > { %4001 = vmatmul.mubr.msk.f32.vlgmr.msra.gmra.mrb[16].mxu1 %vm1457_vm12, %v3486_v60 }
 0x655   : > { %v3562_v62 = vpop.f32.mrb[16].mxu1 }
 0x656   : > { %v7069_v5 = vadd.f32 %v3562_v62, %v3491_v51  ;;  %v3564_v37 = vpop.f32.mrb[17].mxu1 }
 0x657   : > { %v7071_v59 = vadd.f32 %v3564_v37, %v3491_v51 }
 0x658   : > { %v3567_v19 = vand.u32 2147483647, %v7069_v5  ;;  %v3570_v21 = vand.u32 2139095040, %v7069_v5  ;;  %vm3569_vm1 = vcmp.lt.s32.totalorder %v7069_v5, 0 }
 0x659   : > { %v3674_v20 = vand.u32 2139095040, %v7071_v59  ;;  %v3671_v2 = vand.u32 2147483647, %v7071_v59 }
 0x65a   : > { %v3571_v0 = vshrl.u32 %v3570_v21, 23  ;;  %v3574_v23 = vand.u32 8388607, %v3567_v19  ;;  %vm3568_vm9 = vcmp.le.f32.partialorder %v3567_v19, 0.7853982 }
 0x65b   : > { %v3675_v57 = vshrl.u32 %v3674_v20, 23  ;;  %v3678_v48 = vand.u32 8388607, %v3671_v2 }
 0x65c   : > { %v4002_v35 = vadd.s32 4294967169, %v3571_v0  ;;  %v3575_v45 = vor.u32 8388608, %v3574_v23 }
 0x65d   : > { %v4006_v38 = vadd.s32 4294967169, %v3675_v57  ;;  %v3679_v42 = vor.u32 8388608, %v3678_v48 }
 0x65e   : > { %v3577_v31 = vadd.s32 1, %v4002_v35  ;;  %v7081_v43 = vshll.u32 %v3575_v45, 8 }
 0x65f   : > { %v3681_v13 = vadd.s32 1, %v4006_v38  ;;  %v3719_v48 = vshll.u32 %v3679_v42, 8 }
 0x660   : > { %vm3578_vm12 = vcmp.gt.s32.totalorder %v3577_v31, 0 }
 0x661   : > { %v3579_v6 = vsel %vm3578_vm12, %v3577_v31, 0  ;;  %vm3682_vm10 = vcmp.gt.s32.totalorder %v3681_v13, 0  ;;  %vm3673_vm12 = vcmp.lt.s32.totalorder %v7071_v59, 0 }
 0x662   : > { %v3580_v26 = vshrl.u32 %v3579_v6, 5  ;;  %v3581_v14 = vand.u32 31, %v3579_v6  ;;  %v3683_v8 = vsel %vm3682_vm10, %v3681_v13, 0  ;;  %vm3672_vm10 = vcmp.le.f32.partialorder %v3671_v2, 0.7853982 }
 0x663   : > { %v7084_v11 = vshrl.u32 %v3683_v8, 5  ;;  %v3685_v34 = vand.u32 31, %v3683_v8 }
 0x664   : > { %v3582_v30 = vsub.s32 32, %v3581_v14  ;;  %v3584_v58 = vshll.u32 %v7224_v17, %v3581_v14  ;;  %v3587_v27 = vshll.u32 %v7225_v32, %v3581_v14  ;;  %v3590_v50 = vshll.u32 %v7222_v7, %v3581_v14 }
 0x665   : > { %v3593_v49 = vshll.u32 %v7226_v46, %v3581_v14  ;;  %v3596_v40 = vshll.u32 %v7309_v52, %v3581_v14  ;;  %vm3599_vm11 = vcmp.lt.s32.totalorder %v3580_v26, 1  ;;  %vm3600_vm13 = vcmp.lt.s32.totalorder %v3580_v26, 2 }
 0x666   : > { %v3585_v9 = vshrl.u32 %v7225_v32, %v3582_v30  ;;  %v3588_v12 = vshrl.u32 %v7222_v7, %v3582_v30  ;;  %v3591_v22 = vshrl.u32 %v7226_v46, %v3582_v30  ;;  %v3583_v1 = vshrl.u32 %v7224_v17, %v3582_v30 }
 0x667   : > { %v3594_v47 = vshrl.u32 %v7309_v52, %v3582_v30  ;;  %v3597_v44 = vshrl.u32 %v7310_v3, %v3582_v30  ;;  %v3686_v24 = vsub.s32 32, %v3685_v34  ;;  %vm3601_vm14 = vcmp.lt.s32.totalorder %v3580_v26, 3 }
 0x668   : > { %v3586_v55 = vor.u32 %v3585_v9, %v3584_v58  ;;  %v3589_v10 = vor.u32 %v3588_v12, %v3587_v27  ;;  %v3592_v15 = vor.u32 %v3591_v22, %v3590_v50  ;;  %vm3602_vm15 = vcmp.lt.s32.totalorder %v3580_v26, 4 }
 0x669   : > { %v3595_v56 = vor.u32 %v3594_v47, %v3593_v49  ;;  %v3598_v53 = vor.u32 %v3597_v44, %v3596_v40  ;;  %v3688_v41 = vshll.u32 %v7224_v17, %v3685_v34  ;;  %v3689_v36 = vshrl.u32 %v7225_v32, %v3686_v24 }
 0x66a   : > { %v3603_v16 = vsel %vm3599_vm11, %v3583_v1, %v3586_v55  ;;  %v3604_v39 = vsel %vm3602_vm15, %v3592_v15, 2102212464  ;;  %v3607_v4 = vsel %vm3599_vm11, %v3586_v55, %v3589_v10  ;;  %v3611_v61 = vsel %vm3599_vm11, %v3589_v10, %v3592_v15 }
 0x66b   : > { %v3605_v18 = vsel %vm3601_vm14, %v3589_v10, %v3604_v39  ;;  %v3608_v33 = vsel %vm3602_vm15, %v3595_v56, 920167782  ;;  %v3612_v29 = vsel %vm3602_vm15, %v3598_v53, 1326507024  ;;  %v3691_v63 = vshll.u32 %v7225_v32, %v3685_v34 }
 0x66c   : > { %v3609_v54 = vsel %vm3601_vm14, %v3592_v15, %v3608_v33  ;;  %v3613_v25 = vsel %vm3601_vm14, %v3595_v56, %v3612_v29  ;;  %v3606_v28 = vsel %vm3600_vm13, %v3603_v16, %v3605_v18  ;;  %v3692_v62 = vshrl.u32 %v7222_v7, %v3686_v24 }
 0x66d   : > { %v3610_v60 = vsel %vm3600_vm13, %v3607_v4, %v3609_v54  ;;  %v3614_v51 = vsel %vm3600_vm13, %v3611_v61, %v3613_v25  ;;  %v3690_v23 = vor.u32 %v3689_v36, %v3688_v41  ;;  %v3694_v32 = vshll.u32 %v7222_v7, %v3685_v34 }
 0x66e   : > { %v7107_v37 = vmul.u32.u64.low %v7081_v43, %v3614_v51  ;;  %v7108_v21 = vmul.u32.u64.high %v7081_v43, %v3614_v51, %v7107_v37  ;;  %v7111_v20 = vmul.u32.u64.low %v7081_v43, %v3610_v60  ;;  %v7112_v0 = vmul.u32.u64.high %v7081_v43, %v3610_v60, %v7111_v20 }
 0x66f   : > { %v3693_v57 = vor.u32 %v3692_v62, %v3691_v63  ;;  %v3695_v35 = vshrl.u32 %v7226_v46, %v3686_v24  ;;  %v3697_v38 = vshll.u32 %v7226_v46, %v3685_v34  ;;  %v3698_v31 = vshrl.u32 %v7309_v52, %v3686_v24 }
 0x670   : > { %v3701_v45 = vshrl.u32 %v7310_v3, %v3686_v24  ;;  %v3622_v13 = vmul.u32 %v7081_v43, %v3606_v28  ;;  %v3687_v6 = vshrl.u32 %v7224_v17, %v3686_v24  ;;  %v3700_v14 = vshll.u32 %v7309_v52, %v3685_v34 }
 0x671   : > { %v3696_v26 = vor.u32 %v3695_v35, %v3694_v32  ;;  %vm3624_vm4 = vc.u32 %v7108_v21, %v7111_v20  ;;  %v3625_v7 = vadd.s32 1, %v7112_v0  ;;  %v3699_v8 = vor.u32 %v3698_v31, %v3697_v38 }
 0x672   : > { %vm3703_vm5 = vcmp.lt.s32.totalorder %v7084_v11, 1  ;;  %v3702_v46 = vor.u32 %v3701_v45, %v3700_v14  ;;  %vm3705_vm0 = vcmp.lt.s32.totalorder %v7084_v11, 3  ;;  %vm3706_vm2 = vcmp.lt.s32.totalorder %v7084_v11, 4 }
 0x673   : > { %v3711_v42 = vsel %vm3703_vm5, %v3690_v23, %v3693_v57  ;;  %v3626_v43 = vsel %vm3624_vm4, %v3625_v7, %v7112_v0  ;;  %v3708_v30 = vsel %vm3706_vm2, %v3696_v26, 2102212464  ;;  %v3712_v17 = vsel %vm3706_vm2, %v3699_v8, 920167782 }
 0x674   : > { %v3715_v58 = vsel %vm3703_vm5, %v3693_v57, %v3696_v26  ;;  %v3627_v27 = vadd.s32 %v3626_v43, %v3622_v13  ;;  %vm3704_vm7 = vcmp.lt.s32.totalorder %v7084_v11, 2  ;;  %v3713_v34 = vsel %vm3705_vm0, %v3696_v26, %v3712_v17 }
 0x675   : > { %v3716_v50 = vsel %vm3706_vm2, %v3702_v46, 1326507024  ;;  %v3707_v49 = vsel %vm3703_vm5, %v3687_v6, %v3690_v23  ;;  %v3709_v52 = vsel %vm3705_vm0, %v3693_v57, %v3708_v30  ;;  %v3714_v40 = vsel %vm3704_vm7, %v3711_v42, %v3713_v34 }
 0x676   : > { %v3717_v9 = vsel %vm3705_vm0, %v3699_v8, %v3716_v50  ;;  %v3628_v12 = vadd.s32 536870912, %v3627_v27  ;;  %v7129_v1 = vmul.u32.u64.low %v3719_v48, %v3714_v40  ;;  %v7130_v47 = vmul.u32.u64.high %v3719_v48, %v3714_v40, %v7129_v1 }
 0x677   : > { %v3718_v22 = vsel %vm3704_vm7, %v3715_v58, %v3717_v9  ;;  %v3710_v10 = vsel %vm3704_vm7, %v3707_v49, %v3709_v52  ;;  %v3623_v63 = vadd.s32 %v7111_v20, %v7108_v21  ;;  %vm3659_vm15 = vweird.f32 %v7069_v5 }
 0x678   : > { %v7132_v3 = vmul.u32.u64.low %v3719_v48, %v3718_v22  ;;  %v7133_v44 = vmul.u32.u64.high %v3719_v48, %v3718_v22, %v7132_v3  ;;  %v3629_v55 = vshrl.u32 %v3628_v12, 30  ;;  %v3729_v24 = vadd.s32 1, %v7130_v47 }
 0x679   : > { %v3726_v11 = vmul.u32 %v3719_v48, %v3710_v10  ;;  %vm3763_vm2 = vweird.f32 %v7071_v59 }
 0x67a   : > { %v3630_v15 = vshll.u32 %v3629_v55, 30  ;;  %vm3728_vm3 = vc.u32 %v7133_v44, %v7129_v1  ;;  %v3727_v13 = vadd.s32 %v7129_v1, %v7133_v44  ;;  %v3653_v20 = vsub.s32 4, %v3629_v55 }
 0x67b   : > { %v3730_v53 = vsel %vm3728_vm3, %v3729_v24, %v7130_v47 }
 0x67c   : > { %v3631_v56 = vsub.s32 %v3627_v27, %v3630_v15  ;;  %v3731_v16 = vadd.s32 %v3730_v53, %v3726_v11  ;;  %v3654_v17 = vsel %vm3569_vm1, %v3653_v20, %v3629_v55 }
 0x67d   : > { %v3656_v34 = vsel %vm3568_vm9, 0, %v3654_v17 }
 0x67e   : > { %v3633_v39 = vsub.s32 0, %v3631_v56  ;;  %v3732_v4 = vadd.s32 536870912, %v3731_v16  ;;  %v3660_v9 = vadd.s32 3, %v3656_v34 }
 0x680   : > { %v4003_v61 = vmin.u32 %v3633_v39, %v3631_v56  ;;  %v3733_v18 = vshrl.u32 %v3732_v4, 30  ;;  %v3661_v1 = vand.u32 3, %v3660_v9 }
 0x682   : > { %v3635_v33 = vclz %v4003_v61  ;;  %v3734_v29 = vshll.u32 %v3733_v18, 30  ;;  %v3757_v40 = vsub.s32 4, %v3733_v18  ;;  %vm3666_vm11 = vcmp.eq.s32.totalorder %v3661_v1, 2 }
 0x683   : > { %vm3663_vm13 = vcmp.eq.s32.totalorder %v3661_v1, 0  ;;  %vm3662_vm14 = vcmp.lt.s32.totalorder %v3661_v1, 2 }
 0x684   : > { %v4004_v41 = vadd.s32 4294967294, %v3635_v33  ;;  %v3735_v54 = vsub.s32 %v3731_v16, %v3734_v29  ;;  %v3758_v22 = vsel %vm3673_vm12, %v3757_v40, %v3733_v18 }
 0x685   : > { %v3760_v44 = vsel %vm3672_vm10, 0, %v3758_v22 }
 0x686   : > { %vm4005_vm6 = vcmp.lt.s32.totalorder %v4004_v41, 0  ;;  %v3737_v36 = vsub.s32 0, %v3735_v54  ;;  %v3764_v11 = vadd.s32 3, %v3760_v44 }
 0x687   : > { %v3638_v25 = vsel %vm4005_vm6, 0, %v4004_v41 }
 0x688   : > { %v3639_v28 = vsub.s32 32, %v3638_v25  ;;  %v3643_v60 = vsub.s32 4294967266, %v3638_v25  ;;  %v4007_v51 = vmin.u32 %v3737_v36, %v3735_v54  ;;  %v3640_v62 = vshll.u32 %v3631_v56, %v3638_v25 }
 0x689   : > { %v3765_v16 = vand.u32 3, %v3764_v11 }
 0x68a   : > { %v3641_v37 = vshrl.u32 %v3623_v63, %v3639_v28  ;;  %v3644_v0 = vadd.s32 127, %v3643_v60  ;;  %v3739_v23 = vclz %v4007_v51 }
 0x68b   : > { %vm3770_vm4 = vcmp.eq.s32.totalorder %v3765_v16, 2  ;;  %vm3767_vm5 = vcmp.eq.s32.totalorder %v3765_v16, 0  ;;  %vm3766_vm0 = vcmp.lt.s32.totalorder %v3765_v16, 2 }
 0x68c   : > { %v3642_v57 = vor.u32 %v3641_v37, %v3640_v62  ;;  %v3645_v32 = vshll.u32 %v3644_v0, 23  ;;  %v4008_v35 = vadd.s32 4294967294, %v3739_v23 }
 0x68e   : > { %v3646_v38 = vor.u32 4788187, %v3645_v32  ;;  %vm4009_vm8 = vcmp.lt.s32.totalorder %v4008_v35, 0  ;;  %v3649_v45 = vcvt.s32.f32 %v3642_v57 }
 0x68f   : > { %v3742_v48 = vsel %vm4009_vm8, 0, %v4008_v35 }
 0x690   : > { %v3647_v31 = vand.u32 2147483647, %v3646_v38  ;;  %v3743_v6 = vsub.s32 32, %v3742_v48  ;;  %v3747_v26 = vsub.s32 4294967266, %v3742_v48  ;;  %v3744_v14 = vshll.u32 %v3735_v54, %v3742_v48 }
 0x692   : > { %v3650_v21 = vmul.f32 %v3649_v45, %v3647_v31  ;;  %v3745_v7 = vshrl.u32 %v3727_v13, %v3743_v6  ;;  %v3748_v8 = vadd.s32 127, %v3747_v26 }
 0x694   : > { %v3651_v46 = vxor.u32 2147483648, %v3650_v21  ;;  %v3746_v42 = vor.u32 %v3745_v7, %v3744_v14  ;;  %v3749_v43 = vshll.u32 %v3748_v8, 23 }
 0x696   : > { %v3652_v30 = vsel %vm3569_vm1, %v3651_v46, %v3650_v21  ;;  %v3750_v27 = vor.u32 4788187, %v3749_v43  ;;  %v3753_v49 = vcvt.s32.f32 %v3746_v42 }
 0x697   : > { %v3655_v58 = vsel %vm3568_vm9, %v7069_v5, %v3652_v30 }
 0x698   : > { %4285 = vcosq.f32 %v3655_v58  ;;  %v3751_v50 = vand.u32 2147483647, %v3750_v27 }
 0x699   : > { %4287 = vsinq.f32 %v3655_v58 }
 0x69a   : > { %v3754_v52 = vmul.f32 %v3753_v49, %v3751_v50 }
 0x69c   : > { %v3755_v12 = vxor.u32 2147483648, %v3754_v52 }
 0x69e   : > { %v3756_v19 = vsel %vm3673_vm12, %v3755_v12, %v3754_v52 }
 0x69f   : > { %v3759_v47 = vsel %vm3672_vm10, %v7071_v59, %v3756_v19 }
 0x6a0   : > { %4289 = vcosq.f32 %v3759_v47 }
 0x6a1   : > { %4291 = vsinq.f32 %v3759_v47 }
 0x6a2   : > { %v4286_v3 = vpop.eup %4285 }
 0x6a3   : > { %v4288_v55 = vpop.eup %4287  ;;  %v3667_v10 = vxor.u32 2147483648, %v4286_v3 }
 0x6a4   : > { %v3664_v15 = vxor.u32 2147483648, %v4288_v55 }
 0x6a5   : > { %v3668_v24 = vsel %vm3666_vm11, %v3667_v10, %v4288_v55 }
 0x6a6   : > { %v3665_v56 = vsel %vm3663_vm13, %v4286_v3, %v3664_v15 }
 0x6a7   : > { %v3669_v2 = vsel %vm3662_vm14, %v3665_v56, %v3668_v24 }
 0x6a8   : > { %v3670_v53 = vsel %vm3659_vm15, nan, %v3669_v2 }
 0x6aa   : > { %v4290_v39 = vpop.eup %4289 }
 0x6ab   : > { %v4292_v4 = vpop.eup %4291  ;;  %v3771_v61 = vxor.u32 2147483648, %v4290_v39 }
 0x6ac   : > { %v3768_v18 = vxor.u32 2147483648, %v4292_v4 }
 0x6ad   : > { %v3772_v33 = vsel %vm3770_vm4, %v3771_v61, %v4292_v4 }
 0x6ae   : > { %v3769_v29 = vsel %vm3767_vm5, %v4290_v39, %v3768_v18 }
 0x6af   : > { %v3773_v41 = vsel %vm3766_vm0, %v3769_v29, %v3772_v33 }
 0x6b0   : > { %v3774_v5 = vsel %vm3763_vm2, nan, %v3773_v41 }
 0x6b1   : > { %v3777_v54 = vcombine.low %v3670_v53, %v3774_v5 }
 0x6b3   : > { %3779 = vst [vmem:[%s372_s21] sm:$0x77] %v3777_v54 }
 0x6b4 PF: > { %s19_s30 = sadd.s32 1, %s4299_s30  }
 0x6b5   : > { %p16_p4 = scmp.ge.s32.totalorder %s19_s30, 4  }
 0x6b7   :  { %18 = sbr.rel (!%p16_p4) target bundleno = 1 (0x1), region = 98 }

</bundles_post_ra>
